<compile_context>
chip_gen: v7x
topology: tpu7x:2x2x1
jax: 0.10.0
libtpu: 0.0.40
codegen_flags: <defaults>
</compile_context>

<pallas_src>
import jax
import jax.numpy as jnp
import numpy as np
from jax import lax
from jax.experimental import pallas as pl
from jax.experimental.pallas import tpu as pltpu


def _round_up(x, m):
    return (x + m - 1) // m * m


# ----------------------------------------------------------------------------
# Fused kernel: conv_layer(3x3)+LeakyReLU -> [confidence_head | reconstruction_head]
# ----------------------------------------------------------------------------
def _confidence_block_kernel(x_ref, w1_ref, b1_ref, wh_ref, bh_ref,
                             pre_ref, conf_ref, rec_ref,
                             xpad_ref, hpad_ref):
    # x_ref   : (1, Cin, H, W)       VMEM block
    # w1_ref  : (9*Cin*Cmid,)        SMEM, flat HWIO order (dy, dx, ci, co)
    # b1_ref  : (Cmid,)              SMEM
    # wh_ref  : (9*Cmid*Ch,)         SMEM, heads concatenated (conf | rec)
    # bh_ref  : (Ch,)                SMEM
    # pre_ref : (1, Cmid, H, W)      output (pre_confidence, post-LeakyReLU)
    # conf_ref: (1, 1, H, W)         output (confidence)
    # rec_ref : (1, 3, H, W)         output (reconstruction)
    # xpad_ref: (Cin,  H+2, Wp)      VMEM halo scratch, Wp = round_up(W+2, 128)
    # hpad_ref: (Cmid, H+2, Wp)      VMEM halo scratch
    f32 = jnp.float32
    Cin = x_ref.shape[1]
    H, W = x_ref.shape[2], x_ref.shape[3]
    Cmid = pre_ref.shape[1]
    n_conf = conf_ref.shape[1]
    n_rec = rec_ref.shape[1]
    Ch = n_conf + n_rec
    Wp = xpad_ref.shape[2]

    # Row-strip size: accumulators stay in vregs per strip.
    T = 8 if (H % 8 == 0 and H > 8) else H
    n_strips = H // T

    # ---- Stage 0a: zero only the 1-pixel halo border (every step, cheap,
    #      megacore-safe; interior is fully rewritten below). ----
    zrow_x = jnp.zeros((Cin, 1, Wp), f32)
    xpad_ref[:, 0:1, :] = zrow_x
    xpad_ref[:, H + 1:H + 2, :] = zrow_x
    zcol_x = jnp.zeros((Cin, H + 2, 1), f32)
    xpad_ref[:, :, 0:1] = zcol_x
    xpad_ref[:, :, W + 1:W + 2] = zcol_x

    zrow_h = jnp.zeros((Cmid, 1, Wp), f32)
    hpad_ref[:, 0:1, :] = zrow_h
    hpad_ref[:, H + 1:H + 2, :] = zrow_h
    zcol_h = jnp.zeros((Cmid, H + 2, 1), f32)
    hpad_ref[:, :, 0:1] = zcol_h
    hpad_ref[:, :, W + 1:W + 2] = zcol_h

    # ---- Stage 0b: interior halo copy, one vectorized store across channels. ----
    xpad_ref[:, 1:H + 1, 1:W + 1] = x_ref[0].astype(f32)

    # ---- Hoist all SMEM weight / bias scalar reads out of the strip loops. ----
    w1 = [w1_ref[i] for i in range(9 * Cin * Cmid)]
    b1 = [b1_ref[i] for i in range(Cmid)]
    wh = [wh_ref[i] for i in range(9 * Cmid * Ch)]
    bh = [bh_ref[i] for i in range(Ch)]

    def _strip_start(s):
        r0 = s * T
        if T % 8 == 0:
            r0 = pl.multiple_of(r0, 8)
        return r0

    # ---- Stage 1: conv_layer (Cin -> Cmid, 3x3 "same") + LeakyReLU(0.1). ----
    def stage1(s, carry):
        r0 = _strip_start(s)
        # two partial sums per output channel -> shorter dependent add chains
        acc = [[jnp.zeros((T, W), f32), jnp.zeros((T, W), f32)]
               for _ in range(Cmid)]
        term = 0
        for dx in range(3):                       # lane shift hoisted outermost
            for ci in range(Cin):
                # one shifted plane load per (ci, dx), reused for all 3 dy taps
                plane = xpad_ref[ci, pl.ds(r0, T + 2), dx:dx + W]   # (T+2, W)
                for dy in range(3):
                    patch = plane[dy:dy + T, :]
                    base = ((dy * 3 + dx) * Cin + ci) * Cmid
                    p = term & 1
                    for co in range(Cmid):
                        acc[co][p] = acc[co][p] + w1[base + co] * patch
                    term += 1
        for co in range(Cmid):
            hval = acc[co][0] + acc[co][1] + b1[co]
            hval = jnp.where(hval > 0, hval, 0.1 * hval)        # LeakyReLU(0.1)
            pre_ref[0, co, pl.ds(r0, T), :] = hval.astype(pre_ref.dtype)
            hpad_ref[co, pl.ds(r0 + 1, T), 1:W + 1] = hval      # stays in VMEM
        return carry

    lax.fori_loop(0, n_strips, stage1, 0)

    # ---- Stage 2: both heads fused (Cmid -> 1 + 3). ----
    def stage2(s, carry):
        r0 = _strip_start(s)
        acc = [[jnp.zeros((T, W), f32), jnp.zeros((T, W), f32)]
               for _ in range(Ch)]
        term = 0
        for dx in range(3):
            for ci in range(Cmid):
                plane = hpad_ref[ci, pl.ds(r0, T + 2), dx:dx + W]
                for dy in range(3):
                    patch = plane[dy:dy + T, :]
                    base = ((dy * 3 + dx) * Cmid + ci) * Ch
                    p = term & 1
                    for co in range(Ch):
                        acc[co][p] = acc[co][p] + wh[base + co] * patch
                    term += 1
        for co in range(n_conf):                  # confidence: ReLU then +1e-10
            cval = jnp.maximum(acc[co][0] + acc[co][1] + bh[co], 0.0) + 1e-10
            conf_ref[0, co, pl.ds(r0, T), :] = cval.astype(conf_ref.dtype)
        for j in range(n_rec):                    # reconstruction: linear
            co = n_conf + j
            rval = acc[co][0] + acc[co][1] + bh[co]
            rec_ref[0, j, pl.ds(r0, T), :] = rval.astype(rec_ref.dtype)
        return carry

    lax.fori_loop(0, n_strips, stage2, 0)


# ----------------------------------------------------------------------------
# Wrapper: one fused pallas_call for the whole block
# ----------------------------------------------------------------------------
def confidence_block_apply(x, params):
    """x: (N, Cin, H, W) NCHW concatenated pre_confidence.

    Returns (pre_confidence (N,Cmid,H,W), confidence (N,1,H,W),
             reconstruction (N,3,H,W)).
    """
    N, Cin, H, W = x.shape
    w1 = params['w1']                 # (3, 3, Cin, Cmid)  HWIO
    b1 = params['b1'].reshape(-1)
    w2 = params['w2']                 # (3, 3, Cmid, 1)
    b2 = params['b2'].reshape(-1)
    w3 = params['w3']                 # (3, 3, Cmid, 3)
    b3 = params['b3'].reshape(-1)

    if w1.shape[0] != 3 or w1.shape[1] != 3 or w1.shape[2] != Cin:
        raise ValueError(
            f"conv_layer weight expects input channels {w1.shape[2]}, "
            f"but concatenated pre_confidence has {Cin} channels")
    Cmid = w1.shape[3]
    n_conf = w2.shape[3]
    n_rec = w3.shape[3]

    # Flatten weights for SMEM; merge the two heads into one weight/bias tensor.
    w1_flat = w1.reshape(-1).astype(jnp.float32)                     # (9*Cin*Cmid,)
    wh_flat = jnp.concatenate([w2, w3], axis=-1).reshape(-1).astype(jnp.float32)
    bh = jnp.concatenate([b2, b3], axis=0).astype(jnp.float32)

    Wp = _round_up(W + 2, 128)        # lane-aligned scratch pitch

    # Generation-aware VMEM budget: ~96 MiB on 128-MiB parts (v5e/v6e),
    # ~48 MiB on v7x (64 MiB physical).
    try:
        vmem_cap = int(pltpu.get_tpu_info().vmem_capacity_bytes)
    except Exception:
        vmem_cap = 64 * 1024 * 1024
    vmem_limit = max(32 * 1024 * 1024,
                     min((vmem_cap * 3) // 4, 96 * 1024 * 1024))

    smem_spec = pl.BlockSpec(memory_space=pltpu.MemorySpace.SMEM)

    return pl.pallas_call(
        _confidence_block_kernel,
        out_shape=(
            jax.ShapeDtypeStruct((N, Cmid, H, W), x.dtype),
            jax.ShapeDtypeStruct((N, n_conf, H, W), x.dtype),
            jax.ShapeDtypeStruct((N, n_rec, H, W), x.dtype),
        ),
        grid=(N,),
        in_specs=[
            pl.BlockSpec((1, Cin, H, W), lambda n: (n, 0, 0, 0)),
            smem_spec,   # w1_flat
            smem_spec,   # b1
            smem_spec,   # wh_flat
            smem_spec,   # bh
        ],
        out_specs=(
            pl.BlockSpec((1, Cmid, H, W), lambda n: (n, 0, 0, 0)),
            pl.BlockSpec((1, n_conf, H, W), lambda n: (n, 0, 0, 0)),
            pl.BlockSpec((1, n_rec, H, W), lambda n: (n, 0, 0, 0)),
        ),
        scratch_shapes=[
            pltpu.VMEM((Cin, H + 2, Wp), jnp.float32),
            pltpu.VMEM((Cmid, H + 2, Wp), jnp.float32),
        ],
        compiler_params=pltpu.CompilerParams(
            dimension_semantics=("parallel",),
            vmem_limit_bytes=vmem_limit,
        ),
    )(x, w1_flat, b1.astype(jnp.float32), wh_flat, bh)


# ----------------------------------------------------------------------------
# ConfidenceBlock forward (dict/list bookkeeping = Python glue, convs = Pallas)
# ----------------------------------------------------------------------------
def confidence_block_forward(feats, params, level):
    confidence_feat = feats['confidence_feat'][-1]          # NCHW
    if level == 0:
        feats['confidence'].append([])
        feats['pre_confidence'].append([])
        feats['pre_dehaze_result'].append([])
        pre_confidence = confidence_feat
    else:
        pre_confidence = feats['pre_confidence'][-1][level - 1]
    pre_confidence = jnp.concatenate([pre_confidence, confidence_feat], axis=1)
    if len(feats['pre_confidence']) == 1:
        former_pre_confidence = pre_confidence
    else:
        f1 = feats['pre_confidence'][-2][level]
        f2 = feats['pre_confidence'][-2][level - 1]
        former_pre_confidence = jnp.concatenate([f1, f2], axis=1)
    pre_confidence = jnp.concatenate([pre_confidence, former_pre_confidence], axis=1)

    pre, confidence, reconstruction = confidence_block_apply(pre_confidence, params)

    feats['pre_confidence'][-1].append(pre)
    feats['confidence'][-1].append(confidence)
    feats['pre_dehaze_result'][-1].append(reconstruction)
    return feats


# ----------------------------------------------------------------------------
# Pure-JAX reference for a sanity check
# ----------------------------------------------------------------------------
def _ref_conv3x3_nchw(x, w_hwio, b):
    y = jax.lax.conv_general_dilated(
        x, w_hwio, window_strides=(1, 1), padding="SAME",
        dimension_numbers=("NCHW", "HWIO", "NCHW"))
    return y + b.reshape(1, -1, 1, 1)


if __name__ == "__main__":
    channels = 4
    level = 0
    N, H, W = 2, 16, 16
    Cfeat = channels // 2       # confidence_feat channels (cat x4 -> channels*2)
    Cin = channels * 2          # conv_layer input channels
    Cmid = channels // 2        # conv_layer output channels

    key = jax.random.PRNGKey(0)
    ks = jax.random.split(key, 7)
    params = {
        'w1': jax.random.normal(ks[0], (3, 3, Cin, Cmid), jnp.float32) * 0.1,
        'b1': jax.random.normal(ks[1], (Cmid,), jnp.float32) * 0.1,
        'w2': jax.random.normal(ks[2], (3, 3, Cmid, 1), jnp.float32) * 0.1,
        'b2': jax.random.normal(ks[3], (1,), jnp.float32) * 0.1,
        'w3': jax.random.normal(ks[4], (3, 3, Cmid, 3), jnp.float32) * 0.1,
        'b3': jax.random.normal(ks[5], (3,), jnp.float32) * 0.1,
    }
    confidence_feat = jax.random.normal(ks[6], (N, Cfeat, H, W), jnp.float32)

    feats = {
        'confidence_feat': [confidence_feat],
        'confidence': [],
        'pre_confidence': [],
        'pre_dehaze_result': [],
    }

    feats = confidence_block_forward(feats, params, level)
    pre = jax.block_until_ready(feats['pre_confidence'][-1][-1])
    conf = jax.block_until_ready(feats['confidence'][-1][-1])
    rec = jax.block_until_ready(feats['pre_dehaze_result'][-1][-1])

    # Reference (mirrors the PyTorch forward for level=0, first frame:
    # x_cat = cat([cf, cf, cf, cf], dim=1)).
    x_cat = jnp.concatenate([confidence_feat] * 4, axis=1)
    h_ref = _ref_conv3x3_nchw(x_cat, params['w1'], params['b1'])
    h_ref = jnp.where(h_ref > 0, h_ref, 0.1 * h_ref)
    conf_ref = jnp.maximum(
        _ref_conv3x3_nchw(h_ref, params['w2'], params['b2']), 0.0) + 1e-10
    rec_ref = _ref_conv3x3_nchw(h_ref, params['w3'], params['b3'])

    assert pre.shape == (N, Cmid, H, W)
    assert conf.shape == (N, 1, H, W)
    assert rec.shape == (N, 3, H, W)
    np.testing.assert_allclose(np.asarray(pre), np.asarray(h_ref), rtol=1e-4, atol=1e-4)
    np.testing.assert_allclose(np.asarray(conf), np.asarray(conf_ref), rtol=1e-4, atol=1e-4)
    np.testing.assert_allclose(np.asarray(rec), np.asarray(rec_ref), rtol=1e-4, atol=1e-4)

    print("KERNEL_OK")
</pallas_src>

<mosaic_0001>
module attributes {stable_mosaic.version = 11 : i64} {
  func.func @_confidence_block_kernel(%arg0: i32, %arg1: memref<1x8x16x16xf32, #tpu.memory_space<vmem>>, %arg2: memref<144xf32, #tpu.memory_space<smem>>, %arg3: memref<2xf32, #tpu.memory_space<smem>>, %arg4: memref<72xf32, #tpu.memory_space<smem>>, %arg5: memref<4xf32, #tpu.memory_space<smem>>, %arg6: memref<1x2x16x16xf32, #tpu.memory_space<vmem>>, %arg7: memref<1x1x16x16xf32, #tpu.memory_space<vmem>>, %arg8: memref<1x3x16x16xf32, #tpu.memory_space<vmem>>, %arg9: memref<8x18x128xf32, #tpu.memory_space<vmem>>, %arg10: memref<2x18x128xf32, #tpu.memory_space<vmem>>) attributes {dimension_semantics = [#tpu.dimension_semantics<parallel>], iteration_bounds = array<i64: 2>, scalar_prefetch = 0 : i64, scratch_operands = 2 : i64, tpu.core_type = #tpu.core_type<tc>, window_params = [{transform_indices = @transform_0, window_bounds = array<i64: 1, 8, 16, 16>}, {transform_indices = @transform_1, window_bounds = array<i64: 144>}, {transform_indices = @transform_2, window_bounds = array<i64: 2>}, {transform_indices = @transform_3, window_bounds = array<i64: 72>}, {transform_indices = @transform_4, window_bounds = array<i64: 4>}, {transform_indices = @transform_5, window_bounds = array<i64: 1, 2, 16, 16>}, {transform_indices = @transform_6, window_bounds = array<i64: 1, 1, 16, 16>}, {transform_indices = @transform_7, window_bounds = array<i64: 1, 3, 16, 16>}]} {
    %cst = arith.constant 0.000000e+00 : f32
    %0 = vector.broadcast %cst : f32 to vector<8x1x128xf32>
    %c0 = arith.constant 0 : index
    %c0_0 = arith.constant 0 : index
    %c0_1 = arith.constant 0 : index
    %1 = vector.load %arg9[%c0, %c0_0, %c0_1] : memref<8x18x128xf32, #tpu.memory_space<vmem>>, vector<8x1x128xf32>
    tpu.vector_store %arg9[%c0, %c0_0, %c0_1], %0 {strides = array<i32>} : memref<8x18x128xf32, #tpu.memory_space<vmem>>, vector<8x1x128xf32>,
    %c0_2 = arith.constant 0 : index
    %c17 = arith.constant 17 : index
    %c0_3 = arith.constant 0 : index
    %2 = vector.load %arg9[%c0_2, %c17, %c0_3] : memref<8x18x128xf32, #tpu.memory_space<vmem>>, vector<8x1x128xf32>
    tpu.vector_store %arg9[%c0_2, %c17, %c0_3], %0 {strides = array<i32>} : memref<8x18x128xf32, #tpu.memory_space<vmem>>, vector<8x1x128xf32>,
    %cst_4 = arith.constant 0.000000e+00 : f32
    %3 = vector.broadcast %cst_4 : f32 to vector<8x18x1xf32>
    %c0_5 = arith.constant 0 : index
    %c0_6 = arith.constant 0 : index
    %c0_7 = arith.constant 0 : index
    %4 = vector.load %arg9[%c0_5, %c0_6, %c0_7] : memref<8x18x128xf32, #tpu.memory_space<vmem>>, vector<8x18x1xf32>
    tpu.vector_store %arg9[%c0_5, %c0_6, %c0_7], %3 {strides = array<i32>} : memref<8x18x128xf32, #tpu.memory_space<vmem>>, vector<8x18x1xf32>,
    %c0_8 = arith.constant 0 : index
    %c0_9 = arith.constant 0 : index
    %c17_10 = arith.constant 17 : index
    %5 = vector.load %arg9[%c0_8, %c0_9, %c17_10] : memref<8x18x128xf32, #tpu.memory_space<vmem>>, vector<8x18x1xf32>
    tpu.vector_store %arg9[%c0_8, %c0_9, %c17_10], %3 {strides = array<i32>} : memref<8x18x128xf32, #tpu.memory_space<vmem>>, vector<8x18x1xf32>,
    %cst_11 = arith.constant 0.000000e+00 : f32
    %6 = vector.broadcast %cst_11 : f32 to vector<2x1x128xf32>
    %c0_12 = arith.constant 0 : index
    %c0_13 = arith.constant 0 : index
    %c0_14 = arith.constant 0 : index
    %7 = vector.load %arg10[%c0_12, %c0_13, %c0_14] : memref<2x18x128xf32, #tpu.memory_space<vmem>>, vector<2x1x128xf32>
    tpu.vector_store %arg10[%c0_12, %c0_13, %c0_14], %6 {strides = array<i32>} : memref<2x18x128xf32, #tpu.memory_space<vmem>>, vector<2x1x128xf32>,
    %c0_15 = arith.constant 0 : index
    %c17_16 = arith.constant 17 : index
    %c0_17 = arith.constant 0 : index
    %8 = vector.load %arg10[%c0_15, %c17_16, %c0_17] : memref<2x18x128xf32, #tpu.memory_space<vmem>>, vector<2x1x128xf32>
    tpu.vector_store %arg10[%c0_15, %c17_16, %c0_17], %6 {strides = array<i32>} : memref<2x18x128xf32, #tpu.memory_space<vmem>>, vector<2x1x128xf32>,
    %cst_18 = arith.constant 0.000000e+00 : f32
    %9 = vector.broadcast %cst_18 : f32 to vector<2x18x1xf32>
    %c0_19 = arith.constant 0 : index
    %c0_20 = arith.constant 0 : index
    %c0_21 = arith.constant 0 : index
    %10 = vector.load %arg10[%c0_19, %c0_20, %c0_21] : memref<2x18x128xf32, #tpu.memory_space<vmem>>, vector<2x18x1xf32>
    tpu.vector_store %arg10[%c0_19, %c0_20, %c0_21], %9 {strides = array<i32>} : memref<2x18x128xf32, #tpu.memory_space<vmem>>, vector<2x18x1xf32>,
    %c0_22 = arith.constant 0 : index
    %c0_23 = arith.constant 0 : index
    %c17_24 = arith.constant 17 : index
    %11 = vector.load %arg10[%c0_22, %c0_23, %c17_24] : memref<2x18x128xf32, #tpu.memory_space<vmem>>, vector<2x18x1xf32>
    tpu.vector_store %arg10[%c0_22, %c0_23, %c17_24], %9 {strides = array<i32>} : memref<2x18x128xf32, #tpu.memory_space<vmem>>, vector<2x18x1xf32>,
    %c0_25 = arith.constant 0 : index
    %c0_26 = arith.constant 0 : index
    %c0_27 = arith.constant 0 : index
    %c0_28 = arith.constant 0 : index
    %12 = vector.load %arg1[%c0_25, %c0_26, %c0_27, %c0_28] : memref<1x8x16x16xf32, #tpu.memory_space<vmem>>, vector<1x8x16x16xf32>
    %13 = vector.shape_cast %12 : vector<1x8x16x16xf32> to vector<8x16x16xf32>
    %c0_29 = arith.constant 0 : index
    %c1 = arith.constant 1 : index
    %c1_30 = arith.constant 1 : index
    %14 = vector.load %arg9[%c0_29, %c1, %c1_30] : memref<8x18x128xf32, #tpu.memory_space<vmem>>, vector<8x16x16xf32>
    tpu.vector_store %arg9[%c0_29, %c1, %c1_30], %13 {strides = array<i32>} : memref<8x18x128xf32, #tpu.memory_space<vmem>>, vector<8x16x16xf32>,
    %c0_31 = arith.constant 0 : index
    %15 = memref.load %arg2[%c0_31] : memref<144xf32, #tpu.memory_space<smem>>
    %c1_32 = arith.constant 1 : index
    %16 = memref.load %arg2[%c1_32] : memref<144xf32, #tpu.memory_space<smem>>
    %c2 = arith.constant 2 : index
    %17 = memref.load %arg2[%c2] : memref<144xf32, #tpu.memory_space<smem>>
    %c3 = arith.constant 3 : index
    %18 = memref.load %arg2[%c3] : memref<144xf32, #tpu.memory_space<smem>>
    %c4 = arith.constant 4 : index
    %19 = memref.load %arg2[%c4] : memref<144xf32, #tpu.memory_space<smem>>
    %c5 = arith.constant 5 : index
    %20 = memref.load %arg2[%c5] : memref<144xf32, #tpu.memory_space<smem>>
    %c6 = arith.constant 6 : index
    %21 = memref.load %arg2[%c6] : memref<144xf32, #tpu.memory_space<smem>>
    %c7 = arith.constant 7 : index
    %22 = memref.load %arg2[%c7] : memref<144xf32, #tpu.memory_space<smem>>
    %c8 = arith.constant 8 : index
    %23 = memref.load %arg2[%c8] : memref<144xf32, #tpu.memory_space<smem>>
    %c9 = arith.constant 9 : index
    %24 = memref.load %arg2[%c9] : memref<144xf32, #tpu.memory_space<smem>>
    %c10 = arith.constant 10 : index
    %25 = memref.load %arg2[%c10] : memref<144xf32, #tpu.memory_space<smem>>
    %c11 = arith.constant 11 : index
    %26 = memref.load %arg2[%c11] : memref<144xf32, #tpu.memory_space<smem>>
    %c12 = arith.constant 12 : index
    %27 = memref.load %arg2[%c12] : memref<144xf32, #tpu.memory_space<smem>>
    %c13 = arith.constant 13 : index
    %28 = memref.load %arg2[%c13] : memref<144xf32, #tpu.memory_space<smem>>
    %c14 = arith.constant 14 : index
    %29 = memref.load %arg2[%c14] : memref<144xf32, #tpu.memory_space<smem>>
    %c15 = arith.constant 15 : index
    %30 = memref.load %arg2[%c15] : memref<144xf32, #tpu.memory_space<smem>>
    %c16 = arith.constant 16 : index
    %31 = memref.load %arg2[%c16] : memref<144xf32, #tpu.memory_space<smem>>
    %c17_33 = arith.constant 17 : index
    %32 = memref.load %arg2[%c17_33] : memref<144xf32, #tpu.memory_space<smem>>
    %c18 = arith.constant 18 : index
    %33 = memref.load %arg2[%c18] : memref<144xf32, #tpu.memory_space<smem>>
    %c19 = arith.constant 19 : index
    %34 = memref.load %arg2[%c19] : memref<144xf32, #tpu.memory_space<smem>>
    %c20 = arith.constant 20 : index
    %35 = memref.load %arg2[%c20] : memref<144xf32, #tpu.memory_space<smem>>
    %c21 = arith.constant 21 : index
    %36 = memref.load %arg2[%c21] : memref<144xf32, #tpu.memory_space<smem>>
    %c22 = arith.constant 22 : index
    %37 = memref.load %arg2[%c22] : memref<144xf32, #tpu.memory_space<smem>>
    %c23 = arith.constant 23 : index
    %38 = memref.load %arg2[%c23] : memref<144xf32, #tpu.memory_space<smem>>
    %c24 = arith.constant 24 : index
    %39 = memref.load %arg2[%c24] : memref<144xf32, #tpu.memory_space<smem>>
    %c25 = arith.constant 25 : index
    %40 = memref.load %arg2[%c25] : memref<144xf32, #tpu.memory_space<smem>>
    %c26 = arith.constant 26 : index
    %41 = memref.load %arg2[%c26] : memref<144xf32, #tpu.memory_space<smem>>
    %c27 = arith.constant 27 : index
    %42 = memref.load %arg2[%c27] : memref<144xf32, #tpu.memory_space<smem>>
    %c28 = arith.constant 28 : index
    %43 = memref.load %arg2[%c28] : memref<144xf32, #tpu.memory_space<smem>>
    %c29 = arith.constant 29 : index
    %44 = memref.load %arg2[%c29] : memref<144xf32, #tpu.memory_space<smem>>
    %c30 = arith.constant 30 : index
    %45 = memref.load %arg2[%c30] : memref<144xf32, #tpu.memory_space<smem>>
    %c31 = arith.constant 31 : index
    %46 = memref.load %arg2[%c31] : memref<144xf32, #tpu.memory_space<smem>>
    %c32 = arith.constant 32 : index
    %47 = memref.load %arg2[%c32] : memref<144xf32, #tpu.memory_space<smem>>
    %c33 = arith.constant 33 : index
    %48 = memref.load %arg2[%c33] : memref<144xf32, #tpu.memory_space<smem>>
    %c34 = arith.constant 34 : index
    %49 = memref.load %arg2[%c34] : memref<144xf32, #tpu.memory_space<smem>>
    %c35 = arith.constant 35 : index
    %50 = memref.load %arg2[%c35] : memref<144xf32, #tpu.memory_space<smem>>
    %c36 = arith.constant 36 : index
    %51 = memref.load %arg2[%c36] : memref<144xf32, #tpu.memory_space<smem>>
    %c37 = arith.constant 37 : index
    %52 = memref.load %arg2[%c37] : memref<144xf32, #tpu.memory_space<smem>>
    %c38 = arith.constant 38 : index
    %53 = memref.load %arg2[%c38] : memref<144xf32, #tpu.memory_space<smem>>
    %c39 = arith.constant 39 : index
    %54 = memref.load %arg2[%c39] : memref<144xf32, #tpu.memory_space<smem>>
    %c40 = arith.constant 40 : index
    %55 = memref.load %arg2[%c40] : memref<144xf32, #tpu.memory_space<smem>>
    %c41 = arith.constant 41 : index
    %56 = memref.load %arg2[%c41] : memref<144xf32, #tpu.memory_space<smem>>
    %c42 = arith.constant 42 : index
    %57 = memref.load %arg2[%c42] : memref<144xf32, #tpu.memory_space<smem>>
    %c43 = arith.constant 43 : index
    %58 = memref.load %arg2[%c43] : memref<144xf32, #tpu.memory_space<smem>>
    %c44 = arith.constant 44 : index
    %59 = memref.load %arg2[%c44] : memref<144xf32, #tpu.memory_space<smem>>
    %c45 = arith.constant 45 : index
    %60 = memref.load %arg2[%c45] : memref<144xf32, #tpu.memory_space<smem>>
    %c46 = arith.constant 46 : index
    %61 = memref.load %arg2[%c46] : memref<144xf32, #tpu.memory_space<smem>>
    %c47 = arith.constant 47 : index
    %62 = memref.load %arg2[%c47] : memref<144xf32, #tpu.memory_space<smem>>
    %c48 = arith.constant 48 : index
    %63 = memref.load %arg2[%c48] : memref<144xf32, #tpu.memory_space<smem>>
    %c49 = arith.constant 49 : index
    %64 = memref.load %arg2[%c49] : memref<144xf32, #tpu.memory_space<smem>>
    %c50 = arith.constant 50 : index
    %65 = memref.load %arg2[%c50] : memref<144xf32, #tpu.memory_space<smem>>
    %c51 = arith.constant 51 : index
    %66 = memref.load %arg2[%c51] : memref<144xf32, #tpu.memory_space<smem>>
    %c52 = arith.constant 52 : index
    %67 = memref.load %arg2[%c52] : memref<144xf32, #tpu.memory_space<smem>>
    %c53 = arith.constant 53 : index
    %68 = memref.load %arg2[%c53] : memref<144xf32, #tpu.memory_space<smem>>
    %c54 = arith.constant 54 : index
    %69 = memref.load %arg2[%c54] : memref<144xf32, #tpu.memory_space<smem>>
    %c55 = arith.constant 55 : index
    %70 = memref.load %arg2[%c55] : memref<144xf32, #tpu.memory_space<smem>>
    %c56 = arith.constant 56 : index
    %71 = memref.load %arg2[%c56] : memref<144xf32, #tpu.memory_space<smem>>
    %c57 = arith.constant 57 : index
    %72 = memref.load %arg2[%c57] : memref<144xf32, #tpu.memory_space<smem>>
    %c58 = arith.constant 58 : index
    %73 = memref.load %arg2[%c58] : memref<144xf32, #tpu.memory_space<smem>>
    %c59 = arith.constant 59 : index
    %74 = memref.load %arg2[%c59] : memref<144xf32, #tpu.memory_space<smem>>
    %c60 = arith.constant 60 : index
    %75 = memref.load %arg2[%c60] : memref<144xf32, #tpu.memory_space<smem>>
    %c61 = arith.constant 61 : index
    %76 = memref.load %arg2[%c61] : memref<144xf32, #tpu.memory_space<smem>>
    %c62 = arith.constant 62 : index
    %77 = memref.load %arg2[%c62] : memref<144xf32, #tpu.memory_space<smem>>
    %c63 = arith.constant 63 : index
    %78 = memref.load %arg2[%c63] : memref<144xf32, #tpu.memory_space<smem>>
    %c64 = arith.constant 64 : index
    %79 = memref.load %arg2[%c64] : memref<144xf32, #tpu.memory_space<smem>>
    %c65 = arith.constant 65 : index
    %80 = memref.load %arg2[%c65] : memref<144xf32, #tpu.memory_space<smem>>
    %c66 = arith.constant 66 : index
    %81 = memref.load %arg2[%c66] : memref<144xf32, #tpu.memory_space<smem>>
    %c67 = arith.constant 67 : index
    %82 = memref.load %arg2[%c67] : memref<144xf32, #tpu.memory_space<smem>>
    %c68 = arith.constant 68 : index
    %83 = memref.load %arg2[%c68] : memref<144xf32, #tpu.memory_space<smem>>
    %c69 = arith.constant 69 : index
    %84 = memref.load %arg2[%c69] : memref<144xf32, #tpu.memory_space<smem>>
    %c70 = arith.constant 70 : index
    %85 = memref.load %arg2[%c70] : memref<144xf32, #tpu.memory_space<smem>>
    %c71 = arith.constant 71 : index
    %86 = memref.load %arg2[%c71] : memref<144xf32, #tpu.memory_space<smem>>
    %c72 = arith.constant 72 : index
    %87 = memref.load %arg2[%c72] : memref<144xf32, #tpu.memory_space<smem>>
    %c73 = arith.constant 73 : index
    %88 = memref.load %arg2[%c73] : memref<144xf32, #tpu.memory_space<smem>>
    %c74 = arith.constant 74 : index
    %89 = memref.load %arg2[%c74] : memref<144xf32, #tpu.memory_space<smem>>
    %c75 = arith.constant 75 : index
    %90 = memref.load %arg2[%c75] : memref<144xf32, #tpu.memory_space<smem>>
    %c76 = arith.constant 76 : index
    %91 = memref.load %arg2[%c76] : memref<144xf32, #tpu.memory_space<smem>>
    %c77 = arith.constant 77 : index
    %92 = memref.load %arg2[%c77] : memref<144xf32, #tpu.memory_space<smem>>
    %c78 = arith.constant 78 : index
    %93 = memref.load %arg2[%c78] : memref<144xf32, #tpu.memory_space<smem>>
    %c79 = arith.constant 79 : index
    %94 = memref.load %arg2[%c79] : memref<144xf32, #tpu.memory_space<smem>>
    %c80 = arith.constant 80 : index
    %95 = memref.load %arg2[%c80] : memref<144xf32, #tpu.memory_space<smem>>
    %c81 = arith.constant 81 : index
    %96 = memref.load %arg2[%c81] : memref<144xf32, #tpu.memory_space<smem>>
    %c82 = arith.constant 82 : index
    %97 = memref.load %arg2[%c82] : memref<144xf32, #tpu.memory_space<smem>>
    %c83 = arith.constant 83 : index
    %98 = memref.load %arg2[%c83] : memref<144xf32, #tpu.memory_space<smem>>
    %c84 = arith.constant 84 : index
    %99 = memref.load %arg2[%c84] : memref<144xf32, #tpu.memory_space<smem>>
    %c85 = arith.constant 85 : index
    %100 = memref.load %arg2[%c85] : memref<144xf32, #tpu.memory_space<smem>>
    %c86 = arith.constant 86 : index
    %101 = memref.load %arg2[%c86] : memref<144xf32, #tpu.memory_space<smem>>
    %c87 = arith.constant 87 : index
    %102 = memref.load %arg2[%c87] : memref<144xf32, #tpu.memory_space<smem>>
    %c88 = arith.constant 88 : index
    %103 = memref.load %arg2[%c88] : memref<144xf32, #tpu.memory_space<smem>>
    %c89 = arith.constant 89 : index
    %104 = memref.load %arg2[%c89] : memref<144xf32, #tpu.memory_space<smem>>
    %c90 = arith.constant 90 : index
    %105 = memref.load %arg2[%c90] : memref<144xf32, #tpu.memory_space<smem>>
    %c91 = arith.constant 91 : index
    %106 = memref.load %arg2[%c91] : memref<144xf32, #tpu.memory_space<smem>>
    %c92 = arith.constant 92 : index
    %107 = memref.load %arg2[%c92] : memref<144xf32, #tpu.memory_space<smem>>
    %c93 = arith.constant 93 : index
    %108 = memref.load %arg2[%c93] : memref<144xf32, #tpu.memory_space<smem>>
    %c94 = arith.constant 94 : index
    %109 = memref.load %arg2[%c94] : memref<144xf32, #tpu.memory_space<smem>>
    %c95 = arith.constant 95 : index
    %110 = memref.load %arg2[%c95] : memref<144xf32, #tpu.memory_space<smem>>
    %c96 = arith.constant 96 : index
    %111 = memref.load %arg2[%c96] : memref<144xf32, #tpu.memory_space<smem>>
    %c97 = arith.constant 97 : index
    %112 = memref.load %arg2[%c97] : memref<144xf32, #tpu.memory_space<smem>>
    %c98 = arith.constant 98 : index
    %113 = memref.load %arg2[%c98] : memref<144xf32, #tpu.memory_space<smem>>
    %c99 = arith.constant 99 : index
    %114 = memref.load %arg2[%c99] : memref<144xf32, #tpu.memory_space<smem>>
    %c100 = arith.constant 100 : index
    %115 = memref.load %arg2[%c100] : memref<144xf32, #tpu.memory_space<smem>>
    %c101 = arith.constant 101 : index
    %116 = memref.load %arg2[%c101] : memref<144xf32, #tpu.memory_space<smem>>
    %c102 = arith.constant 102 : index
    %117 = memref.load %arg2[%c102] : memref<144xf32, #tpu.memory_space<smem>>
    %c103 = arith.constant 103 : index
    %118 = memref.load %arg2[%c103] : memref<144xf32, #tpu.memory_space<smem>>
    %c104 = arith.constant 104 : index
    %119 = memref.load %arg2[%c104] : memref<144xf32, #tpu.memory_space<smem>>
    %c105 = arith.constant 105 : index
    %120 = memref.load %arg2[%c105] : memref<144xf32, #tpu.memory_space<smem>>
    %c106 = arith.constant 106 : index
    %121 = memref.load %arg2[%c106] : memref<144xf32, #tpu.memory_space<smem>>
    %c107 = arith.constant 107 : index
    %122 = memref.load %arg2[%c107] : memref<144xf32, #tpu.memory_space<smem>>
    %c108 = arith.constant 108 : index
    %123 = memref.load %arg2[%c108] : memref<144xf32, #tpu.memory_space<smem>>
    %c109 = arith.constant 109 : index
    %124 = memref.load %arg2[%c109] : memref<144xf32, #tpu.memory_space<smem>>
    %c110 = arith.constant 110 : index
    %125 = memref.load %arg2[%c110] : memref<144xf32, #tpu.memory_space<smem>>
    %c111 = arith.constant 111 : index
    %126 = memref.load %arg2[%c111] : memref<144xf32, #tpu.memory_space<smem>>
    %c112 = arith.constant 112 : index
    %127 = memref.load %arg2[%c112] : memref<144xf32, #tpu.memory_space<smem>>
    %c113 = arith.constant 113 : index
    %128 = memref.load %arg2[%c113] : memref<144xf32, #tpu.memory_space<smem>>
    %c114 = arith.constant 114 : index
    %129 = memref.load %arg2[%c114] : memref<144xf32, #tpu.memory_space<smem>>
    %c115 = arith.constant 115 : index
    %130 = memref.load %arg2[%c115] : memref<144xf32, #tpu.memory_space<smem>>
    %c116 = arith.constant 116 : index
    %131 = memref.load %arg2[%c116] : memref<144xf32, #tpu.memory_space<smem>>
    %c117 = arith.constant 117 : index
    %132 = memref.load %arg2[%c117] : memref<144xf32, #tpu.memory_space<smem>>
    %c118 = arith.constant 118 : index
    %133 = memref.load %arg2[%c118] : memref<144xf32, #tpu.memory_space<smem>>
    %c119 = arith.constant 119 : index
    %134 = memref.load %arg2[%c119] : memref<144xf32, #tpu.memory_space<smem>>
    %c120 = arith.constant 120 : index
    %135 = memref.load %arg2[%c120] : memref<144xf32, #tpu.memory_space<smem>>
    %c121 = arith.constant 121 : index
    %136 = memref.load %arg2[%c121] : memref<144xf32, #tpu.memory_space<smem>>
    %c122 = arith.constant 122 : index
    %137 = memref.load %arg2[%c122] : memref<144xf32, #tpu.memory_space<smem>>
    %c123 = arith.constant 123 : index
    %138 = memref.load %arg2[%c123] : memref<144xf32, #tpu.memory_space<smem>>
    %c124 = arith.constant 124 : index
    %139 = memref.load %arg2[%c124] : memref<144xf32, #tpu.memory_space<smem>>
    %c125 = arith.constant 125 : index
    %140 = memref.load %arg2[%c125] : memref<144xf32, #tpu.memory_space<smem>>
    %c126 = arith.constant 126 : index
    %141 = memref.load %arg2[%c126] : memref<144xf32, #tpu.memory_space<smem>>
    %c127 = arith.constant 127 : index
    %142 = memref.load %arg2[%c127] : memref<144xf32, #tpu.memory_space<smem>>
    %c128 = arith.constant 128 : index
    %143 = memref.load %arg2[%c128] : memref<144xf32, #tpu.memory_space<smem>>
    %c129 = arith.constant 129 : index
    %144 = memref.load %arg2[%c129] : memref<144xf32, #tpu.memory_space<smem>>
    %c130 = arith.constant 130 : index
    %145 = memref.load %arg2[%c130] : memref<144xf32, #tpu.memory_space<smem>>
    %c131 = arith.constant 131 : index
    %146 = memref.load %arg2[%c131] : memref<144xf32, #tpu.memory_space<smem>>
    %c132 = arith.constant 132 : index
    %147 = memref.load %arg2[%c132] : memref<144xf32, #tpu.memory_space<smem>>
    %c133 = arith.constant 133 : index
    %148 = memref.load %arg2[%c133] : memref<144xf32, #tpu.memory_space<smem>>
    %c134 = arith.constant 134 : index
    %149 = memref.load %arg2[%c134] : memref<144xf32, #tpu.memory_space<smem>>
    %c135 = arith.constant 135 : index
    %150 = memref.load %arg2[%c135] : memref<144xf32, #tpu.memory_space<smem>>
    %c136 = arith.constant 136 : index
    %151 = memref.load %arg2[%c136] : memref<144xf32, #tpu.memory_space<smem>>
    %c137 = arith.constant 137 : index
    %152 = memref.load %arg2[%c137] : memref<144xf32, #tpu.memory_space<smem>>
    %c138 = arith.constant 138 : index
    %153 = memref.load %arg2[%c138] : memref<144xf32, #tpu.memory_space<smem>>
    %c139 = arith.constant 139 : index
    %154 = memref.load %arg2[%c139] : memref<144xf32, #tpu.memory_space<smem>>
    %c140 = arith.constant 140 : index
    %155 = memref.load %arg2[%c140] : memref<144xf32, #tpu.memory_space<smem>>
    %c141 = arith.constant 141 : index
    %156 = memref.load %arg2[%c141] : memref<144xf32, #tpu.memory_space<smem>>
    %c142 = arith.constant 142 : index
    %157 = memref.load %arg2[%c142] : memref<144xf32, #tpu.memory_space<smem>>
    %c143 = arith.constant 143 : index
    %158 = memref.load %arg2[%c143] : memref<144xf32, #tpu.memory_space<smem>>
    %c0_34 = arith.constant 0 : index
    %159 = memref.load %arg3[%c0_34] : memref<2xf32, #tpu.memory_space<smem>>
    %c1_35 = arith.constant 1 : index
    %160 = memref.load %arg3[%c1_35] : memref<2xf32, #tpu.memory_space<smem>>
    %c0_36 = arith.constant 0 : index
    %161 = memref.load %arg4[%c0_36] : memref<72xf32, #tpu.memory_space<smem>>
    %c1_37 = arith.constant 1 : index
    %162 = memref.load %arg4[%c1_37] : memref<72xf32, #tpu.memory_space<smem>>
    %c2_38 = arith.constant 2 : index
    %163 = memref.load %arg4[%c2_38] : memref<72xf32, #tpu.memory_space<smem>>
    %c3_39 = arith.constant 3 : index
    %164 = memref.load %arg4[%c3_39] : memref<72xf32, #tpu.memory_space<smem>>
    %c4_40 = arith.constant 4 : index
    %165 = memref.load %arg4[%c4_40] : memref<72xf32, #tpu.memory_space<smem>>
    %c5_41 = arith.constant 5 : index
    %166 = memref.load %arg4[%c5_41] : memref<72xf32, #tpu.memory_space<smem>>
    %c6_42 = arith.constant 6 : index
    %167 = memref.load %arg4[%c6_42] : memref<72xf32, #tpu.memory_space<smem>>
    %c7_43 = arith.constant 7 : index
    %168 = memref.load %arg4[%c7_43] : memref<72xf32, #tpu.memory_space<smem>>
    %c8_44 = arith.constant 8 : index
    %169 = memref.load %arg4[%c8_44] : memref<72xf32, #tpu.memory_space<smem>>
    %c9_45 = arith.constant 9 : index
    %170 = memref.load %arg4[%c9_45] : memref<72xf32, #tpu.memory_space<smem>>
    %c10_46 = arith.constant 10 : index
    %171 = memref.load %arg4[%c10_46] : memref<72xf32, #tpu.memory_space<smem>>
    %c11_47 = arith.constant 11 : index
    %172 = memref.load %arg4[%c11_47] : memref<72xf32, #tpu.memory_space<smem>>
    %c12_48 = arith.constant 12 : index
    %173 = memref.load %arg4[%c12_48] : memref<72xf32, #tpu.memory_space<smem>>
    %c13_49 = arith.constant 13 : index
    %174 = memref.load %arg4[%c13_49] : memref<72xf32, #tpu.memory_space<smem>>
    %c14_50 = arith.constant 14 : index
    %175 = memref.load %arg4[%c14_50] : memref<72xf32, #tpu.memory_space<smem>>
    %c15_51 = arith.constant 15 : index
    %176 = memref.load %arg4[%c15_51] : memref<72xf32, #tpu.memory_space<smem>>
    %c16_52 = arith.constant 16 : index
    %177 = memref.load %arg4[%c16_52] : memref<72xf32, #tpu.memory_space<smem>>
    %c17_53 = arith.constant 17 : index
    %178 = memref.load %arg4[%c17_53] : memref<72xf32, #tpu.memory_space<smem>>
    %c18_54 = arith.constant 18 : index
    %179 = memref.load %arg4[%c18_54] : memref<72xf32, #tpu.memory_space<smem>>
    %c19_55 = arith.constant 19 : index
    %180 = memref.load %arg4[%c19_55] : memref<72xf32, #tpu.memory_space<smem>>
    %c20_56 = arith.constant 20 : index
    %181 = memref.load %arg4[%c20_56] : memref<72xf32, #tpu.memory_space<smem>>
    %c21_57 = arith.constant 21 : index
    %182 = memref.load %arg4[%c21_57] : memref<72xf32, #tpu.memory_space<smem>>
    %c22_58 = arith.constant 22 : index
    %183 = memref.load %arg4[%c22_58] : memref<72xf32, #tpu.memory_space<smem>>
    %c23_59 = arith.constant 23 : index
    %184 = memref.load %arg4[%c23_59] : memref<72xf32, #tpu.memory_space<smem>>
    %c24_60 = arith.constant 24 : index
    %185 = memref.load %arg4[%c24_60] : memref<72xf32, #tpu.memory_space<smem>>
    %c25_61 = arith.constant 25 : index
    %186 = memref.load %arg4[%c25_61] : memref<72xf32, #tpu.memory_space<smem>>
    %c26_62 = arith.constant 26 : index
    %187 = memref.load %arg4[%c26_62] : memref<72xf32, #tpu.memory_space<smem>>
    %c27_63 = arith.constant 27 : index
    %188 = memref.load %arg4[%c27_63] : memref<72xf32, #tpu.memory_space<smem>>
    %c28_64 = arith.constant 28 : index
    %189 = memref.load %arg4[%c28_64] : memref<72xf32, #tpu.memory_space<smem>>
    %c29_65 = arith.constant 29 : index
    %190 = memref.load %arg4[%c29_65] : memref<72xf32, #tpu.memory_space<smem>>
    %c30_66 = arith.constant 30 : index
    %191 = memref.load %arg4[%c30_66] : memref<72xf32, #tpu.memory_space<smem>>
    %c31_67 = arith.constant 31 : index
    %192 = memref.load %arg4[%c31_67] : memref<72xf32, #tpu.memory_space<smem>>
    %c32_68 = arith.constant 32 : index
    %193 = memref.load %arg4[%c32_68] : memref<72xf32, #tpu.memory_space<smem>>
    %c33_69 = arith.constant 33 : index
    %194 = memref.load %arg4[%c33_69] : memref<72xf32, #tpu.memory_space<smem>>
    %c34_70 = arith.constant 34 : index
    %195 = memref.load %arg4[%c34_70] : memref<72xf32, #tpu.memory_space<smem>>
    %c35_71 = arith.constant 35 : index
    %196 = memref.load %arg4[%c35_71] : memref<72xf32, #tpu.memory_space<smem>>
    %c36_72 = arith.constant 36 : index
    %197 = memref.load %arg4[%c36_72] : memref<72xf32, #tpu.memory_space<smem>>
    %c37_73 = arith.constant 37 : index
    %198 = memref.load %arg4[%c37_73] : memref<72xf32, #tpu.memory_space<smem>>
    %c38_74 = arith.constant 38 : index
    %199 = memref.load %arg4[%c38_74] : memref<72xf32, #tpu.memory_space<smem>>
    %c39_75 = arith.constant 39 : index
    %200 = memref.load %arg4[%c39_75] : memref<72xf32, #tpu.memory_space<smem>>
    %c40_76 = arith.constant 40 : index
    %201 = memref.load %arg4[%c40_76] : memref<72xf32, #tpu.memory_space<smem>>
    %c41_77 = arith.constant 41 : index
    %202 = memref.load %arg4[%c41_77] : memref<72xf32, #tpu.memory_space<smem>>
    %c42_78 = arith.constant 42 : index
    %203 = memref.load %arg4[%c42_78] : memref<72xf32, #tpu.memory_space<smem>>
    %c43_79 = arith.constant 43 : index
    %204 = memref.load %arg4[%c43_79] : memref<72xf32, #tpu.memory_space<smem>>
    %c44_80 = arith.constant 44 : index
    %205 = memref.load %arg4[%c44_80] : memref<72xf32, #tpu.memory_space<smem>>
    %c45_81 = arith.constant 45 : index
    %206 = memref.load %arg4[%c45_81] : memref<72xf32, #tpu.memory_space<smem>>
    %c46_82 = arith.constant 46 : index
    %207 = memref.load %arg4[%c46_82] : memref<72xf32, #tpu.memory_space<smem>>
    %c47_83 = arith.constant 47 : index
    %208 = memref.load %arg4[%c47_83] : memref<72xf32, #tpu.memory_space<smem>>
    %c48_84 = arith.constant 48 : index
    %209 = memref.load %arg4[%c48_84] : memref<72xf32, #tpu.memory_space<smem>>
    %c49_85 = arith.constant 49 : index
    %210 = memref.load %arg4[%c49_85] : memref<72xf32, #tpu.memory_space<smem>>
    %c50_86 = arith.constant 50 : index
    %211 = memref.load %arg4[%c50_86] : memref<72xf32, #tpu.memory_space<smem>>
    %c51_87 = arith.constant 51 : index
    %212 = memref.load %arg4[%c51_87] : memref<72xf32, #tpu.memory_space<smem>>
    %c52_88 = arith.constant 52 : index
    %213 = memref.load %arg4[%c52_88] : memref<72xf32, #tpu.memory_space<smem>>
    %c53_89 = arith.constant 53 : index
    %214 = memref.load %arg4[%c53_89] : memref<72xf32, #tpu.memory_space<smem>>
    %c54_90 = arith.constant 54 : index
    %215 = memref.load %arg4[%c54_90] : memref<72xf32, #tpu.memory_space<smem>>
    %c55_91 = arith.constant 55 : index
    %216 = memref.load %arg4[%c55_91] : memref<72xf32, #tpu.memory_space<smem>>
    %c56_92 = arith.constant 56 : index
    %217 = memref.load %arg4[%c56_92] : memref<72xf32, #tpu.memory_space<smem>>
    %c57_93 = arith.constant 57 : index
    %218 = memref.load %arg4[%c57_93] : memref<72xf32, #tpu.memory_space<smem>>
    %c58_94 = arith.constant 58 : index
    %219 = memref.load %arg4[%c58_94] : memref<72xf32, #tpu.memory_space<smem>>
    %c59_95 = arith.constant 59 : index
    %220 = memref.load %arg4[%c59_95] : memref<72xf32, #tpu.memory_space<smem>>
    %c60_96 = arith.constant 60 : index
    %221 = memref.load %arg4[%c60_96] : memref<72xf32, #tpu.memory_space<smem>>
    %c61_97 = arith.constant 61 : index
    %222 = memref.load %arg4[%c61_97] : memref<72xf32, #tpu.memory_space<smem>>
    %c62_98 = arith.constant 62 : index
    %223 = memref.load %arg4[%c62_98] : memref<72xf32, #tpu.memory_space<smem>>
    %c63_99 = arith.constant 63 : index
    %224 = memref.load %arg4[%c63_99] : memref<72xf32, #tpu.memory_space<smem>>
    %c64_100 = arith.constant 64 : index
    %225 = memref.load %arg4[%c64_100] : memref<72xf32, #tpu.memory_space<smem>>
    %c65_101 = arith.constant 65 : index
    %226 = memref.load %arg4[%c65_101] : memref<72xf32, #tpu.memory_space<smem>>
    %c66_102 = arith.constant 66 : index
    %227 = memref.load %arg4[%c66_102] : memref<72xf32, #tpu.memory_space<smem>>
    %c67_103 = arith.constant 67 : index
    %228 = memref.load %arg4[%c67_103] : memref<72xf32, #tpu.memory_space<smem>>
    %c68_104 = arith.constant 68 : index
    %229 = memref.load %arg4[%c68_104] : memref<72xf32, #tpu.memory_space<smem>>
    %c69_105 = arith.constant 69 : index
    %230 = memref.load %arg4[%c69_105] : memref<72xf32, #tpu.memory_space<smem>>
    %c70_106 = arith.constant 70 : index
    %231 = memref.load %arg4[%c70_106] : memref<72xf32, #tpu.memory_space<smem>>
    %c71_107 = arith.constant 71 : index
    %232 = memref.load %arg4[%c71_107] : memref<72xf32, #tpu.memory_space<smem>>
    %c0_108 = arith.constant 0 : index
    %233 = memref.load %arg5[%c0_108] : memref<4xf32, #tpu.memory_space<smem>>
    %c1_109 = arith.constant 1 : index
    %234 = memref.load %arg5[%c1_109] : memref<4xf32, #tpu.memory_space<smem>>
    %c2_110 = arith.constant 2 : index
    %235 = memref.load %arg5[%c2_110] : memref<4xf32, #tpu.memory_space<smem>>
    %c3_111 = arith.constant 3 : index
    %236 = memref.load %arg5[%c3_111] : memref<4xf32, #tpu.memory_space<smem>>
    %c0_i32 = arith.constant 0 : i32
    %c2_i32 = arith.constant 2 : i32
    %237 = arith.addi %c0_i32, %c2_i32 : i32
    %c1_i32 = arith.constant 1 : i32
    scf.for %arg11 = %c0_i32 to %237 step %c1_i32  : i32 {
      %c8_i32 = arith.constant 8 : i32
      %239 = arith.muli %arg11, %c8_i32 : i32
      %240 = tpu.assume_multiple %239, 8 : i32
      %cst_117 = arith.constant 0.000000e+00 : f32
      %241 = vector.broadcast %cst_117 : f32 to vector<8x16xf32>
      %cst_118 = arith.constant 0.000000e+00 : f32
      %242 = vector.broadcast %cst_118 : f32 to vector<8x16xf32>
      %cst_119 = arith.constant 0.000000e+00 : f32
      %243 = vector.broadcast %cst_119 : f32 to vector<8x16xf32>
      %cst_120 = arith.constant 0.000000e+00 : f32
      %244 = vector.broadcast %cst_120 : f32 to vector<8x16xf32>
      %c0_121 = arith.constant 0 : index
      %245 = arith.index_cast %240 : i32 to index
      %c0_122 = arith.constant 0 : index
      %246 = vector.load %arg9[%c0_121, %245, %c0_122] : memref<8x18x128xf32, #tpu.memory_space<vmem>>, vector<1x10x16xf32>
      %247 = vector.shape_cast %246 : vector<1x10x16xf32> to vector<10x16xf32>
      %248 = vector.extract_strided_slice %247 {offsets = [0, 0], sizes = [8, 16], strides = [1, 1]} : vector<10x16xf32> to vector<8x16xf32>
      %249 = vector.broadcast %15 : f32 to vector<8x16xf32>
      %250 = arith.mulf %249, %248 : vector<8x16xf32>
      %251 = arith.addf %241, %250 : vector<8x16xf32>
      %252 = vector.broadcast %16 : f32 to vector<8x16xf32>
      %253 = arith.mulf %252, %248 : vector<8x16xf32>
      %254 = arith.addf %243, %253 : vector<8x16xf32>
      %255 = vector.extract_strided_slice %247 {offsets = [1, 0], sizes = [8, 16], strides = [1, 1]} : vector<10x16xf32> to vector<8x16xf32>
      %256 = vector.broadcast %63 : f32 to vector<8x16xf32>
      %257 = arith.mulf %256, %255 : vector<8x16xf32>
      %258 = arith.addf %242, %257 : vector<8x16xf32>
      %259 = vector.broadcast %64 : f32 to vector<8x16xf32>
      %260 = arith.mulf %259, %255 : vector<8x16xf32>
      %261 = arith.addf %244, %260 : vector<8x16xf32>
      %262 = vector.extract_strided_slice %247 {offsets = [2, 0], sizes = [8, 16], strides = [1, 1]} : vector<10x16xf32> to vector<8x16xf32>
      %263 = vector.broadcast %111 : f32 to vector<8x16xf32>
      %264 = arith.mulf %263, %262 : vector<8x16xf32>
      %265 = arith.addf %251, %264 : vector<8x16xf32>
      %266 = vector.broadcast %112 : f32 to vector<8x16xf32>
      %267 = arith.mulf %266, %262 : vector<8x16xf32>
      %268 = arith.addf %254, %267 : vector<8x16xf32>
      %c1_123 = arith.constant 1 : index
      %269 = arith.index_cast %240 : i32 to index
      %c0_124 = arith.constant 0 : index
      %270 = vector.load %arg9[%c1_123, %269, %c0_124] : memref<8x18x128xf32, #tpu.memory_space<vmem>>, vector<1x10x16xf32>
      %271 = vector.shape_cast %270 : vector<1x10x16xf32> to vector<10x16xf32>
      %272 = vector.extract_strided_slice %271 {offsets = [0, 0], sizes = [8, 16], strides = [1, 1]} : vector<10x16xf32> to vector<8x16xf32>
      %273 = vector.broadcast %17 : f32 to vector<8x16xf32>
      %274 = arith.mulf %273, %272 : vector<8x16xf32>
      %275 = arith.addf %258, %274 : vector<8x16xf32>
      %276 = vector.broadcast %18 : f32 to vector<8x16xf32>
      %277 = arith.mulf %276, %272 : vector<8x16xf32>
      %278 = arith.addf %261, %277 : vector<8x16xf32>
      %279 = vector.extract_strided_slice %271 {offsets = [1, 0], sizes = [8, 16], strides = [1, 1]} : vector<10x16xf32> to vector<8x16xf32>
      %280 = vector.broadcast %65 : f32 to vector<8x16xf32>
      %281 = arith.mulf %280, %279 : vector<8x16xf32>
      %282 = arith.addf %265, %281 : vector<8x16xf32>
      %283 = vector.broadcast %66 : f32 to vector<8x16xf32>
      %284 = arith.mulf %283, %279 : vector<8x16xf32>
      %285 = arith.addf %268, %284 : vector<8x16xf32>
      %286 = vector.extract_strided_slice %271 {offsets = [2, 0], sizes = [8, 16], strides = [1, 1]} : vector<10x16xf32> to vector<8x16xf32>
      %287 = vector.broadcast %113 : f32 to vector<8x16xf32>
      %288 = arith.mulf %287, %286 : vector<8x16xf32>
      %289 = arith.addf %275, %288 : vector<8x16xf32>
      %290 = vector.broadcast %114 : f32 to vector<8x16xf32>
      %291 = arith.mulf %290, %286 : vector<8x16xf32>
      %292 = arith.addf %278, %291 : vector<8x16xf32>
      %c2_125 = arith.constant 2 : index
      %293 = arith.index_cast %240 : i32 to index
      %c0_126 = arith.constant 0 : index
      %294 = vector.load %arg9[%c2_125, %293, %c0_126] : memref<8x18x128xf32, #tpu.memory_space<vmem>>, vector<1x10x16xf32>
      %295 = vector.shape_cast %294 : vector<1x10x16xf32> to vector<10x16xf32>
      %296 = vector.extract_strided_slice %295 {offsets = [0, 0], sizes = [8, 16], strides = [1, 1]} : vector<10x16xf32> to vector<8x16xf32>
      %297 = vector.broadcast %19 : f32 to vector<8x16xf32>
      %298 = arith.mulf %297, %296 : vector<8x16xf32>
      %299 = arith.addf %282, %298 : vector<8x16xf32>
      %300 = vector.broadcast %20 : f32 to vector<8x16xf32>
      %301 = arith.mulf %300, %296 : vector<8x16xf32>
      %302 = arith.addf %285, %301 : vector<8x16xf32>
      %303 = vector.extract_strided_slice %295 {offsets = [1, 0], sizes = [8, 16], strides = [1, 1]} : vector<10x16xf32> to vector<8x16xf32>
      %304 = vector.broadcast %67 : f32 to vector<8x16xf32>
      %305 = arith.mulf %304, %303 : vector<8x16xf32>
      %306 = arith.addf %289, %305 : vector<8x16xf32>
      %307 = vector.broadcast %68 : f32 to vector<8x16xf32>
      %308 = arith.mulf %307, %303 : vector<8x16xf32>
      %309 = arith.addf %292, %308 : vector<8x16xf32>
      %310 = vector.extract_strided_slice %295 {offsets = [2, 0], sizes = [8, 16], strides = [1, 1]} : vector<10x16xf32> to vector<8x16xf32>
      %311 = vector.broadcast %115 : f32 to vector<8x16xf32>
      %312 = arith.mulf %311, %310 : vector<8x16xf32>
      %313 = arith.addf %299, %312 : vector<8x16xf32>
      %314 = vector.broadcast %116 : f32 to vector<8x16xf32>
      %315 = arith.mulf %314, %310 : vector<8x16xf32>
      %316 = arith.addf %302, %315 : vector<8x16xf32>
      %c3_127 = arith.constant 3 : index
      %317 = arith.index_cast %240 : i32 to index
      %c0_128 = arith.constant 0 : index
      %318 = vector.load %arg9[%c3_127, %317, %c0_128] : memref<8x18x128xf32, #tpu.memory_space<vmem>>, vector<1x10x16xf32>
      %319 = vector.shape_cast %318 : vector<1x10x16xf32> to vector<10x16xf32>
      %320 = vector.extract_strided_slice %319 {offsets = [0, 0], sizes = [8, 16], strides = [1, 1]} : vector<10x16xf32> to vector<8x16xf32>
      %321 = vector.broadcast %21 : f32 to vector<8x16xf32>
      %322 = arith.mulf %321, %320 : vector<8x16xf32>
      %323 = arith.addf %306, %322 : vector<8x16xf32>
      %324 = vector.broadcast %22 : f32 to vector<8x16xf32>
      %325 = arith.mulf %324, %320 : vector<8x16xf32>
      %326 = arith.addf %309, %325 : vector<8x16xf32>
      %327 = vector.extract_strided_slice %319 {offsets = [1, 0], sizes = [8, 16], strides = [1, 1]} : vector<10x16xf32> to vector<8x16xf32>
      %328 = vector.broadcast %69 : f32 to vector<8x16xf32>
      %329 = arith.mulf %328, %327 : vector<8x16xf32>
      %330 = arith.addf %313, %329 : vector<8x16xf32>
      %331 = vector.broadcast %70 : f32 to vector<8x16xf32>
      %332 = arith.mulf %331, %327 : vector<8x16xf32>
      %333 = arith.addf %316, %332 : vector<8x16xf32>
      %334 = vector.extract_strided_slice %319 {offsets = [2, 0], sizes = [8, 16], strides = [1, 1]} : vector<10x16xf32> to vector<8x16xf32>
      %335 = vector.broadcast %117 : f32 to vector<8x16xf32>
      %336 = arith.mulf %335, %334 : vector<8x16xf32>
      %337 = arith.addf %323, %336 : vector<8x16xf32>
      %338 = vector.broadcast %118 : f32 to vector<8x16xf32>
      %339 = arith.mulf %338, %334 : vector<8x16xf32>
      %340 = arith.addf %326, %339 : vector<8x16xf32>
      %c4_129 = arith.constant 4 : index
      %341 = arith.index_cast %240 : i32 to index
      %c0_130 = arith.constant 0 : index
      %342 = vector.load %arg9[%c4_129, %341, %c0_130] : memref<8x18x128xf32, #tpu.memory_space<vmem>>, vector<1x10x16xf32>
      %343 = vector.shape_cast %342 : vector<1x10x16xf32> to vector<10x16xf32>
      %344 = vector.extract_strided_slice %343 {offsets = [0, 0], sizes = [8, 16], strides = [1, 1]} : vector<10x16xf32> to vector<8x16xf32>
      %345 = vector.broadcast %23 : f32 to vector<8x16xf32>
      %346 = arith.mulf %345, %344 : vector<8x16xf32>
      %347 = arith.addf %330, %346 : vector<8x16xf32>
      %348 = vector.broadcast %24 : f32 to vector<8x16xf32>
      %349 = arith.mulf %348, %344 : vector<8x16xf32>
      %350 = arith.addf %333, %349 : vector<8x16xf32>
      %351 = vector.extract_strided_slice %343 {offsets = [1, 0], sizes = [8, 16], strides = [1, 1]} : vector<10x16xf32> to vector<8x16xf32>
      %352 = vector.broadcast %71 : f32 to vector<8x16xf32>
      %353 = arith.mulf %352, %351 : vector<8x16xf32>
      %354 = arith.addf %337, %353 : vector<8x16xf32>
      %355 = vector.broadcast %72 : f32 to vector<8x16xf32>
      %356 = arith.mulf %355, %351 : vector<8x16xf32>
      %357 = arith.addf %340, %356 : vector<8x16xf32>
      %358 = vector.extract_strided_slice %343 {offsets = [2, 0], sizes = [8, 16], strides = [1, 1]} : vector<10x16xf32> to vector<8x16xf32>
      %359 = vector.broadcast %119 : f32 to vector<8x16xf32>
      %360 = arith.mulf %359, %358 : vector<8x16xf32>
      %361 = arith.addf %347, %360 : vector<8x16xf32>
      %362 = vector.broadcast %120 : f32 to vector<8x16xf32>
      %363 = arith.mulf %362, %358 : vector<8x16xf32>
      %364 = arith.addf %350, %363 : vector<8x16xf32>
      %c5_131 = arith.constant 5 : index
      %365 = arith.index_cast %240 : i32 to index
      %c0_132 = arith.constant 0 : index
      %366 = vector.load %arg9[%c5_131, %365, %c0_132] : memref<8x18x128xf32, #tpu.memory_space<vmem>>, vector<1x10x16xf32>
      %367 = vector.shape_cast %366 : vector<1x10x16xf32> to vector<10x16xf32>
      %368 = vector.extract_strided_slice %367 {offsets = [0, 0], sizes = [8, 16], strides = [1, 1]} : vector<10x16xf32> to vector<8x16xf32>
      %369 = vector.broadcast %25 : f32 to vector<8x16xf32>
      %370 = arith.mulf %369, %368 : vector<8x16xf32>
      %371 = arith.addf %354, %370 : vector<8x16xf32>
      %372 = vector.broadcast %26 : f32 to vector<8x16xf32>
      %373 = arith.mulf %372, %368 : vector<8x16xf32>
      %374 = arith.addf %357, %373 : vector<8x16xf32>
      %375 = vector.extract_strided_slice %367 {offsets = [1, 0], sizes = [8, 16], strides = [1, 1]} : vector<10x16xf32> to vector<8x16xf32>
      %376 = vector.broadcast %73 : f32 to vector<8x16xf32>
      %377 = arith.mulf %376, %375 : vector<8x16xf32>
      %378 = arith.addf %361, %377 : vector<8x16xf32>
      %379 = vector.broadcast %74 : f32 to vector<8x16xf32>
      %380 = arith.mulf %379, %375 : vector<8x16xf32>
      %381 = arith.addf %364, %380 : vector<8x16xf32>
      %382 = vector.extract_strided_slice %367 {offsets = [2, 0], sizes = [8, 16], strides = [1, 1]} : vector<10x16xf32> to vector<8x16xf32>
      %383 = vector.broadcast %121 : f32 to vector<8x16xf32>
      %384 = arith.mulf %383, %382 : vector<8x16xf32>
      %385 = arith.addf %371, %384 : vector<8x16xf32>
      %386 = vector.broadcast %122 : f32 to vector<8x16xf32>
      %387 = arith.mulf %386, %382 : vector<8x16xf32>
      %388 = arith.addf %374, %387 : vector<8x16xf32>
      %c6_133 = arith.constant 6 : index
      %389 = arith.index_cast %240 : i32 to index
      %c0_134 = arith.constant 0 : index
      %390 = vector.load %arg9[%c6_133, %389, %c0_134] : memref<8x18x128xf32, #tpu.memory_space<vmem>>, vector<1x10x16xf32>
      %391 = vector.shape_cast %390 : vector<1x10x16xf32> to vector<10x16xf32>
      %392 = vector.extract_strided_slice %391 {offsets = [0, 0], sizes = [8, 16], strides = [1, 1]} : vector<10x16xf32> to vector<8x16xf32>
      %393 = vector.broadcast %27 : f32 to vector<8x16xf32>
      %394 = arith.mulf %393, %392 : vector<8x16xf32>
      %395 = arith.addf %378, %394 : vector<8x16xf32>
      %396 = vector.broadcast %28 : f32 to vector<8x16xf32>
      %397 = arith.mulf %396, %392 : vector<8x16xf32>
      %398 = arith.addf %381, %397 : vector<8x16xf32>
      %399 = vector.extract_strided_slice %391 {offsets = [1, 0], sizes = [8, 16], strides = [1, 1]} : vector<10x16xf32> to vector<8x16xf32>
      %400 = vector.broadcast %75 : f32 to vector<8x16xf32>
      %401 = arith.mulf %400, %399 : vector<8x16xf32>
      %402 = arith.addf %385, %401 : vector<8x16xf32>
      %403 = vector.broadcast %76 : f32 to vector<8x16xf32>
      %404 = arith.mulf %403, %399 : vector<8x16xf32>
      %405 = arith.addf %388, %404 : vector<8x16xf32>
      %406 = vector.extract_strided_slice %391 {offsets = [2, 0], sizes = [8, 16], strides = [1, 1]} : vector<10x16xf32> to vector<8x16xf32>
      %407 = vector.broadcast %123 : f32 to vector<8x16xf32>
      %408 = arith.mulf %407, %406 : vector<8x16xf32>
      %409 = arith.addf %395, %408 : vector<8x16xf32>
      %410 = vector.broadcast %124 : f32 to vector<8x16xf32>
      %411 = arith.mulf %410, %406 : vector<8x16xf32>
      %412 = arith.addf %398, %411 : vector<8x16xf32>
      %c7_135 = arith.constant 7 : index
      %413 = arith.index_cast %240 : i32 to index
      %c0_136 = arith.constant 0 : index
      %414 = vector.load %arg9[%c7_135, %413, %c0_136] : memref<8x18x128xf32, #tpu.memory_space<vmem>>, vector<1x10x16xf32>
      %415 = vector.shape_cast %414 : vector<1x10x16xf32> to vector<10x16xf32>
      %416 = vector.extract_strided_slice %415 {offsets = [0, 0], sizes = [8, 16], strides = [1, 1]} : vector<10x16xf32> to vector<8x16xf32>
      %417 = vector.broadcast %29 : f32 to vector<8x16xf32>
      %418 = arith.mulf %417, %416 : vector<8x16xf32>
      %419 = arith.addf %402, %418 : vector<8x16xf32>
      %420 = vector.broadcast %30 : f32 to vector<8x16xf32>
      %421 = arith.mulf %420, %416 : vector<8x16xf32>
      %422 = arith.addf %405, %421 : vector<8x16xf32>
      %423 = vector.extract_strided_slice %415 {offsets = [1, 0], sizes = [8, 16], strides = [1, 1]} : vector<10x16xf32> to vector<8x16xf32>
      %424 = vector.broadcast %77 : f32 to vector<8x16xf32>
      %425 = arith.mulf %424, %423 : vector<8x16xf32>
      %426 = arith.addf %409, %425 : vector<8x16xf32>
      %427 = vector.broadcast %78 : f32 to vector<8x16xf32>
      %428 = arith.mulf %427, %423 : vector<8x16xf32>
      %429 = arith.addf %412, %428 : vector<8x16xf32>
      %430 = vector.extract_strided_slice %415 {offsets = [2, 0], sizes = [8, 16], strides = [1, 1]} : vector<10x16xf32> to vector<8x16xf32>
      %431 = vector.broadcast %125 : f32 to vector<8x16xf32>
      %432 = arith.mulf %431, %430 : vector<8x16xf32>
      %433 = arith.addf %419, %432 : vector<8x16xf32>
      %434 = vector.broadcast %126 : f32 to vector<8x16xf32>
      %435 = arith.mulf %434, %430 : vector<8x16xf32>
      %436 = arith.addf %422, %435 : vector<8x16xf32>
      %c0_137 = arith.constant 0 : index
      %437 = arith.index_cast %240 : i32 to index
      %c1_138 = arith.constant 1 : index
      %438 = vector.load %arg9[%c0_137, %437, %c1_138] : memref<8x18x128xf32, #tpu.memory_space<vmem>>, vector<1x10x16xf32>
      %439 = vector.shape_cast %438 : vector<1x10x16xf32> to vector<10x16xf32>
      %440 = vector.extract_strided_slice %439 {offsets = [0, 0], sizes = [8, 16], strides = [1, 1]} : vector<10x16xf32> to vector<8x16xf32>
      %441 = vector.broadcast %31 : f32 to vector<8x16xf32>
      %442 = arith.mulf %441, %440 : vector<8x16xf32>
      %443 = arith.addf %426, %442 : vector<8x16xf32>
      %444 = vector.broadcast %32 : f32 to vector<8x16xf32>
      %445 = arith.mulf %444, %440 : vector<8x16xf32>
      %446 = arith.addf %429, %445 : vector<8x16xf32>
      %447 = vector.extract_strided_slice %439 {offsets = [1, 0], sizes = [8, 16], strides = [1, 1]} : vector<10x16xf32> to vector<8x16xf32>
      %448 = vector.broadcast %79 : f32 to vector<8x16xf32>
      %449 = arith.mulf %448, %447 : vector<8x16xf32>
      %450 = arith.addf %433, %449 : vector<8x16xf32>
      %451 = vector.broadcast %80 : f32 to vector<8x16xf32>
      %452 = arith.mulf %451, %447 : vector<8x16xf32>
      %453 = arith.addf %436, %452 : vector<8x16xf32>
      %454 = vector.extract_strided_slice %439 {offsets = [2, 0], sizes = [8, 16], strides = [1, 1]} : vector<10x16xf32> to vector<8x16xf32>
      %455 = vector.broadcast %127 : f32 to vector<8x16xf32>
      %456 = arith.mulf %455, %454 : vector<8x16xf32>
      %457 = arith.addf %443, %456 : vector<8x16xf32>
      %458 = vector.broadcast %128 : f32 to vector<8x16xf32>
      %459 = arith.mulf %458, %454 : vector<8x16xf32>
      %460 = arith.addf %446, %459 : vector<8x16xf32>
      %c1_139 = arith.constant 1 : index
      %461 = arith.index_cast %240 : i32 to index
      %c1_140 = arith.constant 1 : index
      %462 = vector.load %arg9[%c1_139, %461, %c1_140] : memref<8x18x128xf32, #tpu.memory_space<vmem>>, vector<1x10x16xf32>
      %463 = vector.shape_cast %462 : vector<1x10x16xf32> to vector<10x16xf32>
      %464 = vector.extract_strided_slice %463 {offsets = [0, 0], sizes = [8, 16], strides = [1, 1]} : vector<10x16xf32> to vector<8x16xf32>
      %465 = vector.broadcast %33 : f32 to vector<8x16xf32>
      %466 = arith.mulf %465, %464 : vector<8x16xf32>
      %467 = arith.addf %450, %466 : vector<8x16xf32>
      %468 = vector.broadcast %34 : f32 to vector<8x16xf32>
      %469 = arith.mulf %468, %464 : vector<8x16xf32>
      %470 = arith.addf %453, %469 : vector<8x16xf32>
      %471 = vector.extract_strided_slice %463 {offsets = [1, 0], sizes = [8, 16], strides = [1, 1]} : vector<10x16xf32> to vector<8x16xf32>
      %472 = vector.broadcast %81 : f32 to vector<8x16xf32>
      %473 = arith.mulf %472, %471 : vector<8x16xf32>
      %474 = arith.addf %457, %473 : vector<8x16xf32>
      %475 = vector.broadcast %82 : f32 to vector<8x16xf32>
      %476 = arith.mulf %475, %471 : vector<8x16xf32>
      %477 = arith.addf %460, %476 : vector<8x16xf32>
      %478 = vector.extract_strided_slice %463 {offsets = [2, 0], sizes = [8, 16], strides = [1, 1]} : vector<10x16xf32> to vector<8x16xf32>
      %479 = vector.broadcast %129 : f32 to vector<8x16xf32>
      %480 = arith.mulf %479, %478 : vector<8x16xf32>
      %481 = arith.addf %467, %480 : vector<8x16xf32>
      %482 = vector.broadcast %130 : f32 to vector<8x16xf32>
      %483 = arith.mulf %482, %478 : vector<8x16xf32>
      %484 = arith.addf %470, %483 : vector<8x16xf32>
      %c2_141 = arith.constant 2 : index
      %485 = arith.index_cast %240 : i32 to index
      %c1_142 = arith.constant 1 : index
      %486 = vector.load %arg9[%c2_141, %485, %c1_142] : memref<8x18x128xf32, #tpu.memory_space<vmem>>, vector<1x10x16xf32>
      %487 = vector.shape_cast %486 : vector<1x10x16xf32> to vector<10x16xf32>
      %488 = vector.extract_strided_slice %487 {offsets = [0, 0], sizes = [8, 16], strides = [1, 1]} : vector<10x16xf32> to vector<8x16xf32>
      %489 = vector.broadcast %35 : f32 to vector<8x16xf32>
      %490 = arith.mulf %489, %488 : vector<8x16xf32>
      %491 = arith.addf %474, %490 : vector<8x16xf32>
      %492 = vector.broadcast %36 : f32 to vector<8x16xf32>
      %493 = arith.mulf %492, %488 : vector<8x16xf32>
      %494 = arith.addf %477, %493 : vector<8x16xf32>
      %495 = vector.extract_strided_slice %487 {offsets = [1, 0], sizes = [8, 16], strides = [1, 1]} : vector<10x16xf32> to vector<8x16xf32>
      %496 = vector.broadcast %83 : f32 to vector<8x16xf32>
      %497 = arith.mulf %496, %495 : vector<8x16xf32>
      %498 = arith.addf %481, %497 : vector<8x16xf32>
      %499 = vector.broadcast %84 : f32 to vector<8x16xf32>
      %500 = arith.mulf %499, %495 : vector<8x16xf32>
      %501 = arith.addf %484, %500 : vector<8x16xf32>
      %502 = vector.extract_strided_slice %487 {offsets = [2, 0], sizes = [8, 16], strides = [1, 1]} : vector<10x16xf32> to vector<8x16xf32>
      %503 = vector.broadcast %131 : f32 to vector<8x16xf32>
      %504 = arith.mulf %503, %502 : vector<8x16xf32>
      %505 = arith.addf %491, %504 : vector<8x16xf32>
      %506 = vector.broadcast %132 : f32 to vector<8x16xf32>
      %507 = arith.mulf %506, %502 : vector<8x16xf32>
      %508 = arith.addf %494, %507 : vector<8x16xf32>
      %c3_143 = arith.constant 3 : index
      %509 = arith.index_cast %240 : i32 to index
      %c1_144 = arith.constant 1 : index
      %510 = vector.load %arg9[%c3_143, %509, %c1_144] : memref<8x18x128xf32, #tpu.memory_space<vmem>>, vector<1x10x16xf32>
      %511 = vector.shape_cast %510 : vector<1x10x16xf32> to vector<10x16xf32>
      %512 = vector.extract_strided_slice %511 {offsets = [0, 0], sizes = [8, 16], strides = [1, 1]} : vector<10x16xf32> to vector<8x16xf32>
      %513 = vector.broadcast %37 : f32 to vector<8x16xf32>
      %514 = arith.mulf %513, %512 : vector<8x16xf32>
      %515 = arith.addf %498, %514 : vector<8x16xf32>
      %516 = vector.broadcast %38 : f32 to vector<8x16xf32>
      %517 = arith.mulf %516, %512 : vector<8x16xf32>
      %518 = arith.addf %501, %517 : vector<8x16xf32>
      %519 = vector.extract_strided_slice %511 {offsets = [1, 0], sizes = [8, 16], strides = [1, 1]} : vector<10x16xf32> to vector<8x16xf32>
      %520 = vector.broadcast %85 : f32 to vector<8x16xf32>
      %521 = arith.mulf %520, %519 : vector<8x16xf32>
      %522 = arith.addf %505, %521 : vector<8x16xf32>
      %523 = vector.broadcast %86 : f32 to vector<8x16xf32>
      %524 = arith.mulf %523, %519 : vector<8x16xf32>
      %525 = arith.addf %508, %524 : vector<8x16xf32>
      %526 = vector.extract_strided_slice %511 {offsets = [2, 0], sizes = [8, 16], strides = [1, 1]} : vector<10x16xf32> to vector<8x16xf32>
      %527 = vector.broadcast %133 : f32 to vector<8x16xf32>
      %528 = arith.mulf %527, %526 : vector<8x16xf32>
      %529 = arith.addf %515, %528 : vector<8x16xf32>
      %530 = vector.broadcast %134 : f32 to vector<8x16xf32>
      %531 = arith.mulf %530, %526 : vector<8x16xf32>
      %532 = arith.addf %518, %531 : vector<8x16xf32>
      %c4_145 = arith.constant 4 : index
      %533 = arith.index_cast %240 : i32 to index
      %c1_146 = arith.constant 1 : index
      %534 = vector.load %arg9[%c4_145, %533, %c1_146] : memref<8x18x128xf32, #tpu.memory_space<vmem>>, vector<1x10x16xf32>
      %535 = vector.shape_cast %534 : vector<1x10x16xf32> to vector<10x16xf32>
      %536 = vector.extract_strided_slice %535 {offsets = [0, 0], sizes = [8, 16], strides = [1, 1]} : vector<10x16xf32> to vector<8x16xf32>
      %537 = vector.broadcast %39 : f32 to vector<8x16xf32>
      %538 = arith.mulf %537, %536 : vector<8x16xf32>
      %539 = arith.addf %522, %538 : vector<8x16xf32>
      %540 = vector.broadcast %40 : f32 to vector<8x16xf32>
      %541 = arith.mulf %540, %536 : vector<8x16xf32>
      %542 = arith.addf %525, %541 : vector<8x16xf32>
      %543 = vector.extract_strided_slice %535 {offsets = [1, 0], sizes = [8, 16], strides = [1, 1]} : vector<10x16xf32> to vector<8x16xf32>
      %544 = vector.broadcast %87 : f32 to vector<8x16xf32>
      %545 = arith.mulf %544, %543 : vector<8x16xf32>
      %546 = arith.addf %529, %545 : vector<8x16xf32>
      %547 = vector.broadcast %88 : f32 to vector<8x16xf32>
      %548 = arith.mulf %547, %543 : vector<8x16xf32>
      %549 = arith.addf %532, %548 : vector<8x16xf32>
      %550 = vector.extract_strided_slice %535 {offsets = [2, 0], sizes = [8, 16], strides = [1, 1]} : vector<10x16xf32> to vector<8x16xf32>
      %551 = vector.broadcast %135 : f32 to vector<8x16xf32>
      %552 = arith.mulf %551, %550 : vector<8x16xf32>
      %553 = arith.addf %539, %552 : vector<8x16xf32>
      %554 = vector.broadcast %136 : f32 to vector<8x16xf32>
      %555 = arith.mulf %554, %550 : vector<8x16xf32>
      %556 = arith.addf %542, %555 : vector<8x16xf32>
      %c5_147 = arith.constant 5 : index
      %557 = arith.index_cast %240 : i32 to index
      %c1_148 = arith.constant 1 : index
      %558 = vector.load %arg9[%c5_147, %557, %c1_148] : memref<8x18x128xf32, #tpu.memory_space<vmem>>, vector<1x10x16xf32>
      %559 = vector.shape_cast %558 : vector<1x10x16xf32> to vector<10x16xf32>
      %560 = vector.extract_strided_slice %559 {offsets = [0, 0], sizes = [8, 16], strides = [1, 1]} : vector<10x16xf32> to vector<8x16xf32>
      %561 = vector.broadcast %41 : f32 to vector<8x16xf32>
      %562 = arith.mulf %561, %560 : vector<8x16xf32>
      %563 = arith.addf %546, %562 : vector<8x16xf32>
      %564 = vector.broadcast %42 : f32 to vector<8x16xf32>
      %565 = arith.mulf %564, %560 : vector<8x16xf32>
      %566 = arith.addf %549, %565 : vector<8x16xf32>
      %567 = vector.extract_strided_slice %559 {offsets = [1, 0], sizes = [8, 16], strides = [1, 1]} : vector<10x16xf32> to vector<8x16xf32>
      %568 = vector.broadcast %89 : f32 to vector<8x16xf32>
      %569 = arith.mulf %568, %567 : vector<8x16xf32>
      %570 = arith.addf %553, %569 : vector<8x16xf32>
      %571 = vector.broadcast %90 : f32 to vector<8x16xf32>
      %572 = arith.mulf %571, %567 : vector<8x16xf32>
      %573 = arith.addf %556, %572 : vector<8x16xf32>
      %574 = vector.extract_strided_slice %559 {offsets = [2, 0], sizes = [8, 16], strides = [1, 1]} : vector<10x16xf32> to vector<8x16xf32>
      %575 = vector.broadcast %137 : f32 to vector<8x16xf32>
      %576 = arith.mulf %575, %574 : vector<8x16xf32>
      %577 = arith.addf %563, %576 : vector<8x16xf32>
      %578 = vector.broadcast %138 : f32 to vector<8x16xf32>
      %579 = arith.mulf %578, %574 : vector<8x16xf32>
      %580 = arith.addf %566, %579 : vector<8x16xf32>
      %c6_149 = arith.constant 6 : index
      %581 = arith.index_cast %240 : i32 to index
      %c1_150 = arith.constant 1 : index
      %582 = vector.load %arg9[%c6_149, %581, %c1_150] : memref<8x18x128xf32, #tpu.memory_space<vmem>>, vector<1x10x16xf32>
      %583 = vector.shape_cast %582 : vector<1x10x16xf32> to vector<10x16xf32>
      %584 = vector.extract_strided_slice %583 {offsets = [0, 0], sizes = [8, 16], strides = [1, 1]} : vector<10x16xf32> to vector<8x16xf32>
      %585 = vector.broadcast %43 : f32 to vector<8x16xf32>
      %586 = arith.mulf %585, %584 : vector<8x16xf32>
      %587 = arith.addf %570, %586 : vector<8x16xf32>
      %588 = vector.broadcast %44 : f32 to vector<8x16xf32>
      %589 = arith.mulf %588, %584 : vector<8x16xf32>
      %590 = arith.addf %573, %589 : vector<8x16xf32>
      %591 = vector.extract_strided_slice %583 {offsets = [1, 0], sizes = [8, 16], strides = [1, 1]} : vector<10x16xf32> to vector<8x16xf32>
      %592 = vector.broadcast %91 : f32 to vector<8x16xf32>
      %593 = arith.mulf %592, %591 : vector<8x16xf32>
      %594 = arith.addf %577, %593 : vector<8x16xf32>
      %595 = vector.broadcast %92 : f32 to vector<8x16xf32>
      %596 = arith.mulf %595, %591 : vector<8x16xf32>
      %597 = arith.addf %580, %596 : vector<8x16xf32>
      %598 = vector.extract_strided_slice %583 {offsets = [2, 0], sizes = [8, 16], strides = [1, 1]} : vector<10x16xf32> to vector<8x16xf32>
      %599 = vector.broadcast %139 : f32 to vector<8x16xf32>
      %600 = arith.mulf %599, %598 : vector<8x16xf32>
      %601 = arith.addf %587, %600 : vector<8x16xf32>
      %602 = vector.broadcast %140 : f32 to vector<8x16xf32>
      %603 = arith.mulf %602, %598 : vector<8x16xf32>
      %604 = arith.addf %590, %603 : vector<8x16xf32>
      %c7_151 = arith.constant 7 : index
      %605 = arith.index_cast %240 : i32 to index
      %c1_152 = arith.constant 1 : index
      %606 = vector.load %arg9[%c7_151, %605, %c1_152] : memref<8x18x128xf32, #tpu.memory_space<vmem>>, vector<1x10x16xf32>
      %607 = vector.shape_cast %606 : vector<1x10x16xf32> to vector<10x16xf32>
      %608 = vector.extract_strided_slice %607 {offsets = [0, 0], sizes = [8, 16], strides = [1, 1]} : vector<10x16xf32> to vector<8x16xf32>
      %609 = vector.broadcast %45 : f32 to vector<8x16xf32>
      %610 = arith.mulf %609, %608 : vector<8x16xf32>
      %611 = arith.addf %594, %610 : vector<8x16xf32>
      %612 = vector.broadcast %46 : f32 to vector<8x16xf32>
      %613 = arith.mulf %612, %608 : vector<8x16xf32>
      %614 = arith.addf %597, %613 : vector<8x16xf32>
      %615 = vector.extract_strided_slice %607 {offsets = [1, 0], sizes = [8, 16], strides = [1, 1]} : vector<10x16xf32> to vector<8x16xf32>
      %616 = vector.broadcast %93 : f32 to vector<8x16xf32>
      %617 = arith.mulf %616, %615 : vector<8x16xf32>
      %618 = arith.addf %601, %617 : vector<8x16xf32>
      %619 = vector.broadcast %94 : f32 to vector<8x16xf32>
      %620 = arith.mulf %619, %615 : vector<8x16xf32>
      %621 = arith.addf %604, %620 : vector<8x16xf32>
      %622 = vector.extract_strided_slice %607 {offsets = [2, 0], sizes = [8, 16], strides = [1, 1]} : vector<10x16xf32> to vector<8x16xf32>
      %623 = vector.broadcast %141 : f32 to vector<8x16xf32>
      %624 = arith.mulf %623, %622 : vector<8x16xf32>
      %625 = arith.addf %611, %624 : vector<8x16xf32>
      %626 = vector.broadcast %142 : f32 to vector<8x16xf32>
      %627 = arith.mulf %626, %622 : vector<8x16xf32>
      %628 = arith.addf %614, %627 : vector<8x16xf32>
      %c0_153 = arith.constant 0 : index
      %629 = arith.index_cast %240 : i32 to index
      %c2_154 = arith.constant 2 : index
      %630 = vector.load %arg9[%c0_153, %629, %c2_154] : memref<8x18x128xf32, #tpu.memory_space<vmem>>, vector<1x10x16xf32>
      %631 = vector.shape_cast %630 : vector<1x10x16xf32> to vector<10x16xf32>
      %632 = vector.extract_strided_slice %631 {offsets = [0, 0], sizes = [8, 16], strides = [1, 1]} : vector<10x16xf32> to vector<8x16xf32>
      %633 = vector.broadcast %47 : f32 to vector<8x16xf32>
      %634 = arith.mulf %633, %632 : vector<8x16xf32>
      %635 = arith.addf %618, %634 : vector<8x16xf32>
      %636 = vector.broadcast %48 : f32 to vector<8x16xf32>
      %637 = arith.mulf %636, %632 : vector<8x16xf32>
      %638 = arith.addf %621, %637 : vector<8x16xf32>
      %639 = vector.extract_strided_slice %631 {offsets = [1, 0], sizes = [8, 16], strides = [1, 1]} : vector<10x16xf32> to vector<8x16xf32>
      %640 = vector.broadcast %95 : f32 to vector<8x16xf32>
      %641 = arith.mulf %640, %639 : vector<8x16xf32>
      %642 = arith.addf %625, %641 : vector<8x16xf32>
      %643 = vector.broadcast %96 : f32 to vector<8x16xf32>
      %644 = arith.mulf %643, %639 : vector<8x16xf32>
      %645 = arith.addf %628, %644 : vector<8x16xf32>
      %646 = vector.extract_strided_slice %631 {offsets = [2, 0], sizes = [8, 16], strides = [1, 1]} : vector<10x16xf32> to vector<8x16xf32>
      %647 = vector.broadcast %143 : f32 to vector<8x16xf32>
      %648 = arith.mulf %647, %646 : vector<8x16xf32>
      %649 = arith.addf %635, %648 : vector<8x16xf32>
      %650 = vector.broadcast %144 : f32 to vector<8x16xf32>
      %651 = arith.mulf %650, %646 : vector<8x16xf32>
      %652 = arith.addf %638, %651 : vector<8x16xf32>
      %c1_155 = arith.constant 1 : index
      %653 = arith.index_cast %240 : i32 to index
      %c2_156 = arith.constant 2 : index
      %654 = vector.load %arg9[%c1_155, %653, %c2_156] : memref<8x18x128xf32, #tpu.memory_space<vmem>>, vector<1x10x16xf32>
      %655 = vector.shape_cast %654 : vector<1x10x16xf32> to vector<10x16xf32>
      %656 = vector.extract_strided_slice %655 {offsets = [0, 0], sizes = [8, 16], strides = [1, 1]} : vector<10x16xf32> to vector<8x16xf32>
      %657 = vector.broadcast %49 : f32 to vector<8x16xf32>
      %658 = arith.mulf %657, %656 : vector<8x16xf32>
      %659 = arith.addf %642, %658 : vector<8x16xf32>
      %660 = vector.broadcast %50 : f32 to vector<8x16xf32>
      %661 = arith.mulf %660, %656 : vector<8x16xf32>
      %662 = arith.addf %645, %661 : vector<8x16xf32>
      %663 = vector.extract_strided_slice %655 {offsets = [1, 0], sizes = [8, 16], strides = [1, 1]} : vector<10x16xf32> to vector<8x16xf32>
      %664 = vector.broadcast %97 : f32 to vector<8x16xf32>
      %665 = arith.mulf %664, %663 : vector<8x16xf32>
      %666 = arith.addf %649, %665 : vector<8x16xf32>
      %667 = vector.broadcast %98 : f32 to vector<8x16xf32>
      %668 = arith.mulf %667, %663 : vector<8x16xf32>
      %669 = arith.addf %652, %668 : vector<8x16xf32>
      %670 = vector.extract_strided_slice %655 {offsets = [2, 0], sizes = [8, 16], strides = [1, 1]} : vector<10x16xf32> to vector<8x16xf32>
      %671 = vector.broadcast %145 : f32 to vector<8x16xf32>
      %672 = arith.mulf %671, %670 : vector<8x16xf32>
      %673 = arith.addf %659, %672 : vector<8x16xf32>
      %674 = vector.broadcast %146 : f32 to vector<8x16xf32>
      %675 = arith.mulf %674, %670 : vector<8x16xf32>
      %676 = arith.addf %662, %675 : vector<8x16xf32>
      %c2_157 = arith.constant 2 : index
      %677 = arith.index_cast %240 : i32 to index
      %c2_158 = arith.constant 2 : index
      %678 = vector.load %arg9[%c2_157, %677, %c2_158] : memref<8x18x128xf32, #tpu.memory_space<vmem>>, vector<1x10x16xf32>
      %679 = vector.shape_cast %678 : vector<1x10x16xf32> to vector<10x16xf32>
      %680 = vector.extract_strided_slice %679 {offsets = [0, 0], sizes = [8, 16], strides = [1, 1]} : vector<10x16xf32> to vector<8x16xf32>
      %681 = vector.broadcast %51 : f32 to vector<8x16xf32>
      %682 = arith.mulf %681, %680 : vector<8x16xf32>
      %683 = arith.addf %666, %682 : vector<8x16xf32>
      %684 = vector.broadcast %52 : f32 to vector<8x16xf32>
      %685 = arith.mulf %684, %680 : vector<8x16xf32>
      %686 = arith.addf %669, %685 : vector<8x16xf32>
      %687 = vector.extract_strided_slice %679 {offsets = [1, 0], sizes = [8, 16], strides = [1, 1]} : vector<10x16xf32> to vector<8x16xf32>
      %688 = vector.broadcast %99 : f32 to vector<8x16xf32>
      %689 = arith.mulf %688, %687 : vector<8x16xf32>
      %690 = arith.addf %673, %689 : vector<8x16xf32>
      %691 = vector.broadcast %100 : f32 to vector<8x16xf32>
      %692 = arith.mulf %691, %687 : vector<8x16xf32>
      %693 = arith.addf %676, %692 : vector<8x16xf32>
      %694 = vector.extract_strided_slice %679 {offsets = [2, 0], sizes = [8, 16], strides = [1, 1]} : vector<10x16xf32> to vector<8x16xf32>
      %695 = vector.broadcast %147 : f32 to vector<8x16xf32>
      %696 = arith.mulf %695, %694 : vector<8x16xf32>
      %697 = arith.addf %683, %696 : vector<8x16xf32>
      %698 = vector.broadcast %148 : f32 to vector<8x16xf32>
      %699 = arith.mulf %698, %694 : vector<8x16xf32>
      %700 = arith.addf %686, %699 : vector<8x16xf32>
      %c3_159 = arith.constant 3 : index
      %701 = arith.index_cast %240 : i32 to index
      %c2_160 = arith.constant 2 : index
      %702 = vector.load %arg9[%c3_159, %701, %c2_160] : memref<8x18x128xf32, #tpu.memory_space<vmem>>, vector<1x10x16xf32>
      %703 = vector.shape_cast %702 : vector<1x10x16xf32> to vector<10x16xf32>
      %704 = vector.extract_strided_slice %703 {offsets = [0, 0], sizes = [8, 16], strides = [1, 1]} : vector<10x16xf32> to vector<8x16xf32>
      %705 = vector.broadcast %53 : f32 to vector<8x16xf32>
      %706 = arith.mulf %705, %704 : vector<8x16xf32>
      %707 = arith.addf %690, %706 : vector<8x16xf32>
      %708 = vector.broadcast %54 : f32 to vector<8x16xf32>
      %709 = arith.mulf %708, %704 : vector<8x16xf32>
      %710 = arith.addf %693, %709 : vector<8x16xf32>
      %711 = vector.extract_strided_slice %703 {offsets = [1, 0], sizes = [8, 16], strides = [1, 1]} : vector<10x16xf32> to vector<8x16xf32>
      %712 = vector.broadcast %101 : f32 to vector<8x16xf32>
      %713 = arith.mulf %712, %711 : vector<8x16xf32>
      %714 = arith.addf %697, %713 : vector<8x16xf32>
      %715 = vector.broadcast %102 : f32 to vector<8x16xf32>
      %716 = arith.mulf %715, %711 : vector<8x16xf32>
      %717 = arith.addf %700, %716 : vector<8x16xf32>
      %718 = vector.extract_strided_slice %703 {offsets = [2, 0], sizes = [8, 16], strides = [1, 1]} : vector<10x16xf32> to vector<8x16xf32>
      %719 = vector.broadcast %149 : f32 to vector<8x16xf32>
      %720 = arith.mulf %719, %718 : vector<8x16xf32>
      %721 = arith.addf %707, %720 : vector<8x16xf32>
      %722 = vector.broadcast %150 : f32 to vector<8x16xf32>
      %723 = arith.mulf %722, %718 : vector<8x16xf32>
      %724 = arith.addf %710, %723 : vector<8x16xf32>
      %c4_161 = arith.constant 4 : index
      %725 = arith.index_cast %240 : i32 to index
      %c2_162 = arith.constant 2 : index
      %726 = vector.load %arg9[%c4_161, %725, %c2_162] : memref<8x18x128xf32, #tpu.memory_space<vmem>>, vector<1x10x16xf32>
      %727 = vector.shape_cast %726 : vector<1x10x16xf32> to vector<10x16xf32>
      %728 = vector.extract_strided_slice %727 {offsets = [0, 0], sizes = [8, 16], strides = [1, 1]} : vector<10x16xf32> to vector<8x16xf32>
      %729 = vector.broadcast %55 : f32 to vector<8x16xf32>
      %730 = arith.mulf %729, %728 : vector<8x16xf32>
      %731 = arith.addf %714, %730 : vector<8x16xf32>
      %732 = vector.broadcast %56 : f32 to vector<8x16xf32>
      %733 = arith.mulf %732, %728 : vector<8x16xf32>
      %734 = arith.addf %717, %733 : vector<8x16xf32>
      %735 = vector.extract_strided_slice %727 {offsets = [1, 0], sizes = [8, 16], strides = [1, 1]} : vector<10x16xf32> to vector<8x16xf32>
      %736 = vector.broadcast %103 : f32 to vector<8x16xf32>
      %737 = arith.mulf %736, %735 : vector<8x16xf32>
      %738 = arith.addf %721, %737 : vector<8x16xf32>
      %739 = vector.broadcast %104 : f32 to vector<8x16xf32>
      %740 = arith.mulf %739, %735 : vector<8x16xf32>
      %741 = arith.addf %724, %740 : vector<8x16xf32>
      %742 = vector.extract_strided_slice %727 {offsets = [2, 0], sizes = [8, 16], strides = [1, 1]} : vector<10x16xf32> to vector<8x16xf32>
      %743 = vector.broadcast %151 : f32 to vector<8x16xf32>
      %744 = arith.mulf %743, %742 : vector<8x16xf32>
      %745 = arith.addf %731, %744 : vector<8x16xf32>
      %746 = vector.broadcast %152 : f32 to vector<8x16xf32>
      %747 = arith.mulf %746, %742 : vector<8x16xf32>
      %748 = arith.addf %734, %747 : vector<8x16xf32>
      %c5_163 = arith.constant 5 : index
      %749 = arith.index_cast %240 : i32 to index
      %c2_164 = arith.constant 2 : index
      %750 = vector.load %arg9[%c5_163, %749, %c2_164] : memref<8x18x128xf32, #tpu.memory_space<vmem>>, vector<1x10x16xf32>
      %751 = vector.shape_cast %750 : vector<1x10x16xf32> to vector<10x16xf32>
      %752 = vector.extract_strided_slice %751 {offsets = [0, 0], sizes = [8, 16], strides = [1, 1]} : vector<10x16xf32> to vector<8x16xf32>
      %753 = vector.broadcast %57 : f32 to vector<8x16xf32>
      %754 = arith.mulf %753, %752 : vector<8x16xf32>
      %755 = arith.addf %738, %754 : vector<8x16xf32>
      %756 = vector.broadcast %58 : f32 to vector<8x16xf32>
      %757 = arith.mulf %756, %752 : vector<8x16xf32>
      %758 = arith.addf %741, %757 : vector<8x16xf32>
      %759 = vector.extract_strided_slice %751 {offsets = [1, 0], sizes = [8, 16], strides = [1, 1]} : vector<10x16xf32> to vector<8x16xf32>
      %760 = vector.broadcast %105 : f32 to vector<8x16xf32>
      %761 = arith.mulf %760, %759 : vector<8x16xf32>
      %762 = arith.addf %745, %761 : vector<8x16xf32>
      %763 = vector.broadcast %106 : f32 to vector<8x16xf32>
      %764 = arith.mulf %763, %759 : vector<8x16xf32>
      %765 = arith.addf %748, %764 : vector<8x16xf32>
      %766 = vector.extract_strided_slice %751 {offsets = [2, 0], sizes = [8, 16], strides = [1, 1]} : vector<10x16xf32> to vector<8x16xf32>
      %767 = vector.broadcast %153 : f32 to vector<8x16xf32>
      %768 = arith.mulf %767, %766 : vector<8x16xf32>
      %769 = arith.addf %755, %768 : vector<8x16xf32>
      %770 = vector.broadcast %154 : f32 to vector<8x16xf32>
      %771 = arith.mulf %770, %766 : vector<8x16xf32>
      %772 = arith.addf %758, %771 : vector<8x16xf32>
      %c6_165 = arith.constant 6 : index
      %773 = arith.index_cast %240 : i32 to index
      %c2_166 = arith.constant 2 : index
      %774 = vector.load %arg9[%c6_165, %773, %c2_166] : memref<8x18x128xf32, #tpu.memory_space<vmem>>, vector<1x10x16xf32>
      %775 = vector.shape_cast %774 : vector<1x10x16xf32> to vector<10x16xf32>
      %776 = vector.extract_strided_slice %775 {offsets = [0, 0], sizes = [8, 16], strides = [1, 1]} : vector<10x16xf32> to vector<8x16xf32>
      %777 = vector.broadcast %59 : f32 to vector<8x16xf32>
      %778 = arith.mulf %777, %776 : vector<8x16xf32>
      %779 = arith.addf %762, %778 : vector<8x16xf32>
      %780 = vector.broadcast %60 : f32 to vector<8x16xf32>
      %781 = arith.mulf %780, %776 : vector<8x16xf32>
      %782 = arith.addf %765, %781 : vector<8x16xf32>
      %783 = vector.extract_strided_slice %775 {offsets = [1, 0], sizes = [8, 16], strides = [1, 1]} : vector<10x16xf32> to vector<8x16xf32>
      %784 = vector.broadcast %107 : f32 to vector<8x16xf32>
      %785 = arith.mulf %784, %783 : vector<8x16xf32>
      %786 = arith.addf %769, %785 : vector<8x16xf32>
      %787 = vector.broadcast %108 : f32 to vector<8x16xf32>
      %788 = arith.mulf %787, %783 : vector<8x16xf32>
      %789 = arith.addf %772, %788 : vector<8x16xf32>
      %790 = vector.extract_strided_slice %775 {offsets = [2, 0], sizes = [8, 16], strides = [1, 1]} : vector<10x16xf32> to vector<8x16xf32>
      %791 = vector.broadcast %155 : f32 to vector<8x16xf32>
      %792 = arith.mulf %791, %790 : vector<8x16xf32>
      %793 = arith.addf %779, %792 : vector<8x16xf32>
      %794 = vector.broadcast %156 : f32 to vector<8x16xf32>
      %795 = arith.mulf %794, %790 : vector<8x16xf32>
      %796 = arith.addf %782, %795 : vector<8x16xf32>
      %c7_167 = arith.constant 7 : index
      %797 = arith.index_cast %240 : i32 to index
      %c2_168 = arith.constant 2 : index
      %798 = vector.load %arg9[%c7_167, %797, %c2_168] : memref<8x18x128xf32, #tpu.memory_space<vmem>>, vector<1x10x16xf32>
      %799 = vector.shape_cast %798 : vector<1x10x16xf32> to vector<10x16xf32>
      %800 = vector.extract_strided_slice %799 {offsets = [0, 0], sizes = [8, 16], strides = [1, 1]} : vector<10x16xf32> to vector<8x16xf32>
      %801 = vector.broadcast %61 : f32 to vector<8x16xf32>
      %802 = arith.mulf %801, %800 : vector<8x16xf32>
      %803 = arith.addf %786, %802 : vector<8x16xf32>
      %804 = vector.broadcast %62 : f32 to vector<8x16xf32>
      %805 = arith.mulf %804, %800 : vector<8x16xf32>
      %806 = arith.addf %789, %805 : vector<8x16xf32>
      %807 = vector.extract_strided_slice %799 {offsets = [1, 0], sizes = [8, 16], strides = [1, 1]} : vector<10x16xf32> to vector<8x16xf32>
      %808 = vector.broadcast %109 : f32 to vector<8x16xf32>
      %809 = arith.mulf %808, %807 : vector<8x16xf32>
      %810 = arith.addf %793, %809 : vector<8x16xf32>
      %811 = vector.broadcast %110 : f32 to vector<8x16xf32>
      %812 = arith.mulf %811, %807 : vector<8x16xf32>
      %813 = arith.addf %796, %812 : vector<8x16xf32>
      %814 = vector.extract_strided_slice %799 {offsets = [2, 0], sizes = [8, 16], strides = [1, 1]} : vector<10x16xf32> to vector<8x16xf32>
      %815 = vector.broadcast %157 : f32 to vector<8x16xf32>
      %816 = arith.mulf %815, %814 : vector<8x16xf32>
      %817 = arith.addf %803, %816 : vector<8x16xf32>
      %818 = vector.broadcast %158 : f32 to vector<8x16xf32>
      %819 = arith.mulf %818, %814 : vector<8x16xf32>
      %820 = arith.addf %806, %819 : vector<8x16xf32>
      %821 = arith.addf %810, %817 : vector<8x16xf32>
      %822 = vector.broadcast %159 : f32 to vector<8x16xf32>
      %823 = arith.addf %821, %822 : vector<8x16xf32>
      %cst_169 = arith.constant 0.000000e+00 : f32
      %824 = vector.broadcast %cst_169 : f32 to vector<8x16xf32>
      %825 = arith.cmpf ogt, %823, %824 : vector<8x16xf32>
      %cst_170 = arith.constant 1.000000e-01 : f32
      %826 = vector.broadcast %cst_170 : f32 to vector<8x16xf32>
      %827 = arith.mulf %826, %823 : vector<8x16xf32>
      %828 = arith.select %825, %823, %827 : vector<8x16xi1>, vector<8x16xf32>
      %c0_171 = arith.constant 0 : index
      %c0_172 = arith.constant 0 : index
      %829 = arith.index_cast %240 : i32 to index
      %c0_173 = arith.constant 0 : index
      %830 = vector.load %arg6[%c0_171, %c0_172, %829, %c0_173] : memref<1x2x16x16xf32, #tpu.memory_space<vmem>>, vector<1x1x8x16xf32>
      %831 = vector.shape_cast %830 : vector<1x1x8x16xf32> to vector<8x16xf32>
      %832 = vector.shape_cast %828 : vector<8x16xf32> to vector<1x1x8x16xf32>
      tpu.vector_store %arg6[%c0_171, %c0_172, %829, %c0_173], %832 {strides = array<i32>} : memref<1x2x16x16xf32, #tpu.memory_space<vmem>>, vector<1x1x8x16xf32>,
      %c1_i32_174 = arith.constant 1 : i32
      %833 = arith.addi %240, %c1_i32_174 : i32
      %c0_175 = arith.constant 0 : index
      %834 = arith.index_cast %833 : i32 to index
      %c1_176 = arith.constant 1 : index
      %835 = vector.load %arg10[%c0_175, %834, %c1_176] : memref<2x18x128xf32, #tpu.memory_space<vmem>>, vector<1x8x16xf32>
      %836 = vector.shape_cast %835 : vector<1x8x16xf32> to vector<8x16xf32>
      %837 = vector.shape_cast %828 : vector<8x16xf32> to vector<1x8x16xf32>
      tpu.vector_store %arg10[%c0_175, %834, %c1_176], %837 {strides = array<i32>} : memref<2x18x128xf32, #tpu.memory_space<vmem>>, vector<1x8x16xf32>,
      %838 = arith.addf %813, %820 : vector<8x16xf32>
      %839 = vector.broadcast %160 : f32 to vector<8x16xf32>
      %840 = arith.addf %838, %839 : vector<8x16xf32>
      %cst_177 = arith.constant 0.000000e+00 : f32
      %841 = vector.broadcast %cst_177 : f32 to vector<8x16xf32>
      %842 = arith.cmpf ogt, %840, %841 : vector<8x16xf32>
      %cst_178 = arith.constant 1.000000e-01 : f32
      %843 = vector.broadcast %cst_178 : f32 to vector<8x16xf32>
      %844 = arith.mulf %843, %840 : vector<8x16xf32>
      %845 = arith.select %842, %840, %844 : vector<8x16xi1>, vector<8x16xf32>
      %c0_179 = arith.constant 0 : index
      %c1_180 = arith.constant 1 : index
      %846 = arith.index_cast %240 : i32 to index
      %c0_181 = arith.constant 0 : index
      %847 = vector.load %arg6[%c0_179, %c1_180, %846, %c0_181] : memref<1x2x16x16xf32, #tpu.memory_space<vmem>>, vector<1x1x8x16xf32>
      %848 = vector.shape_cast %847 : vector<1x1x8x16xf32> to vector<8x16xf32>
      %849 = vector.shape_cast %845 : vector<8x16xf32> to vector<1x1x8x16xf32>
      tpu.vector_store %arg6[%c0_179, %c1_180, %846, %c0_181], %849 {strides = array<i32>} : memref<1x2x16x16xf32, #tpu.memory_space<vmem>>, vector<1x1x8x16xf32>,
      %c1_i32_182 = arith.constant 1 : i32
      %850 = arith.addi %240, %c1_i32_182 : i32
      %c1_183 = arith.constant 1 : index
      %851 = arith.index_cast %850 : i32 to index
      %c1_184 = arith.constant 1 : index
      %852 = vector.load %arg10[%c1_183, %851, %c1_184] : memref<2x18x128xf32, #tpu.memory_space<vmem>>, vector<1x8x16xf32>
      %853 = vector.shape_cast %852 : vector<1x8x16xf32> to vector<8x16xf32>
      %854 = vector.shape_cast %845 : vector<8x16xf32> to vector<1x8x16xf32>
      tpu.vector_store %arg10[%c1_183, %851, %c1_184], %854 {strides = array<i32>} : memref<2x18x128xf32, #tpu.memory_space<vmem>>, vector<1x8x16xf32>,
    }
    %c2_i32_112 = arith.constant 2 : i32
    %c0_i32_113 = arith.constant 0 : i32
    %c2_i32_114 = arith.constant 2 : i32
    %238 = arith.addi %c0_i32_113, %c2_i32_114 : i32
    %c1_i32_115 = arith.constant 1 : i32
    scf.for %arg11 = %c0_i32_113 to %238 step %c1_i32_115  : i32 {
      %c8_i32 = arith.constant 8 : i32
      %239 = arith.muli %arg11, %c8_i32 : i32
      %240 = tpu.assume_multiple %239, 8 : i32
      %cst_117 = arith.constant 0.000000e+00 : f32
      %241 = vector.broadcast %cst_117 : f32 to vector<8x16xf32>
      %cst_118 = arith.constant 0.000000e+00 : f32
      %242 = vector.broadcast %cst_118 : f32 to vector<8x16xf32>
      %cst_119 = arith.constant 0.000000e+00 : f32
      %243 = vector.broadcast %cst_119 : f32 to vector<8x16xf32>
      %cst_120 = arith.constant 0.000000e+00 : f32
      %244 = vector.broadcast %cst_120 : f32 to vector<8x16xf32>
      %cst_121 = arith.constant 0.000000e+00 : f32
      %245 = vector.broadcast %cst_121 : f32 to vector<8x16xf32>
      %cst_122 = arith.constant 0.000000e+00 : f32
      %246 = vector.broadcast %cst_122 : f32 to vector<8x16xf32>
      %cst_123 = arith.constant 0.000000e+00 : f32
      %247 = vector.broadcast %cst_123 : f32 to vector<8x16xf32>
      %cst_124 = arith.constant 0.000000e+00 : f32
      %248 = vector.broadcast %cst_124 : f32 to vector<8x16xf32>
      %c0_125 = arith.constant 0 : index
      %249 = arith.index_cast %240 : i32 to index
      %c0_126 = arith.constant 0 : index
      %250 = vector.load %arg10[%c0_125, %249, %c0_126] : memref<2x18x128xf32, #tpu.memory_space<vmem>>, vector<1x10x16xf32>
      %251 = vector.shape_cast %250 : vector<1x10x16xf32> to vector<10x16xf32>
      %252 = vector.extract_strided_slice %251 {offsets = [0, 0], sizes = [8, 16], strides = [1, 1]} : vector<10x16xf32> to vector<8x16xf32>
      %253 = vector.broadcast %161 : f32 to vector<8x16xf32>
      %254 = arith.mulf %253, %252 : vector<8x16xf32>
      %255 = arith.addf %241, %254 : vector<8x16xf32>
      %256 = vector.broadcast %162 : f32 to vector<8x16xf32>
      %257 = arith.mulf %256, %252 : vector<8x16xf32>
      %258 = arith.addf %243, %257 : vector<8x16xf32>
      %259 = vector.broadcast %163 : f32 to vector<8x16xf32>
      %260 = arith.mulf %259, %252 : vector<8x16xf32>
      %261 = arith.addf %245, %260 : vector<8x16xf32>
      %262 = vector.broadcast %164 : f32 to vector<8x16xf32>
      %263 = arith.mulf %262, %252 : vector<8x16xf32>
      %264 = arith.addf %247, %263 : vector<8x16xf32>
      %265 = vector.extract_strided_slice %251 {offsets = [1, 0], sizes = [8, 16], strides = [1, 1]} : vector<10x16xf32> to vector<8x16xf32>
      %266 = vector.broadcast %185 : f32 to vector<8x16xf32>
      %267 = arith.mulf %266, %265 : vector<8x16xf32>
      %268 = arith.addf %242, %267 : vector<8x16xf32>
      %269 = vector.broadcast %186 : f32 to vector<8x16xf32>
      %270 = arith.mulf %269, %265 : vector<8x16xf32>
      %271 = arith.addf %244, %270 : vector<8x16xf32>
      %272 = vector.broadcast %187 : f32 to vector<8x16xf32>
      %273 = arith.mulf %272, %265 : vector<8x16xf32>
      %274 = arith.addf %246, %273 : vector<8x16xf32>
      %275 = vector.broadcast %188 : f32 to vector<8x16xf32>
      %276 = arith.mulf %275, %265 : vector<8x16xf32>
      %277 = arith.addf %248, %276 : vector<8x16xf32>
      %278 = vector.extract_strided_slice %251 {offsets = [2, 0], sizes = [8, 16], strides = [1, 1]} : vector<10x16xf32> to vector<8x16xf32>
      %279 = vector.broadcast %209 : f32 to vector<8x16xf32>
      %280 = arith.mulf %279, %278 : vector<8x16xf32>
      %281 = arith.addf %255, %280 : vector<8x16xf32>
      %282 = vector.broadcast %210 : f32 to vector<8x16xf32>
      %283 = arith.mulf %282, %278 : vector<8x16xf32>
      %284 = arith.addf %258, %283 : vector<8x16xf32>
      %285 = vector.broadcast %211 : f32 to vector<8x16xf32>
      %286 = arith.mulf %285, %278 : vector<8x16xf32>
      %287 = arith.addf %261, %286 : vector<8x16xf32>
      %288 = vector.broadcast %212 : f32 to vector<8x16xf32>
      %289 = arith.mulf %288, %278 : vector<8x16xf32>
      %290 = arith.addf %264, %289 : vector<8x16xf32>
      %c1_127 = arith.constant 1 : index
      %291 = arith.index_cast %240 : i32 to index
      %c0_128 = arith.constant 0 : index
      %292 = vector.load %arg10[%c1_127, %291, %c0_128] : memref<2x18x128xf32, #tpu.memory_space<vmem>>, vector<1x10x16xf32>
      %293 = vector.shape_cast %292 : vector<1x10x16xf32> to vector<10x16xf32>
      %294 = vector.extract_strided_slice %293 {offsets = [0, 0], sizes = [8, 16], strides = [1, 1]} : vector<10x16xf32> to vector<8x16xf32>
      %295 = vector.broadcast %165 : f32 to vector<8x16xf32>
      %296 = arith.mulf %295, %294 : vector<8x16xf32>
      %297 = arith.addf %268, %296 : vector<8x16xf32>
      %298 = vector.broadcast %166 : f32 to vector<8x16xf32>
      %299 = arith.mulf %298, %294 : vector<8x16xf32>
      %300 = arith.addf %271, %299 : vector<8x16xf32>
      %301 = vector.broadcast %167 : f32 to vector<8x16xf32>
      %302 = arith.mulf %301, %294 : vector<8x16xf32>
      %303 = arith.addf %274, %302 : vector<8x16xf32>
      %304 = vector.broadcast %168 : f32 to vector<8x16xf32>
      %305 = arith.mulf %304, %294 : vector<8x16xf32>
      %306 = arith.addf %277, %305 : vector<8x16xf32>
      %307 = vector.extract_strided_slice %293 {offsets = [1, 0], sizes = [8, 16], strides = [1, 1]} : vector<10x16xf32> to vector<8x16xf32>
      %308 = vector.broadcast %189 : f32 to vector<8x16xf32>
      %309 = arith.mulf %308, %307 : vector<8x16xf32>
      %310 = arith.addf %281, %309 : vector<8x16xf32>
      %311 = vector.broadcast %190 : f32 to vector<8x16xf32>
      %312 = arith.mulf %311, %307 : vector<8x16xf32>
      %313 = arith.addf %284, %312 : vector<8x16xf32>
      %314 = vector.broadcast %191 : f32 to vector<8x16xf32>
      %315 = arith.mulf %314, %307 : vector<8x16xf32>
      %316 = arith.addf %287, %315 : vector<8x16xf32>
      %317 = vector.broadcast %192 : f32 to vector<8x16xf32>
      %318 = arith.mulf %317, %307 : vector<8x16xf32>
      %319 = arith.addf %290, %318 : vector<8x16xf32>
      %320 = vector.extract_strided_slice %293 {offsets = [2, 0], sizes = [8, 16], strides = [1, 1]} : vector<10x16xf32> to vector<8x16xf32>
      %321 = vector.broadcast %213 : f32 to vector<8x16xf32>
      %322 = arith.mulf %321, %320 : vector<8x16xf32>
      %323 = arith.addf %297, %322 : vector<8x16xf32>
      %324 = vector.broadcast %214 : f32 to vector<8x16xf32>
      %325 = arith.mulf %324, %320 : vector<8x16xf32>
      %326 = arith.addf %300, %325 : vector<8x16xf32>
      %327 = vector.broadcast %215 : f32 to vector<8x16xf32>
      %328 = arith.mulf %327, %320 : vector<8x16xf32>
      %329 = arith.addf %303, %328 : vector<8x16xf32>
      %330 = vector.broadcast %216 : f32 to vector<8x16xf32>
      %331 = arith.mulf %330, %320 : vector<8x16xf32>
      %332 = arith.addf %306, %331 : vector<8x16xf32>
      %c0_129 = arith.constant 0 : index
      %333 = arith.index_cast %240 : i32 to index
      %c1_130 = arith.constant 1 : index
      %334 = vector.load %arg10[%c0_129, %333, %c1_130] : memref<2x18x128xf32, #tpu.memory_space<vmem>>, vector<1x10x16xf32>
      %335 = vector.shape_cast %334 : vector<1x10x16xf32> to vector<10x16xf32>
      %336 = vector.extract_strided_slice %335 {offsets = [0, 0], sizes = [8, 16], strides = [1, 1]} : vector<10x16xf32> to vector<8x16xf32>
      %337 = vector.broadcast %169 : f32 to vector<8x16xf32>
      %338 = arith.mulf %337, %336 : vector<8x16xf32>
      %339 = arith.addf %310, %338 : vector<8x16xf32>
      %340 = vector.broadcast %170 : f32 to vector<8x16xf32>
      %341 = arith.mulf %340, %336 : vector<8x16xf32>
      %342 = arith.addf %313, %341 : vector<8x16xf32>
      %343 = vector.broadcast %171 : f32 to vector<8x16xf32>
      %344 = arith.mulf %343, %336 : vector<8x16xf32>
      %345 = arith.addf %316, %344 : vector<8x16xf32>
      %346 = vector.broadcast %172 : f32 to vector<8x16xf32>
      %347 = arith.mulf %346, %336 : vector<8x16xf32>
      %348 = arith.addf %319, %347 : vector<8x16xf32>
      %349 = vector.extract_strided_slice %335 {offsets = [1, 0], sizes = [8, 16], strides = [1, 1]} : vector<10x16xf32> to vector<8x16xf32>
      %350 = vector.broadcast %193 : f32 to vector<8x16xf32>
      %351 = arith.mulf %350, %349 : vector<8x16xf32>
      %352 = arith.addf %323, %351 : vector<8x16xf32>
      %353 = vector.broadcast %194 : f32 to vector<8x16xf32>
      %354 = arith.mulf %353, %349 : vector<8x16xf32>
      %355 = arith.addf %326, %354 : vector<8x16xf32>
      %356 = vector.broadcast %195 : f32 to vector<8x16xf32>
      %357 = arith.mulf %356, %349 : vector<8x16xf32>
      %358 = arith.addf %329, %357 : vector<8x16xf32>
      %359 = vector.broadcast %196 : f32 to vector<8x16xf32>
      %360 = arith.mulf %359, %349 : vector<8x16xf32>
      %361 = arith.addf %332, %360 : vector<8x16xf32>
      %362 = vector.extract_strided_slice %335 {offsets = [2, 0], sizes = [8, 16], strides = [1, 1]} : vector<10x16xf32> to vector<8x16xf32>
      %363 = vector.broadcast %217 : f32 to vector<8x16xf32>
      %364 = arith.mulf %363, %362 : vector<8x16xf32>
      %365 = arith.addf %339, %364 : vector<8x16xf32>
      %366 = vector.broadcast %218 : f32 to vector<8x16xf32>
      %367 = arith.mulf %366, %362 : vector<8x16xf32>
      %368 = arith.addf %342, %367 : vector<8x16xf32>
      %369 = vector.broadcast %219 : f32 to vector<8x16xf32>
      %370 = arith.mulf %369, %362 : vector<8x16xf32>
      %371 = arith.addf %345, %370 : vector<8x16xf32>
      %372 = vector.broadcast %220 : f32 to vector<8x16xf32>
      %373 = arith.mulf %372, %362 : vector<8x16xf32>
      %374 = arith.addf %348, %373 : vector<8x16xf32>
      %c1_131 = arith.constant 1 : index
      %375 = arith.index_cast %240 : i32 to index
      %c1_132 = arith.constant 1 : index
      %376 = vector.load %arg10[%c1_131, %375, %c1_132] : memref<2x18x128xf32, #tpu.memory_space<vmem>>, vector<1x10x16xf32>
      %377 = vector.shape_cast %376 : vector<1x10x16xf32> to vector<10x16xf32>
      %378 = vector.extract_strided_slice %377 {offsets = [0, 0], sizes = [8, 16], strides = [1, 1]} : vector<10x16xf32> to vector<8x16xf32>
      %379 = vector.broadcast %173 : f32 to vector<8x16xf32>
      %380 = arith.mulf %379, %378 : vector<8x16xf32>
      %381 = arith.addf %352, %380 : vector<8x16xf32>
      %382 = vector.broadcast %174 : f32 to vector<8x16xf32>
      %383 = arith.mulf %382, %378 : vector<8x16xf32>
      %384 = arith.addf %355, %383 : vector<8x16xf32>
      %385 = vector.broadcast %175 : f32 to vector<8x16xf32>
      %386 = arith.mulf %385, %378 : vector<8x16xf32>
      %387 = arith.addf %358, %386 : vector<8x16xf32>
      %388 = vector.broadcast %176 : f32 to vector<8x16xf32>
      %389 = arith.mulf %388, %378 : vector<8x16xf32>
      %390 = arith.addf %361, %389 : vector<8x16xf32>
      %391 = vector.extract_strided_slice %377 {offsets = [1, 0], sizes = [8, 16], strides = [1, 1]} : vector<10x16xf32> to vector<8x16xf32>
      %392 = vector.broadcast %197 : f32 to vector<8x16xf32>
      %393 = arith.mulf %392, %391 : vector<8x16xf32>
      %394 = arith.addf %365, %393 : vector<8x16xf32>
      %395 = vector.broadcast %198 : f32 to vector<8x16xf32>
      %396 = arith.mulf %395, %391 : vector<8x16xf32>
      %397 = arith.addf %368, %396 : vector<8x16xf32>
      %398 = vector.broadcast %199 : f32 to vector<8x16xf32>
      %399 = arith.mulf %398, %391 : vector<8x16xf32>
      %400 = arith.addf %371, %399 : vector<8x16xf32>
      %401 = vector.broadcast %200 : f32 to vector<8x16xf32>
      %402 = arith.mulf %401, %391 : vector<8x16xf32>
      %403 = arith.addf %374, %402 : vector<8x16xf32>
      %404 = vector.extract_strided_slice %377 {offsets = [2, 0], sizes = [8, 16], strides = [1, 1]} : vector<10x16xf32> to vector<8x16xf32>
      %405 = vector.broadcast %221 : f32 to vector<8x16xf32>
      %406 = arith.mulf %405, %404 : vector<8x16xf32>
      %407 = arith.addf %381, %406 : vector<8x16xf32>
      %408 = vector.broadcast %222 : f32 to vector<8x16xf32>
      %409 = arith.mulf %408, %404 : vector<8x16xf32>
      %410 = arith.addf %384, %409 : vector<8x16xf32>
      %411 = vector.broadcast %223 : f32 to vector<8x16xf32>
      %412 = arith.mulf %411, %404 : vector<8x16xf32>
      %413 = arith.addf %387, %412 : vector<8x16xf32>
      %414 = vector.broadcast %224 : f32 to vector<8x16xf32>
      %415 = arith.mulf %414, %404 : vector<8x16xf32>
      %416 = arith.addf %390, %415 : vector<8x16xf32>
      %c0_133 = arith.constant 0 : index
      %417 = arith.index_cast %240 : i32 to index
      %c2_134 = arith.constant 2 : index
      %418 = vector.load %arg10[%c0_133, %417, %c2_134] : memref<2x18x128xf32, #tpu.memory_space<vmem>>, vector<1x10x16xf32>
      %419 = vector.shape_cast %418 : vector<1x10x16xf32> to vector<10x16xf32>
      %420 = vector.extract_strided_slice %419 {offsets = [0, 0], sizes = [8, 16], strides = [1, 1]} : vector<10x16xf32> to vector<8x16xf32>
      %421 = vector.broadcast %177 : f32 to vector<8x16xf32>
      %422 = arith.mulf %421, %420 : vector<8x16xf32>
      %423 = arith.addf %394, %422 : vector<8x16xf32>
      %424 = vector.broadcast %178 : f32 to vector<8x16xf32>
      %425 = arith.mulf %424, %420 : vector<8x16xf32>
      %426 = arith.addf %397, %425 : vector<8x16xf32>
      %427 = vector.broadcast %179 : f32 to vector<8x16xf32>
      %428 = arith.mulf %427, %420 : vector<8x16xf32>
      %429 = arith.addf %400, %428 : vector<8x16xf32>
      %430 = vector.broadcast %180 : f32 to vector<8x16xf32>
      %431 = arith.mulf %430, %420 : vector<8x16xf32>
      %432 = arith.addf %403, %431 : vector<8x16xf32>
      %433 = vector.extract_strided_slice %419 {offsets = [1, 0], sizes = [8, 16], strides = [1, 1]} : vector<10x16xf32> to vector<8x16xf32>
      %434 = vector.broadcast %201 : f32 to vector<8x16xf32>
      %435 = arith.mulf %434, %433 : vector<8x16xf32>
      %436 = arith.addf %407, %435 : vector<8x16xf32>
      %437 = vector.broadcast %202 : f32 to vector<8x16xf32>
      %438 = arith.mulf %437, %433 : vector<8x16xf32>
      %439 = arith.addf %410, %438 : vector<8x16xf32>
      %440 = vector.broadcast %203 : f32 to vector<8x16xf32>
      %441 = arith.mulf %440, %433 : vector<8x16xf32>
      %442 = arith.addf %413, %441 : vector<8x16xf32>
      %443 = vector.broadcast %204 : f32 to vector<8x16xf32>
      %444 = arith.mulf %443, %433 : vector<8x16xf32>
      %445 = arith.addf %416, %444 : vector<8x16xf32>
      %446 = vector.extract_strided_slice %419 {offsets = [2, 0], sizes = [8, 16], strides = [1, 1]} : vector<10x16xf32> to vector<8x16xf32>
      %447 = vector.broadcast %225 : f32 to vector<8x16xf32>
      %448 = arith.mulf %447, %446 : vector<8x16xf32>
      %449 = arith.addf %423, %448 : vector<8x16xf32>
      %450 = vector.broadcast %226 : f32 to vector<8x16xf32>
      %451 = arith.mulf %450, %446 : vector<8x16xf32>
      %452 = arith.addf %426, %451 : vector<8x16xf32>
      %453 = vector.broadcast %227 : f32 to vector<8x16xf32>
      %454 = arith.mulf %453, %446 : vector<8x16xf32>
      %455 = arith.addf %429, %454 : vector<8x16xf32>
      %456 = vector.broadcast %228 : f32 to vector<8x16xf32>
      %457 = arith.mulf %456, %446 : vector<8x16xf32>
      %458 = arith.addf %432, %457 : vector<8x16xf32>
      %c1_135 = arith.constant 1 : index
      %459 = arith.index_cast %240 : i32 to index
      %c2_136 = arith.constant 2 : index
      %460 = vector.load %arg10[%c1_135, %459, %c2_136] : memref<2x18x128xf32, #tpu.memory_space<vmem>>, vector<1x10x16xf32>
      %461 = vector.shape_cast %460 : vector<1x10x16xf32> to vector<10x16xf32>
      %462 = vector.extract_strided_slice %461 {offsets = [0, 0], sizes = [8, 16], strides = [1, 1]} : vector<10x16xf32> to vector<8x16xf32>
      %463 = vector.broadcast %181 : f32 to vector<8x16xf32>
      %464 = arith.mulf %463, %462 : vector<8x16xf32>
      %465 = arith.addf %436, %464 : vector<8x16xf32>
      %466 = vector.broadcast %182 : f32 to vector<8x16xf32>
      %467 = arith.mulf %466, %462 : vector<8x16xf32>
      %468 = arith.addf %439, %467 : vector<8x16xf32>
      %469 = vector.broadcast %183 : f32 to vector<8x16xf32>
      %470 = arith.mulf %469, %462 : vector<8x16xf32>
      %471 = arith.addf %442, %470 : vector<8x16xf32>
      %472 = vector.broadcast %184 : f32 to vector<8x16xf32>
      %473 = arith.mulf %472, %462 : vector<8x16xf32>
      %474 = arith.addf %445, %473 : vector<8x16xf32>
      %475 = vector.extract_strided_slice %461 {offsets = [1, 0], sizes = [8, 16], strides = [1, 1]} : vector<10x16xf32> to vector<8x16xf32>
      %476 = vector.broadcast %205 : f32 to vector<8x16xf32>
      %477 = arith.mulf %476, %475 : vector<8x16xf32>
      %478 = arith.addf %449, %477 : vector<8x16xf32>
      %479 = vector.broadcast %206 : f32 to vector<8x16xf32>
      %480 = arith.mulf %479, %475 : vector<8x16xf32>
      %481 = arith.addf %452, %480 : vector<8x16xf32>
      %482 = vector.broadcast %207 : f32 to vector<8x16xf32>
      %483 = arith.mulf %482, %475 : vector<8x16xf32>
      %484 = arith.addf %455, %483 : vector<8x16xf32>
      %485 = vector.broadcast %208 : f32 to vector<8x16xf32>
      %486 = arith.mulf %485, %475 : vector<8x16xf32>
      %487 = arith.addf %458, %486 : vector<8x16xf32>
      %488 = vector.extract_strided_slice %461 {offsets = [2, 0], sizes = [8, 16], strides = [1, 1]} : vector<10x16xf32> to vector<8x16xf32>
      %489 = vector.broadcast %229 : f32 to vector<8x16xf32>
      %490 = arith.mulf %489, %488 : vector<8x16xf32>
      %491 = arith.addf %465, %490 : vector<8x16xf32>
      %492 = vector.broadcast %230 : f32 to vector<8x16xf32>
      %493 = arith.mulf %492, %488 : vector<8x16xf32>
      %494 = arith.addf %468, %493 : vector<8x16xf32>
      %495 = vector.broadcast %231 : f32 to vector<8x16xf32>
      %496 = arith.mulf %495, %488 : vector<8x16xf32>
      %497 = arith.addf %471, %496 : vector<8x16xf32>
      %498 = vector.broadcast %232 : f32 to vector<8x16xf32>
      %499 = arith.mulf %498, %488 : vector<8x16xf32>
      %500 = arith.addf %474, %499 : vector<8x16xf32>
      %501 = arith.addf %478, %491 : vector<8x16xf32>
      %502 = vector.broadcast %233 : f32 to vector<8x16xf32>
      %503 = arith.addf %501, %502 : vector<8x16xf32>
      %cst_137 = arith.constant 0.000000e+00 : f32
      %504 = vector.broadcast %cst_137 : f32 to vector<8x16xf32>
      %505 = arith.maximumf %503, %504 : vector<8x16xf32>
      %cst_138 = arith.constant 1.000000e-10 : f32
      %506 = vector.broadcast %cst_138 : f32 to vector<8x16xf32>
      %507 = arith.addf %505, %506 : vector<8x16xf32>
      %c0_139 = arith.constant 0 : index
      %c0_140 = arith.constant 0 : index
      %508 = arith.index_cast %240 : i32 to index
      %c0_141 = arith.constant 0 : index
      %509 = vector.load %arg7[%c0_139, %c0_140, %508, %c0_141] : memref<1x1x16x16xf32, #tpu.memory_space<vmem>>, vector<1x1x8x16xf32>
      %510 = vector.shape_cast %509 : vector<1x1x8x16xf32> to vector<8x16xf32>
      %511 = vector.shape_cast %507 : vector<8x16xf32> to vector<1x1x8x16xf32>
      tpu.vector_store %arg7[%c0_139, %c0_140, %508, %c0_141], %511 {strides = array<i32>} : memref<1x1x16x16xf32, #tpu.memory_space<vmem>>, vector<1x1x8x16xf32>,
      %512 = arith.addf %481, %494 : vector<8x16xf32>
      %513 = vector.broadcast %234 : f32 to vector<8x16xf32>
      %514 = arith.addf %512, %513 : vector<8x16xf32>
      %c0_142 = arith.constant 0 : index
      %c0_143 = arith.constant 0 : index
      %515 = arith.index_cast %240 : i32 to index
      %c0_144 = arith.constant 0 : index
      %516 = vector.load %arg8[%c0_142, %c0_143, %515, %c0_144] : memref<1x3x16x16xf32, #tpu.memory_space<vmem>>, vector<1x1x8x16xf32>
      %517 = vector.shape_cast %516 : vector<1x1x8x16xf32> to vector<8x16xf32>
      %518 = vector.shape_cast %514 : vector<8x16xf32> to vector<1x1x8x16xf32>
      tpu.vector_store %arg8[%c0_142, %c0_143, %515, %c0_144], %518 {strides = array<i32>} : memref<1x3x16x16xf32, #tpu.memory_space<vmem>>, vector<1x1x8x16xf32>,
      %519 = arith.addf %484, %497 : vector<8x16xf32>
      %520 = vector.broadcast %235 : f32 to vector<8x16xf32>
      %521 = arith.addf %519, %520 : vector<8x16xf32>
      %c0_145 = arith.constant 0 : index
      %c1_146 = arith.constant 1 : index
      %522 = arith.index_cast %240 : i32 to index
      %c0_147 = arith.constant 0 : index
      %523 = vector.load %arg8[%c0_145, %c1_146, %522, %c0_147] : memref<1x3x16x16xf32, #tpu.memory_space<vmem>>, vector<1x1x8x16xf32>
      %524 = vector.shape_cast %523 : vector<1x1x8x16xf32> to vector<8x16xf32>
      %525 = vector.shape_cast %521 : vector<8x16xf32> to vector<1x1x8x16xf32>
      tpu.vector_store %arg8[%c0_145, %c1_146, %522, %c0_147], %525 {strides = array<i32>} : memref<1x3x16x16xf32, #tpu.memory_space<vmem>>, vector<1x1x8x16xf32>,
      %526 = arith.addf %487, %500 : vector<8x16xf32>
      %527 = vector.broadcast %236 : f32 to vector<8x16xf32>
      %528 = arith.addf %526, %527 : vector<8x16xf32>
      %c0_148 = arith.constant 0 : index
      %c2_149 = arith.constant 2 : index
      %529 = arith.index_cast %240 : i32 to index
      %c0_150 = arith.constant 0 : index
      %530 = vector.load %arg8[%c0_148, %c2_149, %529, %c0_150] : memref<1x3x16x16xf32, #tpu.memory_space<vmem>>, vector<1x1x8x16xf32>
      %531 = vector.shape_cast %530 : vector<1x1x8x16xf32> to vector<8x16xf32>
      %532 = vector.shape_cast %528 : vector<8x16xf32> to vector<1x1x8x16xf32>
      tpu.vector_store %arg8[%c0_148, %c2_149, %529, %c0_150], %532 {strides = array<i32>} : memref<1x3x16x16xf32, #tpu.memory_space<vmem>>, vector<1x1x8x16xf32>,
    }
    %c2_i32_116 = arith.constant 2 : i32
    return
  }
  func.func @transform_0(%arg0: i32) -> (i32, i32, i32, i32) {
    %c0_i32 = arith.constant 0 : i32
    %c0_i32_0 = arith.constant 0 : i32
    %c0_i32_1 = arith.constant 0 : i32
    %c0_i32_2 = arith.constant 0 : i32
    return %arg0, %c0_i32, %c0_i32_0, %c0_i32_1 : i32, i32, i32, i32
  }
  func.func @transform_1(%arg0: i32) -> i32 {
    %c0_i32 = arith.constant 0 : i32
    %c0_i32_0 = arith.constant 0 : i32
    return %c0_i32 : i32
  }
  func.func @transform_2(%arg0: i32) -> i32 {
    %c0_i32 = arith.constant 0 : i32
    %c0_i32_0 = arith.constant 0 : i32
    return %c0_i32 : i32
  }
  func.func @transform_3(%arg0: i32) -> i32 {
    %c0_i32 = arith.constant 0 : i32
    %c0_i32_0 = arith.constant 0 : i32
    return %c0_i32 : i32
  }
  func.func @transform_4(%arg0: i32) -> i32 {
    %c0_i32 = arith.constant 0 : i32
    %c0_i32_0 = arith.constant 0 : i32
    return %c0_i32 : i32
  }
  func.func @transform_5(%arg0: i32) -> (i32, i32, i32, i32) {
    %c0_i32 = arith.constant 0 : i32
    %c0_i32_0 = arith.constant 0 : i32
    %c0_i32_1 = arith.constant 0 : i32
    %c0_i32_2 = arith.constant 0 : i32
    return %arg0, %c0_i32, %c0_i32_0, %c0_i32_1 : i32, i32, i32, i32
  }
  func.func @transform_6(%arg0: i32) -> (i32, i32, i32, i32) {
    %c0_i32 = arith.constant 0 : i32
    %c0_i32_0 = arith.constant 0 : i32
    %c0_i32_1 = arith.constant 0 : i32
    %c0_i32_2 = arith.constant 0 : i32
    return %arg0, %c0_i32, %c0_i32_0, %c0_i32_1 : i32, i32, i32, i32
  }
  func.func @transform_7(%arg0: i32) -> (i32, i32, i32, i32) {
    %c0_i32 = arith.constant 0 : i32
    %c0_i32_0 = arith.constant 0 : i32
    %c0_i32_1 = arith.constant 0 : i32
    %c0_i32_2 = arith.constant 0 : i32
    return %arg0, %c0_i32, %c0_i32_0, %c0_i32_1 : i32, i32, i32, i32
  }
}

</mosaic_0001>

<bundles_post_ra>
// kernel: tpu_custom_call.1
= control target key start
LH: loop header
LB: loop body
LE: loop exit
PB: predicated region body
PF: predicated region fallthrough
CT: control target
= control target key end

     0   :  { %s6563_s0 = inlined_call_operand.hbm [shape: f32[2,8,16,16], index: 0, kind: input, shape index: {}]   ;;  %s6564_s1 = inlined_call_operand.vmem [shape: f32[144], index: 1, kind: input, shape index: {}]   ;;  %s6565_s2 = inlined_call_operand.vmem [shape: f32[2], index: 2, kind: input, shape index: {}]   ;;  %s6566_s3 = inlined_call_operand.vmem [shape: f32[72], index: 3, kind: input, shape index: {}]   ;;  %s6567_s4 = inlined_call_operand.vmem [shape: f32[4], index: 4, kind: input, shape index: {}]   ;;  %s6568_s5 = inlined_call_operand.hbm [shape: f32[2,2,16,16], index: 5, kind: output, shape index: {0}]   ;;  %s6569_s6 = inlined_call_operand.hbm [shape: f32[2,1,16,16], index: 6, kind: output, shape index: {1}]   ;;  %s6570_s7 = inlined_call_operand.hbm [shape: f32[2,3,16,16], index: 7, kind: output, shape index: {2}]  }
   0x1   :  { %6610 = sst [smem:[#allocation250_spill]] %s6563_s0 }
   0x2   :  { %6611 = sst [smem:[#allocation251_spill]] %s6564_s1 }
   0x3   :  { %6612 = sst [smem:[#allocation252_spill]] %s6565_s2 }
   0x4   :  { %6613 = sst [smem:[#allocation253_spill]] %s6566_s3 }
   0x5   :  { %6614 = sst [smem:[#allocation254_spill]] %s6567_s4 }
   0x6   :  { %6615 = sst [smem:[#allocation255_spill]] %s6568_s5 }
   0x7   :  { %6616 = sst [smem:[#allocation256_spill]] %s6569_s6 }
   0x8   :  { %6617 = sst [smem:[#allocation257_spill]] %s6570_s7 }
   0x9   :  { %13 = vsyncpa [#allocation5], 0 }
   0xa   :  { %15 = vsyncpa [#allocation5 + $0x1], 0 }
   0xb   :  { %16 = vsyncpa [#allocation7], 0 }
   0xc   :  { %17 = vsyncpa [#allocation10], 0 }
   0xd   :  { %18 = vsyncpa [#allocation13], 0 }
   0xe   :  { %19 = vsyncpa [#allocation6], 0 }
   0xf   :  { %21 = vsyncpa [#allocation6 + $0x1], 0 }
  0x10   :  { %22 = vsyncpa [#allocation16], 0 }
  0x11   :  { %24 = vsyncpa [#allocation16 + $0x1], 0  ;;  %s4160_s24 = smov 0   ;;  %s4162_s25 = smov 0  }
  0x12   :  { %s4164_s26 = smov 0   ;;  %s4166_s27 = smov 0  }
  0x13 LB: > { %6618 = sst [smem:[#allocation24_spill]] %s4079_s24  ;;  %s4181_s28 = sadd.s32 4294967295, %s4091_s27   ;;  %s4091_s27 = sphi %s4166_s27, %s7118_s27   ;;  %s4087_s26 = sphi %s4164_s26, %s7121_s26   ;;  %s4083_s25 = sphi %s4162_s25, %s7120_s25   ;;  %s4079_s24 = sphi %s4160_s24, %s7119_s24  }
  0x14   : > { %6619 = sst [smem:[#allocation25_spill]] %s4083_s25  ;;  %s6574_s29 = sadd.s32 4294967294, %s4091_s27  }
  0x15   : > { %6620 = sst [smem:[#allocation26_spill]] %s4087_s26  ;;  %p50_p0 = scmp.ne.s32.totalorder %s4083_s25, %s4079_s24 }
  0x16   : > { %6621 = sst [smem:[#allocation27_spill]] %s4091_s27  ;;  %p6571_p1 = scmp.eq.s32.totalorder %s4181_s28, 0 }
  0x17   : > { %6622 = sst [smem:[#allocation28_spill]] %s4181_s28  ;;  %p164_p3 = scmp.eq.s32.totalorder %s6574_s29, 1 }
  0x18   : > { %p4192_p4 = por %p6571_p1, %p50_p0  ;;  %p3430_p5 = scmp.ge.s32.totalorder %s4091_s27, 1 }
  0x19   : > { %p4197_p6 = por %p164_p3, %p50_p0  ;;  %p223_p7 = scmp.lt.s32.totalorder %s4091_s27, 3 }
  0x1a   : > { %s6623_s30 = scalar_select %p4192_p4, 1, 0 }
  0x1b   : > { %s6624_s8 = scalar_select %p4197_p6, 1, 0 }
  0x1c   : > { %s6626_s2 = sld [smem:[#allocation252_spill]]  ;;  %p4205_p8 = pnand %p3430_p5, %p223_p7 }
  0x1d   : > { %6625 = sst [smem:[#allocation29_spill]] %s6624_s8  ;;  %s6628_s1 = sld [smem:[#allocation251_spill]] }
  0x1e   : > { %s6627_s12 = scalar_select %p4205_p8, 1, 0 }
  0x1f   : > { %p3739_p10 = pneg %p4205_p8  ;;  %s6630_s3 = sld [smem:[#allocation253_spill]] }
  0x20   : > { %s6631_s4 = sld [smem:[#allocation254_spill]] }
  0x21   : > { %p4217_p11 = pnand %p3739_p10, %p6571_p1 }
  0x22   : > { %s247_s11 = sshll.u32 %s6626_s2, 4  ;;  %s248_s11 = int_to_ptr.vmem [resolvable:$true] %s247_s11 }
  0x23   : > { %s236_s15 = sshll.u32 %s6628_s1, 4  ;;  %s3855_s23 = scalar_lea.vmem %s248_s11, 16  ;;  %s237_s15 = int_to_ptr.vmem [resolvable:$true] %s236_s15 }
  0x24   : > { %p3856_p12 = scmp.ne.s32.totalorder %s248_s11, %s3855_s23  ;;  %p3857_p13 = pneg %p4217_p11 }
  0x25   : > { %s258_s19 = sshll.u32 %s6630_s3, 4  ;;  %p3863_p5 = scmp.lt.s32.totalorder %s248_s11, %s248_s11  ;;  %s4224_s19 = int_to_ptr.vmem [resolvable:$true] %s258_s19 }
  0x26   : > { %s269_s22 = sshll.u32 %s6631_s4, 4  ;;  %p3858_p0 = pnand %p3857_p13, %p3856_p12  ;;  %s270_s22 = int_to_ptr.vmem [resolvable:$true] %s269_s22 }
  0x27   : > { %p3864_p7 = scmp.lt.s32.totalorder %s3855_s23, %s3855_s23 }
  0x28   : > { %p3859_p3 = pneg %p3858_p0 }
  0x29   : > { %p3865_p10 = por %p3864_p7, %p3863_p5 }
  0x2b   : > { %p3866_p9 = pnand %p3865_p10, %p3859_p3 }
  0x2d   : > { %3869 = shalt.err (!%p3866_p9)
}
  0x2e   : > { %s4101_s9 = smov [#allocation9]   ;;  %s3870_s10 = scalar_lea.vmem %s237_s15, 32 }
  0x2f   : > { %3745 = dma.vmem_to_smem (!%p4217_p11), %s248_s11, 16, %s4101_s9, [#allocation10]  }
  0x30   : > { %p3871_p1 = scmp.ne.s32.totalorder %s237_s15, %s3870_s10  ;;  %p3878_p4 = scmp.lt.s32.totalorder %s237_s15, %s237_s15 }
  0x31   : > { %p3879_p8 = scmp.lt.s32.totalorder %s3870_s10, %s3870_s10 }
  0x32   : > { %p3873_p2 = pnand %p3871_p1, %p3857_p13 }
  0x33   : > { %p3880_p12 = por %p3879_p8, %p3878_p4 }
  0x34   : > { %p3874_p6 = pneg %p3873_p2 }
  0x36   : > { %p3881_p0 = pnand %p3880_p12, %p3874_p6 }
  0x38   : > { %3884 = shalt.err (!%p3881_p0)
}
  0x39   : > { %s4102_s13 = smov [#allocation8]   ;;  %s3885_s11 = scalar_lea.vmem %s4224_s19, 16 }
  0x3a   : > { %3742 = dma.vmem_to_smem (!%p4217_p11), %s237_s15, 32, %s4102_s13, [#allocation7]  }
  0x3b   : > { %p3886_p9 = scmp.ne.s32.totalorder %s4224_s19, %s3885_s11  ;;  %p3893_p2 = scmp.lt.s32.totalorder %s4224_s19, %s4224_s19 }
  0x3c   : > { %p3894_p5 = scmp.lt.s32.totalorder %s3885_s11, %s3885_s11 }
  0x3d   : > { %p3888_p3 = pnand %p3886_p9, %p3857_p13 }
  0x3e   : > { %p3895_p4 = por %p3894_p5, %p3893_p2 }
  0x3f   : > { %p3889_p1 = pneg %p3888_p3 }
  0x41   : > { %p3896_p6 = pnand %p3895_p4, %p3889_p1 }
  0x43   : > { %3899 = shalt.err (!%p3896_p6)
}
  0x44   : > { %s4103_s14 = smov [#allocation11]   ;;  %s3900_s18 = scalar_lea.vmem %s270_s22, 16 }
  0x45   : > { %3748 = dma.vmem_to_smem (!%p4217_p11), %s4224_s19, 16, %s4103_s14, [#allocation10]  }
  0x46   : > { %p3901_p8 = scmp.ne.s32.totalorder %s270_s22, %s3900_s18  ;;  %p3908_p12 = scmp.lt.s32.totalorder %s270_s22, %s270_s22 }
  0x47   : > { %p3909_p0 = scmp.lt.s32.totalorder %s3900_s18, %s3900_s18 }
  0x48   : > { %p3903_p7 = pnand %p3901_p8, %p3857_p13 }
  0x49   : > { %p3910_p9 = por %p3909_p0, %p3908_p12 }
  0x4a   : > { %p3904_p10 = pneg %p3903_p7 }
  0x4c   : > { %p3911_p3 = pnand %p3910_p9, %p3904_p10 }
  0x4e   : > { %3914 = shalt.err (!%p3911_p3)
}
  0x4f   : > { %s4104_s20 = smov [#allocation12]   ;;  %s4261_s19 = sadd.s32 1, %s4091_s27  }
  0x50   : > { %3751 = dma.vmem_to_smem (!%p4217_p11), %s270_s22, 16, %s4104_s20, [#allocation13]  }
  0x51   : > { %6632 = sst [smem:[#allocation30_spill]] %s4261_s19  ;;  %s34_s21 = ssub.s32 %s4091_s27, %s4261_s19 }
  0x52   : > { %p35_p13 = scmp.eq.s32.totalorder %s34_s21, 0  ;;  %s37_s23 = sadd.s32 1, %s4087_s26 }
  0x53   : > { %p44_p1 = scmp.ne.s32.totalorder %s4087_s26, %s4083_s25  ;;  %p45_p2 = scmp.eq.s32.totalorder %s4091_s27, 0 }
  0x54   : > { %s4270_s16 = scalar_select %p35_p13, %s4087_s26, %s37_s23  }
  0x55   : > { %p46_p5 = por %p45_p2, %p44_p1  ;;  %p6634_p4 = scmp.eq.s32.totalorder %s4181_s28, 1 }
  0x56   : > { %6633 = sst [smem:[#allocation31_spill]] %s4270_s16  ;;  %p3770_p8 = scmp.lt.s32.totalorder %s4091_s27, 2 }
  0x57   : > { %p4274_p6 = por %p6634_p4, %p44_p1  ;;  %s280_s10 = sand.u32 1, %s4087_s26  }
  0x58   : > { %s3436_s13 = sshll.u32 %s280_s10, 7  ;;  %s3710_s22 = sshll.u32 %s4091_s27, 11 }
  0x59   : > { %s6635_s9 = scalar_select %p4274_p6, 1, 0 }
  0x5a   : > { %s6637_s0 = sld [smem:[#allocation250_spill]]  ;;  %s284_s15 = scalar_lea.vmem [#allocation4], %s3436_s13 }
  0x5b   : > { %6636 = sst [smem:[#allocation32_spill]] %s6635_s9  ;;  %s291_s18 = sshll.u32 %s284_s15, 4  ;;  %s4286_s18 = int_to_ptr.vmem [resolvable:$true] %s291_s18 }
  0x5c   : > { %p4288_p11 = pnand %p3770_p8, %p46_p5  ;;  %s4292_s21 = scalar_lea.sflag [#allocation5], %s280_s10 }
  0x5e   : > { %p3917_p10 = pneg %p4288_p11 }
  0x60   : > { %s4284_s17 = scalar_lea.hbm %s6637_s0, %s3710_s22  ;;  %s3920_s11 = scalar_lea.hbm %s6637_s0, 4096 }
  0x61   : > { %s3915_s23 = scalar_lea.hbm %s4284_s17, 2048  ;;  %p3921_p9 = scmp.lt.u32.totalorder %s4284_s17, %s6637_s0 }
  0x62   : > { %p3916_p7 = scmp.ne.s32.totalorder %s4284_s17, %s3915_s23  ;;  %p3922_p3 = scmp.lt.u32.totalorder %s3920_s11, %s3915_s23 }
  0x63   : > { %p3924_p1 = scmp.lt.u32.totalorder %s3915_s23, %s4284_s17 }
  0x64   : > { %p3918_p12 = pnand %p3917_p10, %p3916_p7  ;;  %p3923_p13 = por %p3922_p3, %p3921_p9 }
  0x66   : > { %p3919_p0 = pneg %p3918_p12  ;;  %p3925_p2 = por %p3924_p1, %p3923_p13 }
  0x68   : > { %p3926_p5 = pnand %p3925_p2, %p3919_p0 }
  0x6a   : > { %3929 = shalt.err (!%p3926_p5)
}
  0x6b   : > { %s3930_s10 = scalar_lea.vmem %s4286_s18, 2048  ;;  %s4105_s13 = smov [#allocation4]  }
  0x6c   : > { %p3931_p4 = scmp.ne.s32.totalorder %s4286_s18, %s3930_s10  ;;  %s3935_s22 = sshll.u32 %s4105_s13, 4  ;;  %s3936_s22 = int_to_ptr.vmem [resolvable:$false] %s3935_s22 }
  0x6d   : > { %s3937_s14 = scalar_lea.vmem %s3936_s22, 4096  ;;  %p3938_p12 = scmp.lt.s32.totalorder %s4286_s18, %s3936_s22 }
  0x6e   : > { %p3933_p8 = pnand %p3931_p4, %p3917_p10  ;;  %p3939_p9 = scmp.lt.s32.totalorder %s3937_s14, %s3930_s10 }
  0x70   : > { %p3934_p7 = pneg %p3933_p8  ;;  %p3940_p3 = por %p3939_p9, %p3938_p12 }
  0x72   : > { %p3941_p13 = pnand %p3940_p3, %p3934_p7 }
  0x74   : > { %3944 = shalt.err (!%p3941_p13)
}
  0x75   : > { %s4106_s23 = smov 128   ;;  %s4107_s11 = smov 8  }
  0x76   : > { %3755 = dma.hbm_to_vmem [thread:$0]  (!%p4288_p11), %s4284_s17, 2048, %s4286_s18, %s4292_s21, %s4106_s23, %s4106_s23, %s4107_s11  }
  0x77   : > { %p6639_p10 = scmp.ne.s32.totalorder %s6627_s12, 0 }
  0x79   : > { %303 = sbr.rel (%p6639_p10) target bundleno = 1191 (0x4a7), region = 40 }
  0x80   : > { %s4323_s15 = sand.u32 1, %s4083_s25   ;;  %p6640_p0 = scmp.ne.s32.totalorder %s6623_s30, 0 }
  0x81   : > { %s3440_s10 = sshll.u32 %s4323_s15, 7  ;;  %s306_s13 = scalar_lea.sflag [#allocation5], %s4323_s15 }
  0x82   : > { %s4327_s22 = scalar_lea.vmem [#allocation4], %s3440_s10 }
  0x83   : > { %4054 = dma.done.wait (%p6640_p0), %s306_s13, 2048  }
  0x84   : > { %4056 = vsyncadd (%p6640_p0), %s306_s13, 4294965248  ;;  %p6641_p11 = scmp.eq.s32.totalorder %s4181_s28, 0 }
  0x86   : > { %4058 = dma.done.wait (%p6641_p11), [#allocation7], 32   ;;  %p6642_p1 = pmov %p6641_p11 }
  0x88   : > { %4060 = vsyncadd (%p6642_p1), [#allocation7], 4294967264  ;;  %p6643_p2 = pmov %p6642_p1 }
  0x89   : > { %p6644_p5 = pmov %p6642_p1 }
  0x8a   : > { %4062 = dma.done.wait (%p6643_p2), [#allocation10], 32  }
  0x8b   : > { %4064 = vsyncadd (%p6644_p5), [#allocation10], 4294967264  ;;  %p6645_p4 = pmov %p6642_p1 }
  0x8c   : > { %p6646_p8 = pmov %p6642_p1 }
  0x8d   : > { %4066 = dma.done.wait (%p6645_p4), [#allocation13], 16  }
  0x8e   : > { %4068 = vsyncadd (%p6646_p8), [#allocation13], 4294967280 }
  0x8f   : > { %330 = sfence }
  0x90   : > { %v453_v0 = vld [vmem:[%s4327_s22 + $0x10] sm:$0xff]  ;;  %v451_v1 = vld [vmem:[%s4327_s22] sm:$0xff]  ;;  %s4108_s30 = smov 1   ;;  %v4109_v2 = vmov 0.0   ;;  %vm383_vm0 = vcmask 7168   ;;  %vm409_vm1 = vcmask 146568  }
  0x91   : > { %487 = vrot.lane.b32.xlu1 %v453_v0, %s4108_s30  ;;  %483 = vrot.lane.b32.xlu0 %v451_v1, %s4108_s30  ;;  %368 = vst [vmem:[#allocation2 + $0x18] sm:$0x1] %v4109_v2  ;;  %435 = vst [vmem:[#allocation3] sm:$0x1] %v4109_v2  ;;  %vm386_vm2 = vcmask 1024   ;;  %vm412_vm3 = vcmask 140424  }
  0x92   : > { %436 = vst [vmem:[#allocation3 + $0x18] sm:$0x1] %v4109_v2  ;;  %367 = vst [vmem:[#allocation2] sm:$0x1] %v4109_v2  ;;  %v454_v3 = vld [vmem:[%s4327_s22 + $0x18] sm:$0xff]  ;;  %v452_v4 = vld [vmem:[%s4327_s22 + $0x8] sm:$0xff] }
  0x93   : > { %369 = vst [vmem:[#allocation2 + $0x30] sm:$0x1] %v4109_v2  ;;  %370 = vst [vmem:[#allocation2 + $0x48] sm:$0x1] %v4109_v2  ;;  %v456_v5 = vld [vmem:[%s4327_s22 + $0x28] sm:$0xff]  ;;  %v455_v6 = vld [vmem:[%s4327_s22 + $0x20] sm:$0xff] }
  0x94   : > { %371 = vst [vmem:[#allocation2 + $0x60] sm:$0x1] %v4109_v2  ;;  %372 = vst [vmem:[#allocation2 + $0x78] sm:$0x1] %v4109_v2  ;;  %v458_v7 = vld [vmem:[%s4327_s22 + $0x38] sm:$0xff]  ;;  %v457_v8 = vld [vmem:[%s4327_s22 + $0x30] sm:$0xff] }
  0x95   : > { %373 = vst [vmem:[#allocation2 + $0x90] sm:$0x1] %v4109_v2  ;;  %374 = vst [vmem:[#allocation2 + $0xa8] sm:$0x1] %v4109_v2  ;;  %489 = vrot.lane.b32.xlu1 %v454_v3, %s4108_s30  ;;  %485 = vrot.lane.b32.xlu0 %v452_v4, %s4108_s30  ;;  %v460_v9 = vld [vmem:[%s4327_s22 + $0x48] sm:$0xff]  ;;  %v459_v10 = vld [vmem:[%s4327_s22 + $0x40] sm:$0xff] }
  0x96   : > { %375 = vst [vmem:[#allocation2 + $0x11] sm:$0x1] %v4109_v2  ;;  %376 = vst [vmem:[#allocation2 + $0x29] sm:$0x1] %v4109_v2  ;;  %s4508_s20 = sld [smem:[#allocation8]]  ;;  %v462_v11 = vld [vmem:[%s4327_s22 + $0x58] sm:$0xff] }
  0x97   : > { %377 = vst [vmem:[#allocation2 + $0x41] sm:$0x1] %v4109_v2  ;;  %378 = vst [vmem:[#allocation2 + $0x59] sm:$0x1] %v4109_v2  ;;  %v461_v12 = vld [vmem:[%s4327_s22 + $0x50] sm:$0xff]  ;;  %s4512_s21 = sld [smem:[#allocation8 + $0x1]] }
  0x98   : > { %379 = vst [vmem:[#allocation2 + $0x71] sm:$0x1] %v4109_v2  ;;  %380 = vst [vmem:[#allocation2 + $0x89] sm:$0x1] %v4109_v2  ;;  %s4514_s14 = sld [smem:[#allocation8 + $0x2]]  ;;  %s4516_s23 = sld [smem:[#allocation8 + $0x3]] }
  0x99   : > { %381 = vst [vmem:[#allocation2 + $0xa1] sm:$0x1] %v4109_v2  ;;  %382 = vst [vmem:[#allocation2 + $0xb9] sm:$0x1] %v4109_v2  ;;  %493 = vrot.lane.b32.xlu1 %v456_v5, %s4108_s30  ;;  %491 = vrot.lane.b32.xlu0 %v455_v6, %s4108_s30  ;;  %s4518_s11 = sld [smem:[#allocation8 + $0x4]]  ;;  %s4520_s10 = sld [smem:[#allocation8 + $0x5]] }
  0x9a   : > { %437 = vst [vmem:[#allocation3 + $0x11] sm:$0x1] %v4109_v2  ;;  %438 = vst [vmem:[#allocation3 + $0x29] sm:$0x1] %v4109_v2  ;;  %s4522_s13 = sld [smem:[#allocation8 + $0x6]]  ;;  %s4526_s29 = sld [smem:[#allocation8 + $0x7]] }
  0x9b   : > { %388 = vst.msk [vmem:[#allocation2 + $0x18] sm:$0xff] %vm383_vm0, %v4109_v2  ;;  %389 = vst.msk [vmem:[#allocation2 + $0x20] sm:$0xff] %vm383_vm0, %v4109_v2  ;;  %s4528_s12 = sld [smem:[#allocation8 + $0x8]]  ;;  %v464_v13 = vld [vmem:[%s4327_s22 + $0x68] sm:$0xff]  ;;  %v463_v14 = vld [vmem:[%s4327_s22 + $0x60] sm:$0xff]  ;;  %s4532_s18 = sld [smem:[#allocation8 + $0x9]] }
  0x9c   : > { %439 = vst.msk [vmem:[#allocation3] sm:$0xff] %vm383_vm0, %v4109_v2  ;;  %440 = vst.msk [vmem:[#allocation3 + $0x8] sm:$0xff] %vm383_vm0, %v4109_v2  ;;  %6647 = sst [smem:[#allocation33_spill]] %s4508_s20  ;;  %s4534_s17 = sld [smem:[#allocation8 + $0xa]]  ;;  %v466_v15 = vld [vmem:[%s4327_s22 + $0x78] sm:$0xff]  ;;  %v465_v16 = vld [vmem:[%s4327_s22 + $0x70] sm:$0xff] }
  0x9d   : > { %442 = vst.msk [vmem:[#allocation3 + $0x18] sm:$0xff] %vm383_vm0, %v4109_v2  ;;  %443 = vst.msk [vmem:[#allocation3 + $0x20] sm:$0xff] %vm383_vm0, %v4109_v2  ;;  %497 = vrot.lane.b32.xlu1 %v458_v7, %s4108_s30  ;;  %495 = vrot.lane.b32.xlu0 %v457_v8, %s4108_s30  ;;  %6648 = sst [smem:[#allocation34_spill]] %s4512_s21  ;;  %s4536_s0 = sld [smem:[#allocation8 + $0xb]]  ;;  %vm531_vm4 = vcmask 138248  }
  0x9e   : > { %385 = vst.msk [vmem:[#allocation2 + $0x8] sm:$0xff] %vm383_vm0, %v4109_v2  ;;  %392 = vst.msk [vmem:[#allocation2 + $0x38] sm:$0xff] %vm383_vm0, %v4109_v2  ;;  %6649 = sst [smem:[#allocation35_spill]] %s4514_s14  ;;  %s4538_s1 = sld [smem:[#allocation8 + $0xc]] }
  0x9f   : > { %395 = vst.msk [vmem:[#allocation2 + $0x50] sm:$0xff] %vm383_vm0, %v4109_v2  ;;  %398 = vst.msk [vmem:[#allocation2 + $0x68] sm:$0xff] %vm383_vm0, %v4109_v2  ;;  %6650 = sst [smem:[#allocation36_spill]] %s4516_s23  ;;  %s4540_s2 = sld [smem:[#allocation8 + $0xd]] }
  0xa0   : > { %401 = vst.msk [vmem:[#allocation2 + $0x80] sm:$0xff] %vm383_vm0, %v4109_v2  ;;  %404 = vst.msk [vmem:[#allocation2 + $0x98] sm:$0xff] %vm383_vm0, %v4109_v2  ;;  %6651 = sst [smem:[#allocation37_spill]] %s4518_s11  ;;  %s4542_s3 = sld [smem:[#allocation8 + $0xe]] }
  0xa1   : > { %407 = vst.msk [vmem:[#allocation2 + $0xb0] sm:$0xff] %vm383_vm0, %v4109_v2  ;;  %384 = vst.msk [vmem:[#allocation2] sm:$0xff] %vm383_vm0, %v4109_v2  ;;  %501 = vrot.lane.b32.xlu1 %v460_v9, %s4108_s30  ;;  %499 = vrot.lane.b32.xlu0 %v459_v10, %s4108_s30  ;;  %6652 = sst [smem:[#allocation38_spill]] %s4520_s10  ;;  %s4546_s4 = sld [smem:[#allocation8 + $0xf]] }
  0xa2   : > { %391 = vst.msk [vmem:[#allocation2 + $0x30] sm:$0xff] %vm383_vm0, %v4109_v2  ;;  %394 = vst.msk [vmem:[#allocation2 + $0x48] sm:$0xff] %vm383_vm0, %v4109_v2  ;;  %6653 = sst [smem:[#allocation39_spill]] %s4522_s13  ;;  %s4548_s16 = sld [smem:[#allocation8 + $0x10]] }
  0xa3   : > { %397 = vst.msk [vmem:[#allocation2 + $0x60] sm:$0xff] %vm383_vm0, %v4109_v2  ;;  %400 = vst.msk [vmem:[#allocation2 + $0x78] sm:$0xff] %vm383_vm0, %v4109_v2  ;;  %6654 = sst [smem:[#allocation40_spill]] %s4526_s29  ;;  %s4552_s26 = sld [smem:[#allocation8 + $0x11]] }
  0xa4   : > { %403 = vst.msk [vmem:[#allocation2 + $0x90] sm:$0xff] %vm383_vm0, %v4109_v2  ;;  %406 = vst.msk [vmem:[#allocation2 + $0xa8] sm:$0xff] %vm383_vm0, %v4109_v2  ;;  %6655 = sst [smem:[#allocation41_spill]] %s4528_s12  ;;  %s4554_s25 = sld [smem:[#allocation8 + $0x12]] }
  0xa5   : > { %390 = vst.msk [vmem:[#allocation2 + $0x28] sm:$0x3] %vm386_vm2, %v4109_v2  ;;  %441 = vst.msk [vmem:[#allocation3 + $0x10] sm:$0x3] %vm386_vm2, %v4109_v2  ;;  %505 = vrot.lane.b32.xlu1 %v462_v11, %s4108_s30  ;;  %503 = vrot.lane.b32.xlu0 %v461_v12, %s4108_s30  ;;  %6656 = sst [smem:[#allocation42_spill]] %s4532_s18  ;;  %s4556_s19 = sld [smem:[#allocation8 + $0x13]] }
  0xa6   : > { %444 = vst.msk [vmem:[#allocation3 + $0x28] sm:$0x3] %vm386_vm2, %v4109_v2  ;;  %387 = vst.msk [vmem:[#allocation2 + $0x10] sm:$0x3] %vm386_vm2, %v4109_v2  ;;  %6657 = sst [smem:[#allocation43_spill]] %s4534_s17  ;;  %s4558_s27 = sld [smem:[#allocation8 + $0x14]] }
  0xa7   : > { %393 = vst.msk [vmem:[#allocation2 + $0x40] sm:$0x3] %vm386_vm2, %v4109_v2  ;;  %396 = vst.msk [vmem:[#allocation2 + $0x58] sm:$0x3] %vm386_vm2, %v4109_v2  ;;  %6658 = sst [smem:[#allocation44_spill]] %s4536_s0  ;;  %s4560_s8 = sld [smem:[#allocation8 + $0x15]] }
  0xa8   : > { %399 = vst.msk [vmem:[#allocation2 + $0x70] sm:$0x3] %vm386_vm2, %v4109_v2  ;;  %402 = vst.msk [vmem:[#allocation2 + $0x88] sm:$0x3] %vm386_vm2, %v4109_v2  ;;  %6659 = sst [smem:[#allocation45_spill]] %s4538_s1  ;;  %s4562_s24 = sld [smem:[#allocation8 + $0x16]] }
  0xa9   : > { %405 = vst.msk [vmem:[#allocation2 + $0xa0] sm:$0x3] %vm386_vm2, %v4109_v2  ;;  %408 = vst.msk [vmem:[#allocation2 + $0xb8] sm:$0x3] %vm386_vm2, %v4109_v2  ;;  %6660 = sst [smem:[#allocation46_spill]] %s4540_s2  ;;  %509 = vrot.lane.b32.xlu1 %v464_v13, %s4108_s30  ;;  %507 = vrot.lane.b32.xlu0 %v463_v14, %s4108_s30  ;;  %s4566_s7 = sld [smem:[#allocation8 + $0x17]] }
  0xaa   : > { %414 = vst.msk [vmem:[#allocation2 + $0x18] sm:$0xff] %vm409_vm1, %v4109_v2  ;;  %415 = vst.msk [vmem:[#allocation2 + $0x20] sm:$0xff] %vm409_vm1, %v4109_v2  ;;  %6661 = sst [smem:[#allocation47_spill]] %s4542_s3  ;;  %s4568_s5 = sld [smem:[#allocation8 + $0x18]] }
  0xab   : > { %445 = vst.msk [vmem:[#allocation3] sm:$0xff] %vm409_vm1, %v4109_v2  ;;  %446 = vst.msk [vmem:[#allocation3 + $0x8] sm:$0xff] %vm409_vm1, %v4109_v2  ;;  %6662 = sst [smem:[#allocation48_spill]] %s4546_s4  ;;  %s4570_s22 = sld [smem:[#allocation8 + $0x19]] }
  0xac   : > { %448 = vst.msk [vmem:[#allocation3 + $0x18] sm:$0xff] %vm409_vm1, %v4109_v2  ;;  %449 = vst.msk [vmem:[#allocation3 + $0x20] sm:$0xff] %vm409_vm1, %v4109_v2  ;;  %6663 = sst [smem:[#allocation49_spill]] %s4548_s16  ;;  %s4572_s6 = sld [smem:[#allocation8 + $0x1a]] }
  0xad   : > { %410 = vst.msk [vmem:[#allocation2] sm:$0xff] %vm409_vm1, %v4109_v2  ;;  %411 = vst.msk [vmem:[#allocation2 + $0x8] sm:$0xff] %vm409_vm1, %v4109_v2  ;;  %6664 = sst [smem:[#allocation50_spill]] %s4560_s8  ;;  %513 = vrot.lane.b32.xlu1 %v466_v15, %s4108_s30  ;;  %511 = vrot.lane.b32.xlu0 %v465_v16, %s4108_s30  ;;  %s4574_s9 = sld [smem:[#allocation8 + $0x1b]] }
  0xae   : > { %418 = vst.msk [vmem:[#allocation2 + $0x38] sm:$0xff] %vm409_vm1, %v4109_v2  ;;  %421 = vst.msk [vmem:[#allocation2 + $0x50] sm:$0xff] %vm409_vm1, %v4109_v2  ;;  %6665 = sst [smem:[#allocation51_spill]] %s4562_s24  ;;  %s4576_s28 = sld [smem:[#allocation8 + $0x1c]] }
  0xaf   : > { %424 = vst.msk [vmem:[#allocation2 + $0x68] sm:$0xff] %vm409_vm1, %v4109_v2  ;;  %427 = vst.msk [vmem:[#allocation2 + $0x80] sm:$0xff] %vm409_vm1, %v4109_v2  ;;  %6666 = sst [smem:[#allocation52_spill]] %s4566_s7  ;;  %s4578_s4 = sld [smem:[#allocation8 + $0x1d]] }
  0xb0   : > { %430 = vst.msk [vmem:[#allocation2 + $0x98] sm:$0xff] %vm409_vm1, %v4109_v2  ;;  %433 = vst.msk [vmem:[#allocation2 + $0xb0] sm:$0xff] %vm409_vm1, %v4109_v2  ;;  %6667 = sst [smem:[#allocation53_spill]] %s4568_s5  ;;  %s4580_s0 = sld [smem:[#allocation8 + $0x1e]] }
  0xb1   : > { %416 = vst.msk [vmem:[#allocation2 + $0x28] sm:$0x3] %vm412_vm3, %v4109_v2  ;;  %447 = vst.msk [vmem:[#allocation3 + $0x10] sm:$0x3] %vm412_vm3, %v4109_v2  ;;  %6668 = sst [smem:[#allocation54_spill]] %s4570_s22  ;;  %s4582_s29 = sld [smem:[#allocation8 + $0x1f]] }
  0xb2   : > { %450 = vst.msk [vmem:[#allocation3 + $0x28] sm:$0x3] %vm412_vm3, %v4109_v2  ;;  %413 = vst.msk [vmem:[#allocation2 + $0x10] sm:$0x3] %vm412_vm3, %v4109_v2  ;;  %6669 = sst [smem:[#allocation55_spill]] %s4572_s6  ;;  %s4584_s2 = sld [smem:[#allocation8 + $0x20]] }
  0xb3   : > { %417 = vst.msk [vmem:[#allocation2 + $0x30] sm:$0xff] %vm409_vm1, %v4109_v2  ;;  %420 = vst.msk [vmem:[#allocation2 + $0x48] sm:$0xff] %vm409_vm1, %v4109_v2  ;;  %6670 = sst [smem:[#allocation56_spill]] %s4574_s9  ;;  %s4586_s30 = sld [smem:[#allocation8 + $0x21]] }
  0xb4   : > { %423 = vst.msk [vmem:[#allocation2 + $0x60] sm:$0xff] %vm409_vm1, %v4109_v2  ;;  %426 = vst.msk [vmem:[#allocation2 + $0x78] sm:$0xff] %vm409_vm1, %v4109_v2  ;;  %6671 = sst [smem:[#allocation57_spill]] %s4576_s28  ;;  %s4588_s23 = sld [smem:[#allocation8 + $0x22]] }
  0xb5   : > { %429 = vst.msk [vmem:[#allocation2 + $0x90] sm:$0xff] %vm409_vm1, %v4109_v2  ;;  %432 = vst.msk [vmem:[#allocation2 + $0xa8] sm:$0xff] %vm409_vm1, %v4109_v2  ;;  %6672 = sst [smem:[#allocation58_spill]] %s4578_s4  ;;  %s4590_s21 = sld [smem:[#allocation8 + $0x23]] }
  0xb6   : > { %419 = vst.msk [vmem:[#allocation2 + $0x40] sm:$0x3] %vm412_vm3, %v4109_v2  ;;  %422 = vst.msk [vmem:[#allocation2 + $0x58] sm:$0x3] %vm412_vm3, %v4109_v2  ;;  %6673 = sst [smem:[#allocation59_spill]] %s4580_s0  ;;  %s4592_s18 = sld [smem:[#allocation8 + $0x24]] }
  0xb7   : > { %425 = vst.msk [vmem:[#allocation2 + $0x70] sm:$0x3] %vm412_vm3, %v4109_v2  ;;  %428 = vst.msk [vmem:[#allocation2 + $0x88] sm:$0x3] %vm412_vm3, %v4109_v2  ;;  %6674 = sst [smem:[#allocation60_spill]] %s4582_s29  ;;  %s4594_s10 = sld [smem:[#allocation8 + $0x25]] }
  0xb8   : > { %431 = vst.msk [vmem:[#allocation2 + $0xa0] sm:$0x3] %vm412_vm3, %v4109_v2  ;;  %434 = vst.msk [vmem:[#allocation2 + $0xb8] sm:$0x3] %vm412_vm3, %v4109_v2  ;;  %6675 = sst [smem:[#allocation61_spill]] %s4584_s2  ;;  %s4596_s1 = sld [smem:[#allocation8 + $0x26]] }
  0xb9   : > { %6676 = sst [smem:[#allocation62_spill]] %s4586_s30  ;;  %s4598_s12 = sld [smem:[#allocation8 + $0x27]] }
  0xba   : > { %6677 = sst [smem:[#allocation63_spill]] %s4588_s23  ;;  %s4600_s20 = sld [smem:[#allocation8 + $0x28]] }
  0xbb   : > { %6678 = sst [smem:[#allocation64_spill]] %s4590_s21  ;;  %s4602_s11 = sld [smem:[#allocation8 + $0x29]] }
  0xbc   : > { %6679 = sst [smem:[#allocation65_spill]] %s4592_s18  ;;  %s4604_s3 = sld [smem:[#allocation8 + $0x2a]] }
  0xbd   : > { %6680 = sst [smem:[#allocation66_spill]] %s4594_s10  ;;  %s4606_s2 = sld [smem:[#allocation8 + $0x2b]] }
  0xbe   : > { %6681 = sst [smem:[#allocation67_spill]] %s4596_s1  ;;  %s4608_s30 = sld [smem:[#allocation8 + $0x2c]] }
  0xbf   : > { %6682 = sst [smem:[#allocation68_spill]] %s4598_s12  ;;  %s4610_s23 = sld [smem:[#allocation8 + $0x2d]] }
  0xc0   : > { %6683 = sst [smem:[#allocation69_spill]] %s4600_s20  ;;  %s4612_s21 = sld [smem:[#allocation8 + $0x2e]] }
  0xc1   : > { %6684 = sst [smem:[#allocation70_spill]] %s4602_s11  ;;  %s4614_s18 = sld [smem:[#allocation8 + $0x2f]] }
  0xc2   : > { %6685 = sst [smem:[#allocation71_spill]] %s4604_s3  ;;  %s4616_s10 = sld [smem:[#allocation8 + $0x30]] }
  0xc3   : > { %6686 = sst [smem:[#allocation72_spill]] %s4606_s2  ;;  %s4618_s1 = sld [smem:[#allocation8 + $0x31]] }
  0xc4   : > { %6687 = sst [smem:[#allocation73_spill]] %s4608_s30  ;;  %s4620_s12 = sld [smem:[#allocation8 + $0x32]] }
  0xc5   : > { %6688 = sst [smem:[#allocation74_spill]] %s4610_s23  ;;  %s4622_s20 = sld [smem:[#allocation8 + $0x33]] }
  0xc6   : > { %6689 = sst [smem:[#allocation75_spill]] %s4612_s21  ;;  %s4624_s11 = sld [smem:[#allocation8 + $0x34]] }
  0xc7   : > { %6690 = sst [smem:[#allocation76_spill]] %s4614_s18  ;;  %s4626_s3 = sld [smem:[#allocation8 + $0x35]] }
  0xc8   : > { %6691 = sst [smem:[#allocation77_spill]] %s4616_s10  ;;  %s4628_s2 = sld [smem:[#allocation8 + $0x36]] }
  0xc9   : > { %6692 = sst [smem:[#allocation78_spill]] %s4618_s1  ;;  %s4630_s30 = sld [smem:[#allocation8 + $0x37]] }
  0xca   : > { %6693 = sst [smem:[#allocation79_spill]] %s4620_s12  ;;  %s4632_s23 = sld [smem:[#allocation8 + $0x38]] }
  0xcb   : > { %6694 = sst [smem:[#allocation80_spill]] %s4622_s20  ;;  %s4634_s21 = sld [smem:[#allocation8 + $0x39]] }
  0xcc   : > { %6695 = sst [smem:[#allocation81_spill]] %s4624_s11  ;;  %s4636_s18 = sld [smem:[#allocation8 + $0x3a]] }
  0xcd   : > { %6696 = sst [smem:[#allocation82_spill]] %s4626_s3  ;;  %s4638_s17 = sld [smem:[#allocation8 + $0x3b]] }
  0xce   : > { %6697 = sst [smem:[#allocation83_spill]] %s4628_s2  ;;  %s4640_s1 = sld [smem:[#allocation8 + $0x3c]] }
  0xcf   : > { %6698 = sst [smem:[#allocation84_spill]] %s4630_s30  ;;  %s4642_s12 = sld [smem:[#allocation8 + $0x3d]] }
  0xd0   : > { %6699 = sst [smem:[#allocation85_spill]] %s4632_s23  ;;  %s4644_s20 = sld [smem:[#allocation8 + $0x3e]] }
  0xd1   : > { %6700 = sst [smem:[#allocation86_spill]] %s4634_s21  ;;  %s4646_s0 = sld [smem:[#allocation8 + $0x3f]] }
  0xd2   : > { %6701 = sst [smem:[#allocation87_spill]] %s4636_s18  ;;  %s4648_s3 = sld [smem:[#allocation8 + $0x40]] }
  0xd3   : > { %6702 = sst [smem:[#allocation88_spill]] %s4638_s17  ;;  %s4650_s2 = sld [smem:[#allocation8 + $0x41]] }
  0xd4   : > { %6703 = sst [smem:[#allocation89_spill]] %s4640_s1  ;;  %s4652_s30 = sld [smem:[#allocation8 + $0x42]] }
  0xd5   : > { %6704 = sst [smem:[#allocation90_spill]] %s4642_s12  ;;  %s4654_s23 = sld [smem:[#allocation8 + $0x43]] }
  0xd6   : > { %6705 = sst [smem:[#allocation91_spill]] %s4644_s20  ;;  %s4656_s21 = sld [smem:[#allocation8 + $0x44]] }
  0xd7   : > { %6706 = sst [smem:[#allocation92_spill]] %s4646_s0  ;;  %s4658_s18 = sld [smem:[#allocation8 + $0x45]] }
  0xd8   : > { %6707 = sst [smem:[#allocation93_spill]] %s4648_s3  ;;  %s4660_s17 = sld [smem:[#allocation8 + $0x46]] }
  0xd9   : > { %6708 = sst [smem:[#allocation94_spill]] %s4650_s2  ;;  %s4662_s1 = sld [smem:[#allocation8 + $0x47]] }
  0xda   : > { %s4664_s12 = sld [smem:[#allocation8 + $0x48]]  ;;  %s4666_s20 = sld [smem:[#allocation8 + $0x49]] }
  0xdb   : > { %s4668_s0 = sld [smem:[#allocation8 + $0x4a]]  ;;  %s4670_s11 = sld [smem:[#allocation8 + $0x4b]] }
  0xdc   : > { %s4672_s13 = sld [smem:[#allocation8 + $0x4c]]  ;;  %s4674_s29 = sld [smem:[#allocation8 + $0x4d]] }
  0xdd   : > { %s4676_s28 = sld [smem:[#allocation8 + $0x4e]]  ;;  %s4678_s10 = sld [smem:[#allocation8 + $0x4f]] }
  0xde   : > { %6709 = sst [smem:[#allocation95_spill]] %s4660_s17  ;;  %s4680_s4 = sld [smem:[#allocation8 + $0x50]] }
  0xdf   : > { %6710 = sst [smem:[#allocation96_spill]] %s4662_s1  ;;  %s4682_s14 = sld [smem:[#allocation8 + $0x51]] }
  0xe0   : > { %6711 = sst [smem:[#allocation97_spill]] %s4664_s12  ;;  %s4684_s6 = sld [smem:[#allocation8 + $0x52]] }
  0xe1   : > { %6712 = sst [smem:[#allocation98_spill]] %s4666_s20  ;;  %s4686_s9 = sld [smem:[#allocation8 + $0x53]] }
  0xe2   : > { %6713 = sst [smem:[#allocation99_spill]] %s4668_s0  ;;  %s4688_s20 = sld [smem:[#allocation8 + $0x54]] }
  0xe3   : > { %6714 = sst [smem:[#allocation100_spill]] %s4670_s11  ;;  %s4690_s0 = sld [smem:[#allocation8 + $0x55]] }
  0xe4   : > { %6715 = sst [smem:[#allocation101_spill]] %s4672_s13  ;;  %s4692_s11 = sld [smem:[#allocation8 + $0x56]] }
  0xe5   : > { %6716 = sst [smem:[#allocation102_spill]] %s4674_s29  ;;  %s4694_s13 = sld [smem:[#allocation8 + $0x57]] }
  0xe6   : > { %6717 = sst [smem:[#allocation103_spill]] %s4676_s28  ;;  %s4696_s29 = sld [smem:[#allocation8 + $0x58]] }
  0xe7   : > { %6718 = sst [smem:[#allocation104_spill]] %s4678_s10  ;;  %s4698_s28 = sld [smem:[#allocation8 + $0x59]] }
  0xe8   : > { %6719 = sst [smem:[#allocation105_spill]] %s4680_s4  ;;  %s4700_s10 = sld [smem:[#allocation8 + $0x5a]] }
  0xe9   : > { %6720 = sst [smem:[#allocation106_spill]] %s4682_s14  ;;  %s4702_s4 = sld [smem:[#allocation8 + $0x5b]] }
  0xea   : > { %6721 = sst [smem:[#allocation107_spill]] %s4684_s6  ;;  %s4704_s14 = sld [smem:[#allocation8 + $0x5c]] }
  0xeb   : > { %6722 = sst [smem:[#allocation108_spill]] %s4686_s9  ;;  %s4706_s6 = sld [smem:[#allocation8 + $0x5d]] }
  0xec   : > { %6723 = sst [smem:[#allocation109_spill]] %s4688_s20  ;;  %s4708_s9 = sld [smem:[#allocation8 + $0x5e]] }
  0xed   : > { %6724 = sst [smem:[#allocation110_spill]] %s4690_s0  ;;  %s4710_s20 = sld [smem:[#allocation8 + $0x5f]] }
  0xee   : > { %6725 = sst [smem:[#allocation111_spill]] %s4692_s11  ;;  %s4712_s0 = sld [smem:[#allocation8 + $0x60]] }
  0xef   : > { %6726 = sst [smem:[#allocation112_spill]] %s4694_s13  ;;  %s4714_s11 = sld [smem:[#allocation8 + $0x61]] }
  0xf0   : > { %6727 = sst [smem:[#allocation113_spill]] %s4696_s29  ;;  %s4716_s13 = sld [smem:[#allocation8 + $0x62]] }
  0xf1   : > { %6728 = sst [smem:[#allocation114_spill]] %s4698_s28  ;;  %s4718_s29 = sld [smem:[#allocation8 + $0x63]] }
  0xf2   : > { %6729 = sst [smem:[#allocation115_spill]] %s4700_s10  ;;  %s4720_s28 = sld [smem:[#allocation8 + $0x64]] }
  0xf3   : > { %6730 = sst [smem:[#allocation116_spill]] %s4702_s4  ;;  %s4722_s10 = sld [smem:[#allocation8 + $0x65]] }
  0xf4   : > { %6731 = sst [smem:[#allocation117_spill]] %s4704_s14  ;;  %s4724_s4 = sld [smem:[#allocation8 + $0x66]] }
  0xf5   : > { %6732 = sst [smem:[#allocation118_spill]] %s4706_s6  ;;  %s4726_s14 = sld [smem:[#allocation8 + $0x67]] }
  0xf6   : > { %6733 = sst [smem:[#allocation119_spill]] %s4708_s9  ;;  %s4728_s6 = sld [smem:[#allocation8 + $0x68]] }
  0xf7   : > { %6734 = sst [smem:[#allocation120_spill]] %s4710_s20  ;;  %s4730_s9 = sld [smem:[#allocation8 + $0x69]] }
  0xf8   : > { %6735 = sst [smem:[#allocation121_spill]] %s4712_s0  ;;  %s4732_s20 = sld [smem:[#allocation8 + $0x6a]] }
  0xf9   : > { %6736 = sst [smem:[#allocation122_spill]] %s4714_s11  ;;  %s4734_s0 = sld [smem:[#allocation8 + $0x6b]] }
  0xfa   : > { %6737 = sst [smem:[#allocation123_spill]] %s4716_s13  ;;  %s4736_s11 = sld [smem:[#allocation8 + $0x6c]] }
  0xfb   : > { %6738 = sst [smem:[#allocation124_spill]] %s4718_s29  ;;  %s4738_s13 = sld [smem:[#allocation8 + $0x6d]] }
  0xfc   : > { %6739 = sst [smem:[#allocation125_spill]] %s4720_s28  ;;  %s4740_s29 = sld [smem:[#allocation8 + $0x6e]] }
  0xfd   : > { %6740 = sst [smem:[#allocation126_spill]] %s4722_s10  ;;  %s4742_s28 = sld [smem:[#allocation8 + $0x6f]] }
  0xfe   : > { %6741 = sst [smem:[#allocation127_spill]] %s4724_s4  ;;  %s4744_s10 = sld [smem:[#allocation8 + $0x70]] }
  0xff   : > { %6742 = sst [smem:[#allocation128_spill]] %s4726_s14  ;;  %s4746_s4 = sld [smem:[#allocation8 + $0x71]] }
 0x100   : > { %6743 = sst [smem:[#allocation129_spill]] %s4728_s6  ;;  %s4748_s14 = sld [smem:[#allocation8 + $0x72]] }
 0x101   : > { %6744 = sst [smem:[#allocation130_spill]] %s4730_s9  ;;  %s4750_s6 = sld [smem:[#allocation8 + $0x73]] }
 0x102   : > { %6745 = sst [smem:[#allocation131_spill]] %s4732_s20  ;;  %s4752_s9 = sld [smem:[#allocation8 + $0x74]] }
 0x103   : > { %6746 = sst [smem:[#allocation132_spill]] %s4734_s0  ;;  %s4754_s20 = sld [smem:[#allocation8 + $0x75]]  ;;  %v488_v17 = vpop.permute.xlu1 %487  ;;  %v484_v18 = vpop.permute.xlu0 %483 }
 0x104   : > { %6747 = sst [smem:[#allocation133_spill]] %s4736_s11  ;;  %s4756_s0 = sld [smem:[#allocation8 + $0x76]]  ;;  %534 = vst.msk [vmem:[#allocation2 + $0x19] sm:$0xff] %vm531_vm4, %v488_v17  ;;  %532 = vst.msk [vmem:[#allocation2 + $0x1] sm:$0xff] %vm531_vm4, %v484_v18 }
 0x105   : > { %6748 = sst [smem:[#allocation134_spill]] %s4738_s13  ;;  %s4758_s11 = sld [smem:[#allocation8 + $0x77]] }
 0x106   : > { %6749 = sst [smem:[#allocation135_spill]] %s4740_s29  ;;  %s4760_s13 = sld [smem:[#allocation8 + $0x78]] }
 0x107   : > { %6750 = sst [smem:[#allocation136_spill]] %s4742_s28  ;;  %s4762_s29 = sld [smem:[#allocation8 + $0x79]]  ;;  %v490_v19 = vpop.permute.xlu1 %489  ;;  %v486_v20 = vpop.permute.xlu0 %485 }
 0x108   : > { %6751 = sst [smem:[#allocation137_spill]] %s4744_s10  ;;  %s4764_s28 = sld [smem:[#allocation8 + $0x7a]]  ;;  %535 = vst.msk [vmem:[#allocation2 + $0x21] sm:$0xff] %vm531_vm4, %v490_v19  ;;  %533 = vst.msk [vmem:[#allocation2 + $0x9] sm:$0xff] %vm531_vm4, %v486_v20 }
 0x109   : > { %6752 = sst [smem:[#allocation138_spill]] %s4746_s4  ;;  %s4766_s12 = sld [smem:[#allocation8 + $0x7b]] }
 0x10a   : > { %6753 = sst [smem:[#allocation139_spill]] %s4748_s14  ;;  %s4768_s5 = sld [smem:[#allocation8 + $0x7c]] }
 0x10b   : > { %6754 = sst [smem:[#allocation140_spill]] %s4750_s6  ;;  %s4770_s22 = sld [smem:[#allocation8 + $0x7d]]  ;;  %v494_v21 = vpop.permute.xlu1 %493  ;;  %v492_v22 = vpop.permute.xlu0 %491 }
 0x10c   : > { %6755 = sst [smem:[#allocation141_spill]] %s4752_s9  ;;  %s4772_s17 = sld [smem:[#allocation8 + $0x7e]]  ;;  %537 = vst.msk [vmem:[#allocation2 + $0x39] sm:$0xff] %vm531_vm4, %v494_v21  ;;  %536 = vst.msk [vmem:[#allocation2 + $0x31] sm:$0xff] %vm531_vm4, %v492_v22 }
 0x10d   : > { %6756 = sst [smem:[#allocation142_spill]] %s4756_s0  ;;  %s4774_s1 = sld [smem:[#allocation8 + $0x7f]] }
 0x10e   : > { %6757 = sst [smem:[#allocation143_spill]] %s4758_s11  ;;  %s4776_s24 = sld [smem:[#allocation8 + $0x80]] }
 0x10f   : > { %6758 = sst [smem:[#allocation144_spill]] %s4760_s13  ;;  %s4778_s0 = sld [smem:[#allocation8 + $0x81]]  ;;  %v498_v23 = vpop.permute.xlu1 %497  ;;  %v496_v24 = vpop.permute.xlu0 %495 }
 0x110   : > { %6759 = sst [smem:[#allocation145_spill]] %s4762_s29  ;;  %s4780_s11 = sld [smem:[#allocation8 + $0x82]]  ;;  %539 = vst.msk [vmem:[#allocation2 + $0x51] sm:$0xff] %vm531_vm4, %v498_v23  ;;  %538 = vst.msk [vmem:[#allocation2 + $0x49] sm:$0xff] %vm531_vm4, %v496_v24 }
 0x111   : > { %6760 = sst [smem:[#allocation146_spill]] %s4764_s28  ;;  %s4782_s13 = sld [smem:[#allocation8 + $0x83]] }
 0x112   : > { %6761 = sst [smem:[#allocation147_spill]] %s4766_s12  ;;  %s4784_s29 = sld [smem:[#allocation8 + $0x84]] }
 0x113   : > { %6762 = sst [smem:[#allocation148_spill]] %s4768_s5  ;;  %s4786_s28 = sld [smem:[#allocation8 + $0x85]]  ;;  %v502_v25 = vpop.permute.xlu1 %501  ;;  %v500_v26 = vpop.permute.xlu0 %499 }
 0x114   : > { %6763 = sst [smem:[#allocation149_spill]] %s4770_s22  ;;  %s4788_s12 = sld [smem:[#allocation8 + $0x86]]  ;;  %541 = vst.msk [vmem:[#allocation2 + $0x69] sm:$0xff] %vm531_vm4, %v502_v25  ;;  %540 = vst.msk [vmem:[#allocation2 + $0x61] sm:$0xff] %vm531_vm4, %v500_v26 }
 0x115   : > { %6764 = sst [smem:[#allocation150_spill]] %s4772_s17  ;;  %s4790_s5 = sld [smem:[#allocation8 + $0x87]] }
 0x116   : > { %6765 = sst [smem:[#allocation151_spill]] %s4774_s1  ;;  %s4792_s22 = sld [smem:[#allocation8 + $0x88]] }
 0x117   : > { %6766 = sst [smem:[#allocation152_spill]] %s4776_s24  ;;  %s4794_s17 = sld [smem:[#allocation8 + $0x89]]  ;;  %v506_v27 = vpop.permute.xlu1 %505  ;;  %v504_v28 = vpop.permute.xlu0 %503 }
 0x118   : > { %6767 = sst [smem:[#allocation153_spill]] %s4778_s0  ;;  %s4796_s1 = sld [smem:[#allocation8 + $0x8a]]  ;;  %543 = vst.msk [vmem:[#allocation2 + $0x81] sm:$0xff] %vm531_vm4, %v506_v27  ;;  %542 = vst.msk [vmem:[#allocation2 + $0x79] sm:$0xff] %vm531_vm4, %v504_v28 }
 0x119   : > { %6768 = sst [smem:[#allocation154_spill]] %s4780_s11  ;;  %s4798_s24 = sld [smem:[#allocation8 + $0x8b]] }
 0x11a   : > { %6769 = sst [smem:[#allocation155_spill]] %s4782_s13  ;;  %s4800_s0 = sld [smem:[#allocation8 + $0x8c]] }
 0x11b   : > { %6770 = sst [smem:[#allocation156_spill]] %s4784_s29  ;;  %s4802_s11 = sld [smem:[#allocation8 + $0x8d]]  ;;  %v510_v29 = vpop.permute.xlu1 %509  ;;  %v508_v30 = vpop.permute.xlu0 %507 }
 0x11c   : > { %6771 = sst [smem:[#allocation157_spill]] %s4786_s28  ;;  %s4804_s13 = sld [smem:[#allocation8 + $0x8e]]  ;;  %545 = vst.msk [vmem:[#allocation2 + $0x99] sm:$0xff] %vm531_vm4, %v510_v29  ;;  %544 = vst.msk [vmem:[#allocation2 + $0x91] sm:$0xff] %vm531_vm4, %v508_v30 }
 0x11d   : > { %6772 = sst [smem:[#allocation158_spill]] %s4788_s12  ;;  %s4806_s29 = sld [smem:[#allocation8 + $0x8f]] }
 0x11e   : > { %6773 = sst [smem:[#allocation159_spill]] %s4790_s5  ;;  %s4808_s28 = sld [smem:[#allocation9]] }
 0x11f   : > { %6774 = sst [smem:[#allocation160_spill]] %s4792_s22  ;;  %s4810_s12 = sld [smem:[#allocation9 + $0x1]]  ;;  %v514_v31 = vpop.permute.xlu1 %513  ;;  %v512_v32 = vpop.permute.xlu0 %511 }
 0x120   : > { %6775 = sst [smem:[#allocation161_spill]] %s4794_s17  ;;  %s4812_s5 = sld [smem:[#allocation11]]  ;;  %547 = vst.msk [vmem:[#allocation2 + $0xb1] sm:$0xff] %vm531_vm4, %v514_v31  ;;  %546 = vst.msk [vmem:[#allocation2 + $0xa9] sm:$0xff] %vm531_vm4, %v512_v32 }
 0x121   : > { %6776 = sst [smem:[#allocation162_spill]] %s4796_s1  ;;  %s4814_s22 = sld [smem:[#allocation11 + $0x1]] }
 0x122   : > { %6777 = sst [smem:[#allocation163_spill]] %s4798_s24  ;;  %s4816_s17 = sld [smem:[#allocation11 + $0x2]] }
 0x123   : > { %6778 = sst [smem:[#allocation164_spill]] %s4800_s0  ;;  %s4818_s1 = sld [smem:[#allocation11 + $0x3]] }
 0x124   : > { %6779 = sst [smem:[#allocation165_spill]] %s4802_s11  ;;  %s4820_s24 = sld [smem:[#allocation11 + $0x4]] }
 0x125   : > { %6780 = sst [smem:[#allocation166_spill]] %s4804_s13  ;;  %s4822_s0 = sld [smem:[#allocation11 + $0x5]] }
 0x126   : > { %6781 = sst [smem:[#allocation167_spill]] %s4806_s29  ;;  %s4824_s11 = sld [smem:[#allocation11 + $0x6]] }
 0x127   : > { %6782 = sst [smem:[#allocation168_spill]] %s4808_s28  ;;  %s4826_s13 = sld [smem:[#allocation11 + $0x7]] }
 0x128   : > { %6783 = sst [smem:[#allocation169_spill]] %s4810_s12  ;;  %s4828_s29 = sld [smem:[#allocation11 + $0x8]] }
 0x129   : > { %6784 = sst [smem:[#allocation170_spill]] %s4812_s5  ;;  %s4830_s28 = sld [smem:[#allocation11 + $0x9]] }
 0x12a   : > { %6785 = sst [smem:[#allocation171_spill]] %s4814_s22  ;;  %s4832_s12 = sld [smem:[#allocation11 + $0xa]] }
 0x12b   : > { %6786 = sst [smem:[#allocation172_spill]] %s4816_s17  ;;  %s4834_s5 = sld [smem:[#allocation11 + $0xb]] }
 0x12c   : > { %6787 = sst [smem:[#allocation173_spill]] %s4818_s1  ;;  %s4836_s22 = sld [smem:[#allocation11 + $0xc]] }
 0x12d   : > { %6788 = sst [smem:[#allocation174_spill]] %s4820_s24  ;;  %s4838_s17 = sld [smem:[#allocation11 + $0xd]] }
 0x12e   : > { %6789 = sst [smem:[#allocation175_spill]] %s4822_s0  ;;  %s4840_s1 = sld [smem:[#allocation11 + $0xe]] }
 0x12f   : > { %6790 = sst [smem:[#allocation176_spill]] %s4824_s11  ;;  %s4842_s24 = sld [smem:[#allocation11 + $0xf]] }
 0x130   : > { %6791 = sst [smem:[#allocation177_spill]] %s4826_s13  ;;  %s4844_s0 = sld [smem:[#allocation11 + $0x10]] }
 0x131   : > { %6792 = sst [smem:[#allocation178_spill]] %s4828_s29  ;;  %s4846_s11 = sld [smem:[#allocation11 + $0x11]] }
 0x132   : > { %6793 = sst [smem:[#allocation179_spill]] %s4830_s28  ;;  %s4848_s13 = sld [smem:[#allocation11 + $0x12]] }
 0x133   : > { %6794 = sst [smem:[#allocation180_spill]] %s4832_s12  ;;  %s4850_s29 = sld [smem:[#allocation11 + $0x13]] }
 0x134   : > { %6795 = sst [smem:[#allocation181_spill]] %s4834_s5  ;;  %s4852_s28 = sld [smem:[#allocation11 + $0x14]] }
 0x135   : > { %6796 = sst [smem:[#allocation182_spill]] %s4836_s22  ;;  %s4854_s12 = sld [smem:[#allocation11 + $0x15]] }
 0x136   : > { %6797 = sst [smem:[#allocation183_spill]] %s4838_s17  ;;  %s4856_s5 = sld [smem:[#allocation11 + $0x16]] }
 0x137   : > { %6798 = sst [smem:[#allocation184_spill]] %s4840_s1  ;;  %s4858_s22 = sld [smem:[#allocation11 + $0x17]] }
 0x138   : > { %6799 = sst [smem:[#allocation185_spill]] %s4842_s24  ;;  %s4860_s17 = sld [smem:[#allocation11 + $0x18]] }
 0x139   : > { %6800 = sst [smem:[#allocation186_spill]] %s4844_s0  ;;  %s4862_s1 = sld [smem:[#allocation11 + $0x19]] }
 0x13a   : > { %6801 = sst [smem:[#allocation187_spill]] %s4846_s11  ;;  %s4864_s24 = sld [smem:[#allocation11 + $0x1a]] }
 0x13b   : > { %6802 = sst [smem:[#allocation188_spill]] %s4848_s13  ;;  %s4866_s0 = sld [smem:[#allocation11 + $0x1b]] }
 0x13c   : > { %6803 = sst [smem:[#allocation189_spill]] %s4850_s29  ;;  %s4868_s11 = sld [smem:[#allocation11 + $0x1c]] }
 0x13d   : > { %6804 = sst [smem:[#allocation190_spill]] %s4852_s28  ;;  %s4870_s13 = sld [smem:[#allocation11 + $0x1d]] }
 0x13e   : > { %6805 = sst [smem:[#allocation191_spill]] %s4854_s12  ;;  %s4872_s29 = sld [smem:[#allocation11 + $0x1e]] }
 0x13f   : > { %6806 = sst [smem:[#allocation192_spill]] %s4856_s5  ;;  %s4874_s28 = sld [smem:[#allocation11 + $0x1f]] }
 0x140   : > { %6807 = sst [smem:[#allocation193_spill]] %s4858_s22  ;;  %s4876_s12 = sld [smem:[#allocation11 + $0x20]] }
 0x141   : > { %6808 = sst [smem:[#allocation194_spill]] %s4860_s17  ;;  %s4878_s5 = sld [smem:[#allocation11 + $0x21]] }
 0x142   : > { %6809 = sst [smem:[#allocation195_spill]] %s4862_s1  ;;  %s4880_s22 = sld [smem:[#allocation11 + $0x22]] }
 0x143   : > { %6810 = sst [smem:[#allocation196_spill]] %s4864_s24  ;;  %s4882_s17 = sld [smem:[#allocation11 + $0x23]] }
 0x144   : > { %6811 = sst [smem:[#allocation197_spill]] %s4866_s0  ;;  %s4884_s1 = sld [smem:[#allocation11 + $0x24]] }
 0x145   : > { %6812 = sst [smem:[#allocation198_spill]] %s4868_s11  ;;  %s4886_s24 = sld [smem:[#allocation11 + $0x25]] }
 0x146   : > { %6813 = sst [smem:[#allocation199_spill]] %s4870_s13  ;;  %s4888_s0 = sld [smem:[#allocation11 + $0x26]] }
 0x147   : > { %6814 = sst [smem:[#allocation200_spill]] %s4872_s29  ;;  %s4890_s11 = sld [smem:[#allocation11 + $0x27]] }
 0x148   : > { %6815 = sst [smem:[#allocation201_spill]] %s4874_s28  ;;  %s4892_s13 = sld [smem:[#allocation11 + $0x28]] }
 0x149   : > { %6816 = sst [smem:[#allocation202_spill]] %s4876_s12  ;;  %s4894_s29 = sld [smem:[#allocation11 + $0x29]] }
 0x14a   : > { %6817 = sst [smem:[#allocation203_spill]] %s4878_s5  ;;  %s4896_s28 = sld [smem:[#allocation11 + $0x2a]] }
 0x14b   : > { %6818 = sst [smem:[#allocation204_spill]] %s4882_s17  ;;  %s4898_s12 = sld [smem:[#allocation11 + $0x2b]] }
 0x14c   : > { %6819 = sst [smem:[#allocation205_spill]] %s4884_s1  ;;  %s4900_s5 = sld [smem:[#allocation11 + $0x2c]] }
 0x14d   : > { %6820 = sst [smem:[#allocation206_spill]] %s4886_s24  ;;  %s4902_s17 = sld [smem:[#allocation11 + $0x2d]] }
 0x14e   : > { %6821 = sst [smem:[#allocation207_spill]] %s4888_s0  ;;  %s4904_s1 = sld [smem:[#allocation11 + $0x2e]] }
 0x14f   : > { %6822 = sst [smem:[#allocation208_spill]] %s4890_s11  ;;  %s4906_s24 = sld [smem:[#allocation11 + $0x2f]] }
 0x150   : > { %6823 = sst [smem:[#allocation209_spill]] %s4892_s13  ;;  %s4908_s0 = sld [smem:[#allocation11 + $0x30]] }
 0x151   : > { %6824 = sst [smem:[#allocation210_spill]] %s4894_s29  ;;  %s4910_s13 = sld [smem:[#allocation11 + $0x31]] }
 0x152   : > { %6825 = sst [smem:[#allocation211_spill]] %s4896_s28  ;;  %s4912_s29 = sld [smem:[#allocation11 + $0x32]] }
 0x153   : > { %6826 = sst [smem:[#allocation212_spill]] %s4898_s12  ;;  %s4944_s28 = sld [smem:[#allocation11 + $0x40]] }
 0x154   : > { %6827 = sst [smem:[#allocation213_spill]] %s4900_s5  ;;  %s4916_s5 = sld [smem:[#allocation11 + $0x33]] }
 0x155   : > { %6828 = sst [smem:[#allocation214_spill]] %s4902_s17  ;;  %s4918_s12 = sld [smem:[#allocation11 + $0x34]] }
 0x156   : > { %6829 = sst [smem:[#allocation215_spill]] %s4904_s1  ;;  %s4920_s17 = sld [smem:[#allocation11 + $0x35]] }
 0x157   : > { %6830 = sst [smem:[#allocation216_spill]] %s4906_s24  ;;  %s4922_s1 = sld [smem:[#allocation11 + $0x36]] }
 0x158   : > { %6831 = sst [smem:[#allocation217_spill]] %s4908_s0  ;;  %s4924_s24 = sld [smem:[#allocation11 + $0x37]] }
 0x159   : > { %6832 = sst [smem:[#allocation218_spill]] %s4910_s13  ;;  %s4926_s0 = sld [smem:[#allocation11 + $0x38]] }
 0x15a   : > { %6833 = sst [smem:[#allocation219_spill]] %s4912_s29  ;;  %s4928_s13 = sld [smem:[#allocation11 + $0x39]] }
 0x15b   : > { %6834 = sst [smem:[#allocation220_spill]] %s4916_s5  ;;  %s4930_s29 = sld [smem:[#allocation11 + $0x3a]] }
 0x15c   : > { %6835 = sst [smem:[#allocation221_spill]] %s4918_s12  ;;  %s4934_s5 = sld [smem:[#allocation11 + $0x3b]] }
 0x15d   : > { %6836 = sst [smem:[#allocation222_spill]] %s4920_s17  ;;  %s4936_s12 = sld [smem:[#allocation11 + $0x3c]] }
 0x15e   : > { %6837 = sst [smem:[#allocation223_spill]] %s4922_s1  ;;  %s4938_s17 = sld [smem:[#allocation11 + $0x3d]] }
 0x15f   : > { %6838 = sst [smem:[#allocation224_spill]] %s4924_s24  ;;  %s4940_s1 = sld [smem:[#allocation11 + $0x3e]] }
 0x160   : > { %s4942_s24 = sld [smem:[#allocation11 + $0x3f]]  ;;  %s4946_s11 = sld [smem:[#allocation11 + $0x41]] }
 0x161   : > { %6839 = sst [smem:[#allocation225_spill]] %s4930_s29  ;;  %s4948_s29 = sld [smem:[#allocation11 + $0x42]] }
 0x162   : > { %6840 = sst [smem:[#allocation226_spill]] %s4934_s5  ;;  %s4952_s5 = sld [smem:[#allocation11 + $0x43]] }
 0x163   : > { %6841 = sst [smem:[#allocation227_spill]] %s4936_s12  ;;  %s4954_s12 = sld [smem:[#allocation11 + $0x44]] }
 0x164   : > { %6842 = sst [smem:[#allocation228_spill]] %s4938_s17  ;;  %s4956_s17 = sld [smem:[#allocation11 + $0x45]] }
 0x165   : > { %6843 = sst [smem:[#allocation229_spill]] %s4940_s1  ;;  %s4958_s1 = sld [smem:[#allocation11 + $0x46]] }
 0x166   : > { %6844 = sst [smem:[#allocation230_spill]] %s4942_s24  ;;  %s4960_s24 = sld [smem:[#allocation11 + $0x47]] }
 0x167   : > { %6845 = sst [smem:[#allocation231_spill]] %s4944_s28  ;;  %s4962_s28 = sld [smem:[#allocation12]] }
 0x168   : > { %6846 = sst [smem:[#allocation232_spill]] %s4946_s11  ;;  %s4964_s11 = sld [smem:[#allocation12 + $0x1]] }
 0x169   : > { %6847 = sst [smem:[#allocation233_spill]] %s4948_s29  ;;  %s4966_s29 = sld [smem:[#allocation12 + $0x2]] }
 0x16a   : > { %6848 = sst [smem:[#allocation234_spill]] %s4952_s5  ;;  %s4970_s5 = sld [smem:[#allocation12 + $0x3]] }
 0x16b   : > { %6849 = sst [smem:[#allocation235_spill]] %s4956_s17  ;;  %s4992_s17 = smov 0  }
 0x16c   : > { %6850 = sst [smem:[#allocation236_spill]] %s4958_s1 }
 0x16d   : > { %6851 = sst [smem:[#allocation237_spill]] %s4960_s24  ;;  %s6858_s24 = smul.u32 48, %s4323_s15 }
 0x16e   : > { %6852 = sst [smem:[#allocation238_spill]] %s4962_s28 }
 0x16f   : > { %6853 = sst [smem:[#allocation239_spill]] %s4964_s11  ;;  %s6857_s11 = sshll.u32 %s4323_s15, 4 }
 0x170   : > { %6854 = sst [smem:[#allocation240_spill]] %s4966_s29  ;;  %s6856_s29 = sshll.u32 %s4323_s15, 5 }
 0x171   : > { %6855 = sst [smem:[#allocation241_spill]] %s4970_s5  ;;  %s4982_s5 = scalar_lea.vmem [#allocation14], %s6856_s29 }
 0x172   : > { %s4986_s28 = scalar_lea.vmem [#allocation15], %s6857_s11  ;;  %s4990_s1 = scalar_lea.vmem [#allocation17], %s6858_s24 }
 0x173 LB: >> { %s6859_s3 = sld [smem:[#allocation93_spill]]  ;;  %s6860_s16 = sld [smem:[#allocation49_spill]]  ;;  %v1193_v37 = vstv %s4552_s26  ;;  %v1259_v49 = vstv %s4556_s19  ;;  %v1250_v50 = vstv %s4554_s25  ;;  %v1280_v54 = vstv %s4654_s23  ;;  %s4095_s17 = sphi %s4992_s17, %s775_s17  }
 0x174   : >> { %s6861_s4 = sld [smem:[#allocation138_spill]]  ;;  %s6862_s10 = sld [smem:[#allocation137_spill]]  ;;  %vm801_vm5 = vcmask 1045504   ;;  %v1268_v60 = vstv %s4652_s30  ;;  %vm840_vm6 = vcmask 1046528   ;;  %v1324_v27 = vstv %s4558_s27 }
 0x175   : >> { %s4998_s29 = sshll.u32 %s4095_s17, 3  ;;  %s6863_s2 = sld [smem:[#allocation94_spill]]  ;;  %v1338_v31 = vstv %s4656_s21  ;;  %v1376_v32 = vstv %s4754_s20  ;;  %vm2303_vm7 = vcmask 130048  }
 0x176   : >> { %s5003_s24 = scalar_lea.vmem [#allocation2], %s4998_s29  ;;  %s6600_s11 = smov 127  }
 0x177   : >> { %v5006_v35 = vld [vmem:[%s5003_s24] sm:$0xff]  ;;  %v5009_v36 = vld [vmem:[%s5003_s24 + $0x8] sm:$0x3]  ;;  %v5032_v53 = vld [vmem:[%s5003_s24 + $0x18] sm:$0xff]  ;;  %s6864_s14 = sld [smem:[#allocation139_spill]]  ;;  %s6865_s6 = sld [smem:[#allocation140_spill]] }
 0x178   : >> { %v1194_v43 = vmul.f32 %v1193_v37, %v5006_v35  ;;  %v5036_v59 = vld [vmem:[%s5003_s24 + $0x20] sm:$0x3]  ;;  %v1260_v61 = vmul.f32 %v5032_v53, %v1259_v49  ;;  %v1251_v62 = vmul.f32 %v5032_v53, %v1250_v50  ;;  %v1281_v63 = vmul.f32 %v5032_v53, %v1280_v54  ;;  %s6866_s8 = sld [smem:[#allocation50_spill]]  ;;  %s6867_s9 = sld [smem:[#allocation141_spill]]  ;;  %v5068_v25 = vld [vmem:[%s5003_s24 + $0x30] sm:$0xff] }
 0x179   : >> { %v1200_v33 = vstv %s6859_s3  ;;  %v1186_v34 = vstv %s6860_s16  ;;  %v1282_v0 = vmul.f32 %v5036_v59, %v1280_v54  ;;  %v1269_v3 = vmul.f32 %v5032_v53, %v1268_v60  ;;  %v5077_v30 = vld [vmem:[%s5003_s24 + $0x38] sm:$0x3]  ;;  %s6868_s7 = sld [smem:[#allocation52_spill]]  ;;  %s6870_s3 = sld [smem:[#allocation96_spill]] }
 0x17a   : >> { %v1201_v38 = vmul.f32 %v1200_v33, %v5006_v35  ;;  %v1187_v39 = vmul.f32 %v1186_v34, %v5006_v35  ;;  %v1238_v40 = vstv %s6861_s4  ;;  %v1226_v41 = vstv %s6862_s10  ;;  %s6871_s4 = sld [smem:[#allocation95_spill]]  ;;  %s6881_s10 = sld [smem:[#allocation56_spill]] }
 0x17b   : >> { %v1202_v42 = vmul.f32 %v1200_v33, %v5009_v36  ;;  %v1213_v44 = vstv %s6863_s2  ;;  %v1239_v45 = vmul.f32 %v1238_v40, %v5006_v35  ;;  %v1240_v46 = vmul.f32 %v1238_v40, %v5009_v36  ;;  %s6869_s2 = sld [smem:[#allocation51_spill]]  ;;  %s6883_s16 = sld [smem:[#allocation55_spill]] }
 0x17c   : >> { %1205 = vrot.lane.b32.xlu1 %v1201_v38, %s6600_s11  ;;  %1189 = vrot.lane.b32.xlu0 %v1187_v39, %s6600_s11  ;;  %v1227_v47 = vmul.f32 %v1226_v41, %v5006_v35  ;;  %v1228_v48 = vmul.f32 %v1226_v41, %v5009_v36  ;;  %v1215_v51 = vmul.f32 %v1213_v44, %v5009_v36  ;;  %v1262_v7 = vrot.slane %v1260_v61, 7  ;;  %s775_s17 = sadd.s32 1, %s4095_s17  }
 0x17d   : >> { %v1214_v52 = vmul.f32 %v1213_v44, %v5006_v35  ;;  %v1243_v55 = vrot.slane %v1239_v45, 2  ;;  %v1244_v56 = vrot.slane %v1240_v46, 2  ;;  %v1270_v4 = vmul.f32 %v5036_v59, %v1268_v60  ;;  %v5093_v44 = vld [vmem:[%s5003_s24 + $0x48] sm:$0xff]  ;;  %p772_p7 = scmp.ge.s32.totalorder %s775_s17, 2  }
 0x17e   : >> { %v1231_v57 = vrot.slane %v1227_v47, 2  ;;  %v1232_v58 = vrot.slane %v1228_v48, 2  ;;  %v1292_v5 = vstv %s6864_s14  ;;  %v1308_v6 = vstv %s6865_s6  ;;  %s6872_s6 = sld [smem:[#allocation142_spill]]  ;;  %s6882_s14 = sld [smem:[#allocation99_spill]] }
 0x17f   : >> { %v1245_v1 = vsel %vm801_vm5, %v1243_v55, %v1244_v56  ;;  %v1253_v8 = vrot.slane %v1251_v62, 7  ;;  %v1285_v9 = vrot.slane %v1281_v63, 1  ;;  %v1286_v10 = vrot.slane %v1282_v0, 1 }
 0x180   : >> { %1207 = vrot.lane.b32.xlu1 %v1202_v42, %s6600_s11  ;;  %1196 = vrot.lane.b32.xlu0 %v1194_v43, %s6600_s11  ;;  %v1233_v2 = vsel %vm801_vm5, %v1231_v57, %v1232_v58  ;;  %v1273_v11 = vrot.slane %v1269_v3, 1  ;;  %v1274_v12 = vrot.slane %v1270_v4, 1  ;;  %v1293_v13 = vmul.f32 %v5032_v53, %v1292_v5 }
 0x181   : >> { %v1294_v14 = vmul.f32 %v5036_v59, %v1292_v5  ;;  %v1309_v15 = vmul.f32 %v5032_v53, %v1308_v6  ;;  %v1310_v16 = vmul.f32 %v5036_v59, %v1308_v6  ;;  %v1287_v17 = vsel %vm840_vm6, %v1285_v9, %v1286_v10 }
 0x182   : >> { %v1275_v18 = vsel %vm840_vm6, %v1273_v11, %v1274_v12  ;;  %v1297_v20 = vrot.slane %v1293_v13, 1  ;;  %v1331_v26 = vstv %s6866_s8  ;;  %v1325_v29 = vmul.f32 %v5068_v25, %v1324_v27  ;;  %s6873_s8 = sld [smem:[#allocation143_spill]]  ;;  %v5141_v27 = vld [vmem:[%s5003_s24 + $0x68] sm:$0x3] }
 0x183   : >> { %v1298_v19 = vrot.slane %v1294_v14, 1  ;;  %v1314_v22 = vrot.slane %v1310_v16, 1  ;;  %v1313_v23 = vrot.slane %v1309_v15, 1  ;;  %v1332_v28 = vmul.f32 %v5068_v25, %v1331_v26 }
 0x184   : >> { %1220 = vrot.lane.b32.xlu1 %v1215_v51, %s6600_s11  ;;  %1218 = vrot.lane.b32.xlu0 %v1214_v52, %s6600_s11  ;;  %v1364_v33 = vstv %s6867_s9  ;;  %v1340_v34 = vmul.f32 %v5077_v30, %v1338_v31  ;;  %v1339_v37 = vmul.f32 %v5068_v25, %v1338_v31  ;;  %v1351_v38 = vstv %s4658_s18  ;;  %s6880_s9 = sld [smem:[#allocation100_spill]] }
 0x185   : >> { %v1299_v21 = vsel %vm840_vm6, %v1297_v20, %v1298_v19  ;;  %v1315_v24 = vsel %vm840_vm6, %v1313_v23, %v1314_v22  ;;  %v1377_v39 = vmul.f32 %v5068_v25, %v1376_v32  ;;  %v1378_v40 = vmul.f32 %v5077_v30, %v1376_v32  ;;  %v5101_v52 = vld [vmem:[%s5003_s24 + $0x50] sm:$0x3]  ;;  %v5131_v20 = vld [vmem:[%s5003_s24 + $0x60] sm:$0xff] }
 0x186   : >> { %v1365_v41 = vmul.f32 %v5068_v25, %v1364_v33  ;;  %v1366_v42 = vmul.f32 %v5077_v30, %v1364_v33  ;;  %v1353_v43 = vmul.f32 %v5077_v30, %v1351_v38  ;;  %v1352_v45 = vmul.f32 %v5068_v25, %v1351_v38 }
 0x187   : >> { %v1381_v46 = vrot.slane %v1377_v39, 2  ;;  %v1397_v47 = vstv %s6868_s7  ;;  %v1388_v48 = vstv %s6869_s2  ;;  %v1382_v49 = vrot.slane %v1378_v40, 2  ;;  %s6874_s2 = sld [smem:[#allocation54_spill]]  ;;  %s6879_s7 = sld [smem:[#allocation98_spill]] }
 0x188   : >> { %1246 = vrot.lane.b32.xlu1 %v1245_v1, %s6600_s11  ;;  %1234 = vrot.lane.b32.xlu0 %v1233_v2, %s6600_s11  ;;  %v1369_v50 = vrot.slane %v1365_v41, 2  ;;  %v1370_v51 = vrot.slane %v1366_v42, 2  ;;  %v1418_v54 = vstv %s6870_s3  ;;  %v1406_v55 = vstv %s6871_s4  ;;  %s6875_s3 = sld [smem:[#allocation145_spill]]  ;;  %s6876_s4 = sld [smem:[#allocation53_spill]] }
 0x189   : >> { %v1398_v56 = vmul.f32 %v5093_v44, %v1397_v47  ;;  %v1389_v57 = vmul.f32 %v5093_v44, %v1388_v48  ;;  %v1419_v58 = vmul.f32 %v5093_v44, %v1418_v54  ;;  %v1420_v60 = vmul.f32 %v5101_v52, %v1418_v54 }
 0x18a   : >> { %v1383_v61 = vsel %vm801_vm5, %v1381_v46, %v1382_v49  ;;  %v1371_v62 = vsel %vm801_vm5, %v1369_v50, %v1370_v51  ;;  %v1407_v63 = vmul.f32 %v5093_v44, %v1406_v55  ;;  %v1408_v0 = vmul.f32 %v5101_v52, %v1406_v55 }
 0x18b   : >> { %v1430_v1 = vstv %s6872_s6  ;;  %v1400_v2 = vrot.slane %v1398_v56, 7  ;;  %v1391_v3 = vrot.slane %v1389_v57, 7  ;;  %v1423_v4 = vrot.slane %v1419_v58, 1  ;;  %s6877_s6 = sld [smem:[#allocation144_spill]] }
 0x18c   : >> { %1263 = vrot.lane.b32.xlu1 %v1262_v7, %s6600_s11  ;;  %1254 = vrot.lane.b32.xlu0 %v1253_v8, %s6600_s11  ;;  %v1424_v5 = vrot.slane %v1420_v60, 1  ;;  %v1446_v6 = vstv %s6873_s8  ;;  %v1411_v7 = vrot.slane %v1407_v63, 1  ;;  %v1412_v8 = vrot.slane %v1408_v0, 1  ;;  %s6878_s8 = sld [smem:[#allocation97_spill]] }
 0x18d   : >> { %v1431_v9 = vmul.f32 %v5093_v44, %v1430_v1  ;;  %v1432_v10 = vmul.f32 %v5101_v52, %v1430_v1  ;;  %v1447_v12 = vmul.f32 %v5093_v44, %v1446_v6  ;;  %v1448_v16 = vmul.f32 %v5101_v52, %v1446_v6 }
 0x18e   : >> { %v1425_v11 = vsel %vm840_vm6, %v1423_v4, %v1424_v5  ;;  %v1413_v13 = vsel %vm840_vm6, %v1411_v7, %v1412_v8  ;;  %v1556_v38 = vstv %s6880_s9  ;;  %v1535_v41 = vstv %s6881_s10  ;;  %s6886_s9 = sld [smem:[#allocation123_spill]]  ;;  %s6889_s10 = sld [smem:[#allocation77_spill]] }
 0x18f   : >> { %v1436_v14 = vrot.slane %v1432_v10, 1  ;;  %v1435_v15 = vrot.slane %v1431_v9, 1  ;;  %v1544_v42 = vstv %s6882_s14  ;;  %v1526_v47 = vstv %s6883_s16  ;;  %s6887_s14 = sld [smem:[#allocation147_spill]]  ;;  %s6888_s16 = sld [smem:[#allocation58_spill]]  ;;  %v5190_v10 = vld [vmem:[%s5003_s24 + $0x90] sm:$0xff] }
 0x190   : >> { %1288 = vrot.lane.b32.xlu1 %v1287_v17, %s6600_s11  ;;  %1276 = vrot.lane.b32.xlu0 %v1275_v18, %s6600_s11  ;;  %v1452_v18 = vrot.slane %v1448_v16, 1 }
 0x191   : >> { %v1437_v17 = vsel %vm840_vm6, %v1435_v15, %v1436_v14  ;;  %v1502_v26 = vstv %s6877_s6  ;;  %s6892_s6 = sld [smem:[#allocation60_spill]] }
 0x192   : >> { %v1503_v40 = vmul.f32 %v5131_v20, %v1502_v26  ;;  %v1504_v48 = vmul.f32 %v5141_v27, %v1502_v26 }
 0x194   : >> { %1302 = vrot.lane.b32.xlu1 %v1298_v19, %s6600_s11  ;;  %1300 = vrot.lane.b32.xlu0 %v1299_v21, %s6600_s11  ;;  %v1451_v19 = vrot.slane %v1447_v12, 1  ;;  %v1469_v21 = vstv %s6874_s2  ;;  %s6884_s2 = sld [smem:[#allocation146_spill]]  ;;  %v1507_v60 = vrot.slane %v1503_v40, 2 }
 0x195   : >> { %v1470_v31 = vmul.f32 %v5131_v20, %v1469_v21  ;;  %v1584_v6 = vstv %s6887_s14  ;;  %v1607_v12 = vstv %s6888_s16  ;;  %s6897_s14 = sld [smem:[#allocation81_spill]]  ;;  %s6898_s16 = sld [smem:[#allocation59_spill]] }
 0x196   : >> { %v1453_v23 = vsel %vm840_vm6, %v1451_v19, %v1452_v18  ;;  %v5212_v26 = vmul.f32 %v5190_v10, %v1607_v12 }
 0x198   : >> { %1318 = vrot.lane.b32.xlu1 %v1314_v22, %s6600_s11  ;;  %1316 = vrot.lane.b32.xlu0 %v1315_v24, %s6600_s11  ;;  %v1514_v22 = vstv %s6875_s3  ;;  %v1462_v24 = vstv %s6876_s4  ;;  %s6890_s3 = sld [smem:[#allocation57_spill]]  ;;  %s6891_s4 = sld [smem:[#allocation101_spill]] }
 0x199   : >> { %v1515_v32 = vmul.f32 %v5131_v20, %v1514_v22  ;;  %v1516_v33 = vmul.f32 %v5141_v27, %v1514_v22  ;;  %v1463_v39 = vmul.f32 %v5131_v20, %v1462_v24 }
 0x19a   : >> { %v1568_v51 = vstv %s6884_s2  ;;  %s6894_s2 = sld [smem:[#allocation102_spill]] }
 0x19b   : >> { %v1519_v54 = vrot.slane %v1515_v32, 2  ;;  %v1520_v55 = vrot.slane %v1516_v33, 2 }
 0x19c   : >> { %1334 = vrot.lane.b32.xlu1 %v1332_v28, %s6600_s11  ;;  %1327 = vrot.lane.b32.xlu0 %v1325_v29, %s6600_s11  ;;  %v1476_v28 = vstv %s6878_s8  ;;  %v1489_v29 = vstv %s6879_s7  ;;  %s6885_s7 = sld [smem:[#allocation35_spill]]  ;;  %s6893_s8 = sld [smem:[#allocation150_spill]] }
 0x19d   : >> { %v1491_v46 = vmul.f32 %v5141_v27, %v1489_v29  ;;  %v1490_v58 = vmul.f32 %v5131_v20, %v1489_v29  ;;  %v1521_v7 = vsel %vm801_vm5, %v1519_v54, %v1520_v55  ;;  %v5216_v29 = vld [vmem:[%s5003_s24 + $0x98] sm:$0x3] }
 0x1a0   : >> { %1345 = vrot.lane.b32.xlu1 %v1340_v34, %s6600_s11  ;;  %1343 = vrot.lane.b32.xlu0 %v1339_v37, %s6600_s11  ;;  %v5149_v34 = vld [vmem:[%s5003_s24 + $0x78] sm:$0xff]  ;;  %v5152_v37 = vld [vmem:[%s5003_s24 + $0x80] sm:$0x3] }
 0x1a1   : >> { %v1557_v49 = vmul.f32 %v5149_v34, %v1556_v38  ;;  %v1558_v50 = vmul.f32 %v5152_v37, %v1556_v38  ;;  %v5170_v56 = vmul.f32 %v5149_v34, %v1535_v41  ;;  %v1545_v57 = vmul.f32 %v5149_v34, %v1544_v42 }
 0x1a2   : >> { %v1546_v63 = vmul.f32 %v5152_v37, %v1544_v42  ;;  %v1569_v0 = vmul.f32 %v5149_v34, %v1568_v51  ;;  %v5183_v1 = vmul.f32 %v5152_v37, %v1568_v51  ;;  %v1585_v19 = vmul.f32 %v5149_v34, %v1584_v6 }
 0x1a3   : >> { %v1561_v4 = vrot.slane %v1557_v49, 1  ;;  %v1562_v5 = vrot.slane %v1558_v50, 1  ;;  %v1538_v8 = vrot.slane %v5170_v56, 7  ;;  %v1549_v9 = vrot.slane %v1545_v57, 1 }
 0x1a4   : >> { %1358 = vrot.lane.b32.xlu1 %v1353_v43, %s6600_s11  ;;  %1356 = vrot.lane.b32.xlu0 %v1352_v45, %s6600_s11  ;;  %v1478_v43 = vmul.f32 %v5141_v27, %v1476_v28  ;;  %v1477_v45 = vmul.f32 %v5131_v20, %v1476_v28  ;;  %v1550_v16 = vrot.slane %v1546_v63, 1  ;;  %v5209_v24 = vmul.f32 %v5152_v37, %v1584_v6 }
 0x1a5   : >> { %v1600_v28 = vstv %s6890_s3  ;;  %v1614_v38 = vstv %s6891_s4  ;;  %v1627_v50 = vstv %s6894_s2  ;;  %s6899_s3 = sld [smem:[#allocation131_spill]]  ;;  %s6900_s4 = sld [smem:[#allocation135_spill]] }
 0x1a6   : >> { %v1551_v42 = vsel %vm840_vm6, %v1549_v9, %v1550_v16  ;;  %v5242_v49 = vmul.f32 %v5190_v10, %v1600_v28  ;;  %v5247_v54 = vmul.f32 %v5216_v29, %v1614_v38  ;;  %v5266_v63 = vmul.f32 %v5190_v10, %v1614_v38  ;;  %s6903_s2 = sld [smem:[#allocation47_spill]] }
 0x1a8   : >> { %1384 = vrot.lane.b32.xlu1 %v1383_v61, %s6600_s11  ;;  %1372 = vrot.lane.b32.xlu0 %v1371_v62, %s6600_s11  ;;  %v5177_v61 = vmul.f32 %v5149_v34, %v1526_v47  ;;  %v821_v62 = vstv %s6885_s7  ;;  %s6895_s7 = sld [smem:[#allocation39_spill]]  ;;  %v5237_v47 = vld [vmem:[%s5003_s24 + $0xb0] sm:$0x3] }
 0x1aa   : >> { %v1529_v22 = vrot.slane %v5177_v61, 7 }
 0x1ac   : >> { %1401 = vrot.lane.b32.xlu1 %v1400_v2, %s6600_s11  ;;  %1392 = vrot.lane.b32.xlu0 %v1391_v3, %s6600_s11  ;;  %v856_v2 = vstv %s6886_s9  ;;  %v1508_v3 = vrot.slane %v1504_v48, 2  ;;  %s6896_s9 = sld [smem:[#allocation127_spill]]  ;;  %v1590_v48 = vrot.slane %v5209_v24, 1 }
 0x1ad   : >> { %v5201_v15 = vmul.f32 %v5036_v59, %v856_v2 }
 0x1ae   : >> { %v1509_v21 = vsel %vm801_vm5, %v1507_v60, %v1508_v3  ;;  %v924_v51 = vstv %s6895_s7  ;;  %s6904_s7 = sld [smem:[#allocation121_spill]] }
 0x1af   : >> { %v862_v41 = vrot.slane %v5201_v15, 1  ;;  %v5273_v3 = vmul.f32 %v5093_v44, %v924_v51  ;;  %v1128_v51 = vstv %s6903_s2  ;;  %s6911_s2 = sld [smem:[#allocation83_spill]] }
 0x1b0   : >> { %1426 = vrot.lane.b32.xlu1 %v1425_v11, %s6600_s11  ;;  %1414 = vrot.lane.b32.xlu0 %v1413_v13, %s6600_s11  ;;  %v5193_v11 = vmul.f32 %v5032_v53, %v821_v62  ;;  %v786_v13 = vstv %s6889_s10  ;;  %v6604_v62 = vstv %s6897_s14 }
 0x1b1   : >> { %v787_v33 = vmul.f32 %v786_v13, %v5006_v35  ;;  %v891_v9 = vmul.f32 %v5068_v25, %v6604_v62 }
 0x1b2   : >> { %v824_v32 = vrot.slane %v5193_v11, 7  ;;  %v958_v56 = vstv %s6896_s9  ;;  %s6905_s9 = sld [smem:[#allocation89_spill]] }
 0x1b3   : >> { %v959_v6 = vmul.f32 %v5093_v44, %v958_v56  ;;  %v5287_v12 = vmul.f32 %v5101_v52, %v958_v56 }
 0x1b4   : >> { %1440 = vrot.lane.b32.xlu1 %v1436_v14, %s6600_s11  ;;  %1438 = vrot.lane.b32.xlu0 %v1437_v17, %s6600_s11  ;;  %v857_v14 = vmul.f32 %v5032_v53, %v856_v2  ;;  %v1574_v17 = vrot.slane %v5183_v1, 1  ;;  %v826_v57 = vadd.f32 %v824_v32, %v787_v33  ;;  %v1664_v2 = vstv %s6898_s16  ;;  %s6906_s16 = sld [smem:[#allocation79_spill]] }
 0x1b5   : >> { %v6599_v33 = vrot.slane %v5273_v3, 7 }
 0x1b6   : >> { %v861_v40 = vrot.slane %v857_v14, 1  ;;  %v1162_v14 = vstv %s6900_s4  ;;  %s6909_s4 = sld [smem:[#allocation33_spill]] }
 0x1b8   : >> { %1456 = vrot.lane.b32.xlu1 %v1452_v18, %s6600_s11  ;;  %1454 = vrot.lane.b32.xlu0 %v1453_v23, %s6600_s11  ;;  %v1573_v18 = vrot.slane %v1569_v0, 1  ;;  %v1563_v23 = vsel %vm840_vm6, %v1561_v4, %v1562_v5  ;;  %v863_v61 = vsel %vm840_vm6, %v861_v40, %v862_v41  ;;  %v5269_v0 = vmul.f32 %v5216_v29, %v1627_v50 }
 0x1b9   : >> { %v5279_v5 = vmul.f32 %v5190_v10, %v1627_v50  ;;  %v866_v16 = vadd.f32 %v863_v61, %v826_v57  ;;  %v6598_v50 = vrot.slane %v5287_v12, 1  ;;  %v796_v57 = vstv %s6904_s7  ;;  %s6912_s7 = sld [smem:[#allocation129_spill]] }
 0x1bb   : >> { %v893_v56 = vadd.f32 %v891_v9, %v866_v16 }
 0x1bc   : >> { %1472 = vrot.lane.b32.xlu1 %v1470_v31, %s6600_s11  ;;  %1465 = vrot.lane.b32.xlu0 %v1463_v39, %s6600_s11  ;;  %v5219_v31 = vld [vmem:[%s5003_s24 + $0xa8] sm:$0xff]  ;;  %v1673_v39 = vstv %s6892_s6  ;;  %s6901_s6 = sld [smem:[#allocation43_spill]] }
 0x1bd   : >> { %v5250_v55 = vmul.f32 %v5219_v31, %v1673_v39  ;;  %v780_v1 = vstv %s6909_s4  ;;  %s6916_s4 = smov 127  }
 0x1c0   : >> { %1483 = vrot.lane.b32.xlu1 %v1478_v43, %s6600_s11  ;;  %1481 = vrot.lane.b32.xlu0 %v1477_v45, %s6600_s11  ;;  %v5234_v43 = vsel %vm840_vm6, %v1573_v18, %v1574_v17  ;;  %v1589_v45 = vrot.slane %v1585_v19, 1  ;;  %v5294_v19 = vmul.f32 %v5219_v31, %v1664_v2  ;;  %v6596_v2 = vstv %s6905_s9 }
 0x1c2   : >> { %v1591_v4 = vsel %vm840_vm6, %v1589_v45, %v1590_v48  ;;  %v1026_v38 = vstv %s6901_s6  ;;  %v1163_v45 = vmul.f32 %v5219_v31, %v1162_v14  ;;  %s6910_s6 = sld [smem:[#allocation125_spill]] }
 0x1c3   : >> { %v5315_v61 = vmul.f32 %v5149_v34, %v1026_v38 }
 0x1c4   : >> { %1496 = vrot.lane.b32.xlu1 %v1491_v46, %s6600_s11  ;;  %1494 = vrot.lane.b32.xlu0 %v1490_v58, %s6600_s11  ;;  %v1706_v46 = vstv %s6893_s8  ;;  %s6902_s8 = sld [smem:[#allocation85_spill]]  ;;  %v1167_v16 = vrot.slane %v1163_v45, 1 }
 0x1c5   : >> { %v1707_v58 = vmul.f32 %v5219_v31, %v1706_v46  ;;  %v5259_v60 = vmul.f32 %v5237_v47, %v1706_v46  ;;  %v5306_v46 = vmul.f32 %v5237_v47, %v1162_v14  ;;  %v5329_v14 = vmul.f32 %v5219_v31, %v1128_v51 }
 0x1c7   : >> { %v1711_v28 = vrot.slane %v1707_v58, 1  ;;  %6907 = vst [vmem:[#allocation242_spill] sm:$0xff] %v5306_v46  ;;  %v6603_v38 = vrot.slane %v5306_v46, 1  ;;  %v798_v58 = vmul.f32 %v796_v57, %v5009_v36 }
 0x1c8   : >> { %1522 = vrot.lane.b32.xlu1 %v1521_v7, %s6600_s11  ;;  %1510 = vrot.lane.b32.xlu0 %v1509_v21, %s6600_s11  ;;  %v1060_v7 = vstv %s6899_s3  ;;  %v6595_v21 = vrot.slane %v5259_v60, 1  ;;  %s6908_s3 = sld [smem:[#allocation37_spill]] }
 0x1c9   : >> { %v1061_v39 = vmul.f32 %v5149_v34, %v1060_v7  ;;  %v5367_v18 = vsel %vm840_vm6, %v1167_v16, %v6603_v38 }
 0x1ca   : >> { %v6597_v40 = vstv %s6902_s8 }
 0x1cb   : >> { %v993_v9 = vmul.f32 %v5131_v20, %v6597_v40  ;;  %v788_v40 = vmul.f32 %v786_v13, %v5009_v36  ;;  %v938_v13 = vstv %s6911_s2  ;;  %s6920_s2 = sld [smem:[#allocation91_spill]] }
 0x1cc   : >> { %1539 = vrot.lane.b32.xlu1 %v1538_v8, %s6600_s11  ;;  %1530 = vrot.lane.b32.xlu0 %v1529_v22, %s6600_s11  ;;  %v5301_v8 = vmul.f32 %v5152_v37, %v1060_v7  ;;  %v963_v22 = vrot.slane %v959_v6, 1  ;;  %v835_v6 = vstv %s6906_s16  ;;  %v5322_v7 = vsel %vm840_vm6, %v1711_v28, %v6595_v21  ;;  %s6913_s16 = sld [smem:[#allocation87_spill]] }
 0x1cd   : >> { %v5339_v21 = vmul.f32 %v5190_v10, %v6596_v2  ;;  %v836_v51 = vmul.f32 %v5032_v53, %v835_v6  ;;  %v797_v2 = vmul.f32 %v796_v57, %v5006_v35  ;;  %v803_v57 = vrot.slane %v798_v58, 2 }
 0x1ce   : >> { %v965_v28 = vsel %vm840_vm6, %v963_v22, %v6598_v50  ;;  %v884_v45 = vstv %s6908_s3  ;;  %v900_v50 = vstv %s6910_s6  ;;  %s6914_s3 = sld [smem:[#allocation41_spill]]  ;;  %v827_v58 = vadd.f32 %v824_v32, %v788_v40  ;;  %s6917_s6 = sld [smem:[#allocation151_spill]] }
 0x1cf   : >> { %v841_v22 = vrot.slane %v836_v51, 1  ;;  %v802_v38 = vrot.slane %v797_v2, 2  ;;  %v939_v51 = vmul.f32 %v5093_v44, %v938_v13  ;;  %v781_v32 = vmul.f32 %v780_v1, %v5006_v35 }
 0x1d0   : >> { %1564 = vrot.lane.b32.xlu1 %v1563_v23, %s6600_s11  ;;  %1552 = vrot.lane.b32.xlu0 %v1551_v42, %s6600_s11  ;;  %v1065_v23 = vrot.slane %v1061_v39, 1  ;;  %v6602_v42 = vrot.slane %v5301_v8, 1  ;;  %v929_v39 = vadd.f32 %v6599_v33, %v893_v56 }
 0x1d2   : >> { %v5358_v56 = vsel %vm840_vm6, %v1065_v23, %v6602_v42  ;;  %v968_v33 = vadd.f32 %v965_v28, %v929_v39  ;;  %v5371_v23 = vmul.f32 %v5068_v25, %v884_v45  ;;  %v1002_v42 = vstv %s6912_s7  ;;  %s6922_s7 = sld [smem:[#allocation80_spill]] }
 0x1d3   : >> { %v1040_v16 = vstv %s6913_s16  ;;  %v902_v39 = vmul.f32 %v5077_v30, %v900_v50  ;;  %v1003_v24 = vmul.f32 %v5131_v20, %v1002_v42  ;;  %s6923_s16 = sld [smem:[#allocation126_spill]] }
 0x1d4   : >> { %1578 = vrot.lane.b32.xlu1 %v1574_v17, %s6600_s11  ;;  %1576 = vrot.lane.b32.xlu0 %v5234_v43, %s6600_s11  ;;  %v837_v17 = vmul.f32 %v5036_v59, %v835_v6  ;;  %s6915_s11 = sld [smem:[#allocation133_spill]]  ;;  %v901_v6 = vmul.f32 %v5068_v25, %v900_v50  ;;  %v986_v45 = vstv %s6914_s3  ;;  %v940_v43 = vmul.f32 %v5101_v52, %v938_v13  ;;  %s6924_s3 = sld [smem:[#allocation122_spill]] }
 0x1d5   : >> { %v995_v62 = vadd.f32 %v993_v9, %v968_v33  ;;  %v1041_v2 = vmul.f32 %v5149_v34, %v1040_v16  ;;  %v1042_v11 = vmul.f32 %v5152_v37, %v1040_v16  ;;  %v804_v50 = vsel %vm801_vm5, %v802_v38, %v803_v57 }
 0x1d6   : >> { %v842_v28 = vrot.slane %v837_v17, 1  ;;  %v905_v40 = vrot.slane %v901_v6, 2  ;;  %v6918_v33 = vstv %s6897_s14  ;;  %v906_v17 = vrot.slane %v902_v39, 2 }
 0x1d7   : >> { %v892_v9 = vmul.f32 %v5077_v30, %v6918_v33  ;;  %v943_v13 = vrot.slane %v939_v51, 1  ;;  %v944_v16 = vrot.slane %v940_v43, 1  ;;  %v1007_v46 = vrot.slane %v1003_v24, 2 }
 0x1d8   : >> { %1594 = vrot.lane.b32.xlu1 %v1590_v48, %s6916_s4  ;;  %1592 = vrot.lane.b32.xlu0 %v1591_v4, %s6916_s4  ;;  %v1004_v48 = vmul.f32 %v5141_v27, %v1002_v42  ;;  %v867_v42 = vadd.f32 %v862_v41, %v827_v58  ;;  %v1722_v6 = vstv %s6917_s6  ;;  %v843_v38 = vsel %vm840_vm6, %v841_v22, %v842_v28  ;;  %s6925_s6 = sld [smem:[#allocation149_spill]] }
 0x1d9   : >> { %v1045_v57 = vrot.slane %v1041_v2, 1  ;;  %v1046_v15 = vrot.slane %v1042_v11, 1  ;;  %v806_v41 = vadd.f32 %v804_v50, %v781_v32  ;;  %v6921_v58 = vrot.slane %v5315_v61, 7 }
 0x1da   : >> { %v1104_v4 = vstv %s6915_s11  ;;  %s6919_s11 = sld [smem:[#allocation45_spill]]  ;;  %v1142_v43 = vstv %s6920_s2  ;;  %v894_v24 = vadd.f32 %v892_v9, %v867_v42  ;;  %v1723_v22 = vmul.f32 %v5219_v31, %v1722_v6  ;;  %s6928_s2 = sld [smem:[#allocation84_spill]] }
 0x1db   : >> { %v1105_v1 = vmul.f32 %v5190_v10, %v1104_v4  ;;  %v1031_v39 = vadd.f32 %v6921_v58, %v995_v62  ;;  %v5416_v28 = vmul.f32 %v5237_v47, %v1722_v6  ;;  %v945_v2 = vsel %vm840_vm6, %v943_v13, %v944_v16 }
 0x1dc   : >> { %1610 = vrot.lane.b32.xlu1 %v5212_v26, %s6916_s4  ;;  %1603 = vrot.lane.b32.xlu0 %v5242_v49, %s6916_s4  ;;  %v1106_v26 = vmul.f32 %v5216_v29, %v1104_v4  ;;  %v1008_v49 = vrot.slane %v1004_v48, 2  ;;  %v5427_v11 = vsel %vm840_vm6, %v1045_v57, %v1046_v15  ;;  %v845_v50 = vadd.f32 %v843_v38, %v806_v41 }
 0x1dd   : >> { %v1109_v48 = vrot.slane %v1105_v1, 2  ;;  %v846_v42 = vstv %s6922_s7  ;;  %v910_v9 = vstv %s6923_s16  ;;  %v807_v1 = vstv %s6924_s3  ;;  %s6933_s7 = sld [smem:[#allocation38_spill]]  ;;  %s6934_s16 = sld [smem:[#allocation42_spill]] }
 0x1de   : >> { %v1110_v4 = vrot.slane %v1106_v26, 2  ;;  %v5424_v62 = vsel %vm801_vm5, %v1007_v46, %v1008_v49  ;;  %v5441_v46 = vmul.f32 %v5237_v47, %v1142_v43  ;;  %v847_v26 = vmul.f32 %v5032_v53, %v846_v42  ;;  %s6935_s3 = sld [smem:[#allocation34_spill]] }
 0x1df   : >> { %v1652_v16 = vstv %s6925_s6  ;;  %v886_v6 = vadd.f32 %v5371_v23, %v845_v50  ;;  %v911_v38 = vmul.f32 %v5068_v25, %v910_v9  ;;  %v6929_v57 = vrot.slane %v5250_v55, 7  ;;  %s6937_s6 = sld [smem:[#allocation130_spill]] }
 0x1e0   : >> { %1621 = vrot.lane.b32.xlu1 %v5247_v54, %s6916_s4  ;;  %1619 = vrot.lane.b32.xlu0 %v5266_v63, %s6916_s4  ;;  %v1088_v51 = vstv %s6919_s11  ;;  %v907_v54 = vsel %vm801_vm5, %v905_v40, %v906_v17  ;;  %v5421_v63 = vmul.f32 %v5131_v20, %v986_v45  ;;  %s6926_s11 = sld [smem:[#allocation148_spill]]  ;;  %v5438_v45 = vmul.f32 %v5219_v31, %v1142_v43 }
 0x1e1   : >> { %v5430_v32 = vmul.f32 %v5190_v10, %v1088_v51  ;;  %v6927_v40 = vrot.slane %v5273_v3, 7  ;;  %v1070_v17 = vadd.f32 %v5358_v56, %v1031_v39  ;;  %v5448_v13 = vsel %vm801_vm5, %v1109_v48, %v1110_v4 }
 0x1e2   : >> { %v848_v3 = vmul.f32 %v5036_v59, %v846_v42  ;;  %v912_v56 = vmul.f32 %v5077_v30, %v910_v9  ;;  %v6930_v15 = vrot.slane %v5294_v19, 7  ;;  %v6931_v58 = vrot.slane %v5287_v12, 1 }
 0x1e3   : >> { %v930_v33 = vadd.f32 %v6927_v40, %v894_v24  ;;  %v6932_v23 = vstv %s6902_s8  ;;  %v948_v43 = vstv %s6928_s2  ;;  %v1653_v24 = vmul.f32 %v5190_v10, %v1652_v16  ;;  %s6942_s2 = sld [smem:[#allocation104_spill]]  ;;  %s6947_s8 = sld [smem:[#allocation124_spill]] }
 0x1e4   : >> { %1634 = vrot.lane.b32.xlu1 %v5269_v0, %s6916_s4  ;;  %1632 = vrot.lane.b32.xlu0 %v5279_v5, %s6916_s4  ;;  %v1728_v0 = vrot.slane %v5416_v28, 1  ;;  %v1727_v5 = vrot.slane %v1723_v22, 1  ;;  %v994_v51 = vmul.f32 %v5141_v27, %v6932_v23  ;;  %v1654_v48 = vmul.f32 %v5216_v29, %v1652_v16 }
 0x1e5   : >> { %v969_v39 = vadd.f32 %v6931_v58, %v930_v33  ;;  %v5477_v4 = vadd.f32 %v5339_v21, %v1070_v17  ;;  %v5481_v22 = vmul.f32 %v807_v1, %v5009_v36  ;;  %v851_v28 = vrot.slane %v847_v26, 1 }
 0x1e6   : >> { %v1640_v49 = vstv %s6926_s11  ;;  %v1729_v12 = vsel %vm840_vm6, %v1727_v5, %v1728_v0  ;;  %v909_v50 = vadd.f32 %v907_v54, %v886_v6  ;;  %v852_v42 = vrot.slane %v848_v3, 1  ;;  %s6938_s11 = sld [smem:[#allocation105_spill]] }
 0x1e7   : >> { %v1641_v55 = vmul.f32 %v5190_v10, %v1640_v49  ;;  %v1642_v19 = vmul.f32 %v5216_v29, %v1640_v49  ;;  %v915_v40 = vrot.slane %v911_v38, 2  ;;  %v916_v33 = vrot.slane %v912_v56, 2 }
 0x1e8   : >> { %1677 = vrot.lane.b32.xlu1 %v6929_v57, %s6916_s4  ;;  %1668 = vrot.lane.b32.xlu0 %v6930_v15, %s6916_s4  ;;  %v6936_v9 = vrot.slane %v5259_v60, 1  ;;  %v996_v21 = vadd.f32 %v994_v51, %v969_v39  ;;  %v887_v17 = vstv %s6933_s7  ;;  %v949_v5 = vmul.f32 %v5093_v44, %v948_v43  ;;  %s6943_s7 = sld [smem:[#allocation88_spill]] }
 0x1e9   : >> { %v989_v16 = vstv %s6934_s16  ;;  %v1657_v49 = vrot.slane %v1653_v24, 2  ;;  %v1658_v26 = vrot.slane %v1654_v48, 2  ;;  %v1645_v54 = vrot.slane %v1641_v55, 2  ;;  %s6944_s16 = sld [smem:[#allocation103_spill]] }
 0x1ea   : >> { %v1646_v6 = vrot.slane %v1642_v19, 2  ;;  %v6941_v60 = vstv %s6905_s9  ;;  %v950_v15 = vmul.f32 %v5101_v52, %v948_v43  ;;  %v947_v58 = vadd.f32 %v945_v2, %v909_v50  ;;  %s6949_s9 = sld [smem:[#allocation106_spill]] }
 0x1eb   : >> { %v5498_v56 = vmul.f32 %v5216_v29, %v6941_v60  ;;  %v5504_v39 = vsel %vm840_vm6, %v851_v28, %v852_v42  ;;  %v5507_v23 = vmul.f32 %v5068_v25, %v887_v17  ;;  %v5510_v51 = vsel %vm801_vm5, %v915_v40, %v916_v33 }
 0x1ec   : >> { %1716 = vrot.lane.b32.xlu1 %v6936_v9, %s6916_s4  ;;  %1714 = vrot.lane.b32.xlu0 %v5322_v7, %s6916_s4  ;;  %v783_v7 = vstv %s6935_s3  ;;  %v953_v24 = vrot.slane %v949_v5, 1  ;;  %s6945_s3 = sld [smem:[#allocation36_spill]]  ;;  %v5515_v43 = vmul.f32 %v5131_v20, %v989_v16  ;;  %v1012_v2 = vstv %s6937_s6  ;;  %s6950_s6 = sld [smem:[#allocation78_spill]] }
 0x1ed   : >> { %v1752_v48 = vstv %s6938_s11  ;;  %v6946_v55 = vrot.slane %v5315_v61, 7  ;;  %v1659_v28 = vsel %vm801_vm5, %v1657_v49, %v1658_v26  ;;  %v1647_v50 = vsel %vm801_vm5, %v1645_v54, %v1646_v6  ;;  %s6954_s11 = sld [smem:[#allocation63_spill]] }
 0x1ee   : >> { %v5491_v3 = vpop.permute.xlu1 %1205  ;;  %v5493_v38 = vpop.permute.xlu0 %1189  ;;  %v1694_v42 = vstv %s6942_s2  ;;  %v808_v9 = vmul.f32 %v807_v1, %v5006_v35  ;;  %v988_v5 = vadd.f32 %v5421_v63, %v947_v58  ;;  %v5533_v61 = vmul.f32 %v5131_v20, %v1012_v2  ;;  %s6608_s2 = smov 126  }
 0x1ef   : >> { %6939 = vst [vmem:[#allocation243_spill] sm:$0xff] %v5491_v3  ;;  %6940 = vst [vmem:[#allocation244_spill] sm:$0xff] %v5493_v38  ;;  %v1032_v19 = vadd.f32 %v6946_v55, %v996_v21  ;;  %v1682_v17 = vstv %s6944_s16  ;;  %v1754_v16 = vmul.f32 %v1752_v48, %v5009_v36  ;;  %v868_v49 = vstv %s6947_s8  ;;  %s6952_s8 = sld [smem:[#allocation64_spill]]  ;;  %s6959_s16 = sld [smem:[#allocation154_spill]] }
 0x1f0   : >> { %1732 = vrot.lane.b32.xlu1 %v1728_v0, %s6916_s4  ;;  %1730 = vrot.lane.b32.xlu0 %v1729_v12, %s6916_s4  ;;  %v954_v0 = vrot.slane %v950_v15, 1  ;;  %v1050_v12 = vstv %s6943_s7  ;;  %v1753_v26 = vmul.f32 %v1752_v48, %v5006_v35  ;;  %v1695_v54 = vmul.f32 %v5219_v31, %v1694_v42  ;;  %s6958_s7 = sld [smem:[#allocation82_spill]] }
 0x1f1   : >> { %v1696_v1 = vmul.f32 %v5237_v47, %v1694_v42  ;;  %v5544_v63 = vmul.f32 %v5141_v27, %v1012_v2  ;;  %v1765_v6 = vstv %s6949_s9  ;;  %v1683_v60 = vmul.f32 %v5219_v31, %v1682_v17  ;;  %s6956_s9 = sld [smem:[#allocation46_spill]] }
 0x1f2   : >> { %v5524_v40 = vpop.permute.xlu1 %1207  ;;  %v5527_v33 = vpop.permute.xlu0 %1196  ;;  %v828_v21 = vstv %s6945_s3  ;;  %v1684_v15 = vmul.f32 %v5237_v47, %v1682_v17  ;;  %v6951_v58 = vrot.slane %v5301_v8, 1  ;;  %v5555_v48 = vmul.f32 %v5149_v34, %v1050_v12  ;;  %s6960_s3 = sld [smem:[#allocation40_spill]] }
 0x1f3   : >> { %6948 = vst [vmem:[#allocation245_spill] sm:$0xff] %v5524_v40  ;;  %v791_v41 = vstv %s6950_s6  ;;  %v829_v57 = vmul.f32 %v5032_v53, %v828_v21  ;;  %v870_v8 = vmul.f32 %v5036_v59, %v868_v49  ;;  %v1700_v17 = vrot.slane %v1696_v1, 1  ;;  %s6961_s6 = sld [smem:[#allocation128_spill]] }
 0x1f4   : >> { %1660 = vrot.lane.b32.xlu1 %v1659_v28, %s6916_s4  ;;  %1648 = vrot.lane.b32.xlu0 %v1647_v50, %s6916_s4  ;;  %v1071_v55 = vadd.f32 %v6951_v58, %v1032_v19  ;;  %v5552_v28 = vsel %vm840_vm6, %v953_v24, %v954_v0  ;;  %v812_v50 = vrot.slane %v808_v9, 2  ;;  %v869_v19 = vmul.f32 %v5032_v53, %v868_v49 }
 0x1f5   : >> { %v1767_v24 = vmul.f32 %v1765_v6, %v5009_v36  ;;  %v1766_v0 = vmul.f32 %v1765_v6, %v5006_v35  ;;  %v1699_v9 = vrot.slane %v1695_v54, 1  ;;  %v1687_v58 = vrot.slane %v1683_v60, 1 }
 0x1f6   : >> { %v5557_v42 = vpop.permute.xlu1 %1220  ;;  %v5559_v2 = vpop.permute.xlu0 %1218  ;;  %v1802_v21 = vstv %s6954_s11  ;;  %v5572_v40 = vadd.f32 %v5424_v62, %v988_v5  ;;  %v5575_v49 = vmul.f32 %v5152_v37, %v1050_v12  ;;  %v6957_v54 = vrot.slane %v5481_v22, 2  ;;  %s6963_s11 = sld [smem:[#allocation61_spill]] }
 0x1f7   : >> { %6953 = vst [vmem:[#allocation246_spill] sm:$0xff] %v5557_v42  ;;  %6955 = vst [vmem:[#allocation247_spill] sm:$0xff] %v5559_v2  ;;  %v1688_v2 = vrot.slane %v1684_v15, 1  ;;  %v1811_v42 = vstv %s6952_s8  ;;  %v793_v6 = vmul.f32 %v791_v41, %v5009_v36  ;;  %v831_v60 = vrot.slane %v829_v57, 7  ;;  %s6962_s8 = sld [smem:[#allocation62_spill]] }
 0x1f8   : >> { %1759 = vrot.lane.b32.xlu1 %v1754_v16, %s6608_s2  ;;  %1757 = vrot.lane.b32.xlu0 %v1753_v26, %s6608_s2  ;;  %v784_v16 = vmul.f32 %v783_v7, %v5006_v35  ;;  %v814_v1 = vsel %vm801_vm5, %v812_v50, %v6957_v54  ;;  %v792_v62 = vmul.f32 %v791_v41, %v5006_v35  ;;  %v874_v12 = vrot.slane %v870_v8, 1 }
 0x1f9   : >> { %v873_v5 = vrot.slane %v869_v19, 1  ;;  %v1812_v7 = vmul.f32 %v5032_v53, %v1811_v42  ;;  %v1803_v22 = vmul.f32 %v5032_v53, %v1802_v21  ;;  %v1701_v57 = vsel %vm840_vm6, %v1699_v9, %v1700_v17 }
 0x1fa   : >> { %v5579_v26 = vpop.permute.xlu1 %1246  ;;  %v5581_v3 = vpop.permute.xlu0 %1234  ;;  %v1689_v35 = vsel %vm840_vm6, %v1687_v58, %v1688_v2  ;;  %v5597_v41 = vadd.f32 %v5498_v56, %v1071_v55  ;;  %v816_v50 = vadd.f32 %v814_v1, %v784_v16  ;;  %v895_v8 = vstv %s6958_s7  ;;  %s6966_s7 = sld [smem:[#allocation134_spill]] }
 0x1fb   : >> { %v931_v21 = vstv %s6960_s3  ;;  %v970_v54 = vstv %s6961_s6  ;;  %v833_v15 = vadd.f32 %v831_v60, %v792_v62  ;;  %v875_v9 = vsel %vm840_vm6, %v873_v5, %v874_v12  ;;  %s6969_s3 = sld [smem:[#allocation86_spill]]  ;;  %s6970_s6 = sld [smem:[#allocation44_spill]] }
 0x1fc   : >> { %1772 = vrot.lane.b32.xlu1 %v1767_v24, %s6608_s2  ;;  %1770 = vrot.lane.b32.xlu0 %v1766_v0, %s6608_s2  ;;  %s6964_s2 = sld [smem:[#allocation155_spill]]  ;;  %v1844_v24 = vstv %s6959_s16  ;;  %v834_v0 = vadd.f32 %v831_v60, %v793_v6  ;;  %v1814_v56 = vrot.slane %v1812_v7, 7  ;;  %v1805_v55 = vrot.slane %v1803_v22, 7  ;;  %s6968_s16 = sld [smem:[#allocation152_spill]] }
 0x1fd   : >> { %v1745_v2 = vstv %s6962_s8  ;;  %v1738_v17 = vstv %s6963_s11  ;;  %v1845_v58 = vmul.f32 %v5032_v53, %v1844_v24  ;;  %v1846_v16 = vmul.f32 %v5036_v59, %v1844_v24  ;;  %s6971_s8 = sld [smem:[#allocation132_spill]] }
 0x1fe   : >> { %v5600_v19 = vpop.permute.xlu1 %1263  ;;  %v5602_v42 = vpop.permute.xlu0 %1254  ;;  %v855_v6 = vadd.f32 %v5504_v39, %v816_v50  ;;  %v897_v60 = vmul.f32 %v5077_v30, %v895_v8  ;;  %v932_v62 = vmul.f32 %v5093_v44, %v931_v21  ;;  %v5619_v5 = vmul.f32 %v5101_v52, %v970_v54  ;;  %v3839_v30 = vld [vmem:[%s5003_s24] sm:$0xff]  ;;  %s6972_s11 = sld [smem:[#allocation92_spill]] }
 0x1ff   : >> { %v879_v22 = vadd.f32 %v874_v12, %v834_v0  ;;  %v971_v24 = vmul.f32 %v5093_v44, %v970_v54  ;;  %v878_v36 = vadd.f32 %v875_v9, %v833_v15  ;;  %v1746_v52 = vmul.f32 %v3839_v30, %v1745_v2 }
 0x200   : >> { %1702 = vrot.lane.b32.xlu1 %v1701_v57, %s6916_s4  ;;  %1690 = vrot.lane.b32.xlu0 %v1689_v35, %s6916_s4  ;;  %s6965_s4 = sld [smem:[#allocation153_spill]]  ;;  %v896_v35 = vmul.f32 %v5068_v25, %v895_v8  ;;  %v1739_v50 = vmul.f32 %v3839_v30, %v1738_v17  ;;  %v1850_v38 = vrot.slane %v1846_v16, 1  ;;  %v1849_v12 = vrot.slane %v1845_v58, 1  ;;  %v3840_v58 = vld [vmem:[%s5003_s24 + $0x8] sm:$0x3] }
 0x201   : >> { %v1056_v44 = vrot.slane %v5575_v49, 1  ;;  %v1114_v15 = vstv %s6966_s7  ;;  %v889_v8 = vadd.f32 %v5507_v23, %v855_v6  ;;  %v934_v2 = vrot.slane %v932_v62, 7  ;;  %s6975_s7 = sld [smem:[#allocation108_spill]] }
 0x202   : >> { %v1860_v1 = vstv %s6964_s2  ;;  %v5621_v57 = vpop.permute.xlu1 %1288  ;;  %v5623_v7 = vpop.permute.xlu0 %1276  ;;  %s6967_s2 = smov 126   ;;  %v898_v17 = vadd.f32 %v896_v35, %v878_v36  ;;  %v5649_v36 = vadd.f32 %v5427_v11, %v5572_v40 }
 0x203   : >> { %v1862_v21 = vmul.f32 %v5036_v59, %v1860_v1  ;;  %v1861_v0 = vmul.f32 %v5032_v53, %v1860_v1  ;;  %v976_v59 = vrot.slane %v5619_v5, 1  ;;  %v975_v53 = vrot.slane %v971_v24, 1 }
 0x204   : >> { %1815 = vrot.lane.b32.xlu1 %v1814_v56, %s6967_s2  ;;  %1806 = vrot.lane.b32.xlu0 %v1805_v55, %s6967_s2  ;;  %v1778_v56 = vstv %s6968_s16  ;;  %v899_v55 = vadd.f32 %v897_v60, %v879_v22  ;;  %v1851_v1 = vsel %vm840_vm6, %v1849_v12, %v1850_v38  ;;  %v6973_v5 = vstv %s6956_s9  ;;  %s6978_s16 = sld [smem:[#allocation107_spill]] }
 0x205   : >> { %v1866_v49 = vrot.slane %v1862_v21, 1  ;;  %v1865_v6 = vrot.slane %v1861_v0, 1  ;;  %v1779_v60 = vmul.f32 %v3839_v30, %v1778_v56  ;;  %v1780_v62 = vmul.f32 %v3840_v58, %v1778_v56 }
 0x206   : >> { %v1790_v25 = vstv %s6965_s4  ;;  %v5637_v54 = vpop.permute.xlu1 %1302  ;;  %v5639_v9 = vpop.permute.xlu0 %1300  ;;  %v5654_v22 = vmul.f32 %v5190_v10, %v6973_v5  ;;  %v919_v35 = vadd.f32 %v5510_v51, %v889_v8  ;;  %v997_v24 = vstv %s6969_s3  ;;  %s6974_s4 = sld [smem:[#allocation109_spill]]  ;;  %s6980_s3 = sld [smem:[#allocation110_spill]] }
 0x207   : >> { %v1791_v23 = vmul.f32 %v3839_v30, %v1790_v25  ;;  %v1792_v16 = vmul.f32 %v3840_v58, %v1790_v25  ;;  %v937_v21 = vadd.f32 %v934_v2, %v899_v55  ;;  %v1033_v12 = vstv %s6970_s6  ;;  %s6981_s6 = sld [smem:[#allocation90_spill]] }
 0x208   : >> { %1748 = vrot.lane.b32.xlu1 %v1746_v52, %s6967_s2  ;;  %1741 = vrot.lane.b32.xlu0 %v1739_v50, %s6967_s2  ;;  %v1072_v0 = vstv %s6971_s8  ;;  %v936_v30 = vadd.f32 %v934_v2, %v898_v17  ;;  %v5665_v25 = vmul.f32 %v5190_v10, %v1114_v15  ;;  %v1152_v11 = vstv %s6972_s11  ;;  %s6982_s8 = sld [smem:[#allocation48_spill]] }
 0x209   : >> { %v977_v40 = vsel %vm840_vm6, %v975_v53, %v976_v59  ;;  %v1795_v51 = vrot.slane %v1791_v23, 2  ;;  %v1867_v8 = vsel %vm840_vm6, %v1865_v6, %v1866_v49  ;;  %v1796_v56 = vrot.slane %v1792_v16, 2  ;;  %s6983_s11 = sld [smem:[#allocation136_spill]] }
 0x20a   : >> { %v5658_v52 = vpop.permute.xlu1 %1318  ;;  %v5660_v50 = vpop.permute.xlu0 %1316  ;;  %v1783_v58 = vrot.slane %v1779_v60, 2  ;;  %v1784_v5 = vrot.slane %v1780_v62, 2  ;;  %v957_v55 = vadd.f32 %v5552_v28, %v919_v35  ;;  %v999_v2 = vmul.f32 %v5141_v27, %v997_v24 }
 0x20b   : >> { %v1034_v17 = vmul.f32 %v5149_v34, %v1033_v12  ;;  %v5676_v39 = vmul.f32 %v5152_v37, %v1072_v0  ;;  %v981_v23 = vadd.f32 %v976_v59, %v937_v21  ;;  %v998_v16 = vmul.f32 %v5131_v20, %v997_v24 }
 0x20c   : >> { %1854 = vrot.lane.b32.xlu1 %v1850_v38, %s6967_s2  ;;  %1852 = vrot.lane.b32.xlu0 %v1851_v1, %s6967_s2  ;;  %v1073_v1 = vmul.f32 %v5149_v34, %v1072_v0  ;;  %v980_v6 = vadd.f32 %v977_v40, %v936_v30  ;;  %v6976_v28 = vrot.slane %v5544_v63, 2  ;;  %v6977_v27 = vrot.slane %v5533_v61, 2 }
 0x20d   : >> { %v6979_v37 = vrot.slane %v5555_v48, 1  ;;  %v5693_v35 = vmul.f32 %v5216_v29, %v1114_v15  ;;  %v1797_v20 = vsel %vm801_vm5, %v1795_v51, %v1796_v56  ;;  %v1785_v34 = vsel %vm801_vm5, %v1783_v58, %v1784_v5  ;;  %v5720_v56 = vld [vmem:[%s5003_s24 + $0x30] sm:$0xff] }
 0x20e   : >> { %v5678_v38 = vpop.permute.xlu1 %1334  ;;  %v5680_v53 = vpop.permute.xlu0 %1327  ;;  %v1019_v60 = vsel %vm801_vm5, %v6977_v27, %v6976_v28  ;;  %v1890_v61 = vstv %s6974_s4  ;;  %v1832_v63 = vstv %s6975_s7  ;;  %v5703_v48 = vmul.f32 %v5219_v31, %v1152_v11  ;;  %s6984_s4 = sld [smem:[#allocation68_spill]]  ;;  %s6985_s7 = sld [smem:[#allocation67_spill]] }
 0x20f   : >> { %v1057_v62 = vsel %vm840_vm6, %v6979_v37, %v1056_v44  ;;  %v991_v44 = vadd.f32 %v5515_v43, %v957_v55  ;;  %v1036_v15 = vrot.slane %v1034_v17, 7  ;;  %v1820_v21 = vstv %s6978_s16  ;;  %v5716_v43 = vld [vmem:[%s5003_s24 + $0x38] sm:$0x3]  ;;  %s6988_s16 = sld [smem:[#allocation158_spill]] }
 0x210   : >> { %1870 = vrot.lane.b32.xlu1 %v1866_v49, %s6967_s2  ;;  %1868 = vrot.lane.b32.xlu0 %v1867_v8, %s6967_s2  ;;  %v1001_v12 = vadd.f32 %v999_v2, %v981_v23  ;;  %v1078_v0 = vrot.slane %v5676_v39, 1  ;;  %v1077_v30 = vrot.slane %v1073_v1, 1  ;;  %v1000_v40 = vadd.f32 %v998_v16, %v980_v6  ;;  %v3843_v39 = vld [vmem:[%s5003_s24 + $0x18] sm:$0xff]  ;;  %v3844_v2 = vld [vmem:[%s5003_s24 + $0x20] sm:$0x3] }
 0x211   : >> { %v1120_v51 = vrot.slane %v5693_v35, 2  ;;  %v1892_v8 = vmul.f32 %v5716_v43, %v1890_v61  ;;  %v1891_v58 = vmul.f32 %v5720_v56, %v1890_v61  ;;  %v1833_v5 = vmul.f32 %v3843_v39, %v1832_v63 }
 0x212   : >> { %v5706_v24 = vpop.permute.xlu1 %1345  ;;  %v5708_v49 = vpop.permute.xlu0 %1343  ;;  %v1903_v55 = vstv %s6980_s3  ;;  %v1834_v17 = vmul.f32 %v3844_v2, %v1832_v63  ;;  %v1821_v23 = vmul.f32 %v3843_v39, %v1820_v21  ;;  %v1822_v16 = vmul.f32 %v3844_v2, %v1820_v21  ;;  %s6990_s3 = sld [smem:[#allocation66_spill]] }
 0x213   : >> { %v5727_v1 = vmul.f32 %v5237_v47, %v1152_v11  ;;  %v1021_v6 = vadd.f32 %v1019_v60, %v991_v44  ;;  %v1099_v28 = vstv %s6981_s6  ;;  %v1135_v27 = vstv %s6982_s8  ;;  %s6991_s6 = sld [smem:[#allocation65_spill]]  ;;  %s6992_s8 = sld [smem:[#allocation159_spill]] }
 0x214   : >> { %1798 = vrot.lane.b32.xlu1 %v1797_v20, %s6967_s2  ;;  %1786 = vrot.lane.b32.xlu0 %v1785_v34, %s6967_s2  ;;  %v1039_v20 = vadd.f32 %v1036_v15, %v1001_v12  ;;  %v1174_v34 = vstv %s6983_s11  ;;  %v1079_v61 = vsel %vm840_vm6, %v1077_v30, %v1078_v0  ;;  %v1038_v59 = vadd.f32 %v1036_v15, %v1000_v40  ;;  %s6996_s11 = sld [smem:[#allocation157_spill]] }
 0x215   : >> { %v1905_v11 = vmul.f32 %v5716_v43, %v1903_v55  ;;  %v1904_v60 = vmul.f32 %v5720_v56, %v1903_v55  ;;  %v1837_v63 = vrot.slane %v1833_v5, 1  ;;  %v1949_v44 = vstv %s6984_s4  ;;  %s6997_s4 = sld [smem:[#allocation156_spill]] }
 0x216   : >> { %v5731_v37 = vpop.permute.xlu1 %1358  ;;  %v5733_v35 = vpop.permute.xlu0 %1356  ;;  %v1838_v21 = vrot.slane %v1834_v17, 1  ;;  %v1825_v39 = vrot.slane %v1821_v23, 1  ;;  %v1826_v2 = vrot.slane %v1822_v16, 1  ;;  %v1059_v12 = vadd.f32 %v1057_v62, %v1021_v6 }
 0x217   : >> { %6986 = vst [vmem:[#allocation248_spill] sm:$0xff] %v5731_v37  ;;  %6987 = vst [vmem:[#allocation249_spill] sm:$0xff] %v5733_v35  ;;  %v1940_v35 = vstv %s6985_s7  ;;  %v1101_v37 = vmul.f32 %v5216_v29, %v1099_v28  ;;  %v1136_v15 = vmul.f32 %v5219_v31, %v1135_v27  ;;  %v5746_v30 = vmul.f32 %v5237_v47, %v1174_v34  ;;  %v5760_v47 = vld [vmem:[%s5003_s24 + $0x48] sm:$0xff]  ;;  %s7004_s7 = sld [smem:[#allocation112_spill]] }
 0x218   : >> { %1897 = vrot.lane.b32.xlu1 %v1892_v8, %s6967_s2  ;;  %1895 = vrot.lane.b32.xlu0 %v1891_v58, %s6967_s2  ;;  %v1083_v58 = vadd.f32 %v1078_v0, %v1039_v20  ;;  %v1100_v5 = vmul.f32 %v5190_v10, %v1099_v28  ;;  %v1175_v55 = vmul.f32 %v5219_v31, %v1174_v34  ;;  %v1148_v23 = vrot.slane %v5441_v46, 1 }
 0x219   : >> { %v1082_v17 = vadd.f32 %v1079_v61, %v1038_v59  ;;  %v1090_v29 = vadd.f32 %v5430_v32, %v5649_v36  ;;  %v1950_v62 = vmul.f32 %v5760_v47, %v1949_v44  ;;  %v1941_v0 = vmul.f32 %v5760_v47, %v1940_v35  ;;  %v5787_v44 = vld [vmem:[%s5003_s24 + $0x50] sm:$0x3] }
 0x21a   : >> { %v5748_v40 = vpop.permute.xlu1 %1384  ;;  %v5750_v8 = vpop.permute.xlu0 %1372  ;;  %v6989_v10 = vrot.slane %v5665_v25, 2  ;;  %v1157_v46 = vrot.slane %v5703_v48, 1  ;;  %v1839_v59 = vsel %vm840_vm6, %v1837_v63, %v1838_v21  ;;  %v1827_v32 = vsel %vm840_vm6, %v1825_v39, %v1826_v2 }
 0x21b   : >> { %v1158_v36 = vrot.slane %v5727_v1, 1  ;;  %v1093_v16 = vadd.f32 %v5654_v22, %v1059_v12  ;;  %v1138_v6 = vrot.slane %v1136_v15, 7  ;;  %v1982_v25 = vstv %s6988_s16  ;;  %s7006_s16 = sld [smem:[#allocation113_spill]] }
 0x21c   : >> { %1910 = vrot.lane.b32.xlu1 %v1905_v11, %s6967_s2  ;;  %1908 = vrot.lane.b32.xlu0 %v1904_v60, %s6967_s2  ;;  %v1121_v31 = vsel %vm801_vm5, %v6989_v10, %v1120_v51  ;;  %v1103_v51 = vadd.f32 %v1101_v37, %v1083_v58  ;;  %v1180_v48 = vrot.slane %v5746_v30, 1  ;;  %v1179_v35 = vrot.slane %v1175_v55, 1 }
 0x21d   : >> { %v1102_v20 = vadd.f32 %v1100_v5, %v1082_v17  ;;  %v6993_v34 = vrot.slane %v5438_v45, 1  ;;  %v1952_v22 = vrot.slane %v1950_v62, 7  ;;  %v1943_v61 = vrot.slane %v1941_v0, 7 }
 0x21e   : >> { %v5772_v28 = vpop.permute.xlu1 %1401  ;;  %v5774_v27 = vpop.permute.xlu0 %1392  ;;  %v1883_v11 = vstv %s6990_s3  ;;  %v1876_v60 = vstv %s6991_s6  ;;  %v1983_v63 = vmul.f32 %v5760_v47, %v1982_v25  ;;  %v1984_v37 = vmul.f32 %v5787_v44, %v1982_v25  ;;  %s7007_s3 = sld [smem:[#allocation114_spill]]  ;;  %s7008_s6 = sld [smem:[#allocation111_spill]] }
 0x21f   : >> { %v1149_v1 = vsel %vm840_vm6, %v6993_v34, %v1148_v23  ;;  %v1998_v21 = vstv %s6992_s8  ;;  %v6994_v45 = vrot.slane %v5329_v14, 7  ;;  %v1113_v2 = vadd.f32 %v5448_v13, %v1090_v29  ;;  %s7009_s8 = sld [smem:[#allocation72_spill]] }
 0x220   : >> { %1840 = vrot.lane.b32.xlu1 %v1839_v59, %s6967_s2  ;;  %1828 = vrot.lane.b32.xlu0 %v1827_v32, %s6967_s2  ;;  %v1123_v30 = vadd.f32 %v1121_v31, %v1093_v16  ;;  %v1159_v55 = vsel %vm840_vm6, %v1157_v46, %v1158_v36  ;;  %v1141_v17 = vadd.f32 %v1138_v6, %v1103_v51  ;;  %v1987_v29 = vrot.slane %v1983_v63, 1 }
 0x221   : >> { %v1133_v39 = vadd.f32 %v6994_v45, %v5477_v4  ;;  %v6995_v12 = vmov %v6994_v45  ;;  %v1181_v23 = vsel %vm840_vm6, %v1179_v35, %v1180_v48  ;;  %v1140_v62 = vadd.f32 %v1138_v6, %v1102_v20  ;;  %v6998_v6 = vld [vmem:[#allocation242_spill] sm:$0xff] }
 0x222   : >> { %v1134_v15 = vadd.f32 %v6995_v12, %v5597_v41  ;;  %v5798_v58 = vpop.permute.xlu1 %1426  ;;  %v5800_v5 = vpop.permute.xlu0 %1414  ;;  %v1884_v14 = vmul.f32 %v5720_v56, %v1883_v11  ;;  %v1877_v13 = vmul.f32 %v5720_v56, %v1876_v60  ;;  %v2000_v4 = vmul.f32 %v5787_v44, %v1998_v21  ;;  %v7002_v12 = vld [vmem:[#allocation245_spill] sm:$0xff] }
 0x223   : >> { %v1988_v41 = vrot.slane %v1984_v37, 1  ;;  %v1999_v0 = vmul.f32 %v5760_v47, %v1998_v21  ;;  %v1928_v10 = vstv %s6996_s11  ;;  %v1161_v31 = vadd.f32 %v1159_v55, %v1123_v30  ;;  %v7000_v21 = vld [vmem:[#allocation243_spill] sm:$0xff]  ;;  %v7003_v30 = vld [vmem:[#allocation246_spill] sm:$0xff]  ;;  %s7010_s11 = sld [smem:[#allocation71_spill]] }
 0x224   : >> { %1953 = vrot.lane.b32.xlu1 %v1952_v22, %s6967_s2  ;;  %1944 = vrot.lane.b32.xlu0 %v1943_v61, %s6967_s2  ;;  %v1916_v32 = vstv %s6997_s4  ;;  %v1172_v36 = vadd.f32 %v5367_v18, %v1133_v39  ;;  %v1151_v16 = vadd.f32 %v1149_v1, %v1113_v2  ;;  %v6999_v25 = vrot.slane %v6998_v6, 1  ;;  %v7001_v39 = vld [vmem:[#allocation244_spill] sm:$0xff]  ;;  %s7013_s4 = sld [smem:[#allocation162_spill]] }
 0x225   : >> { %v1185_v35 = vadd.f32 %v1180_v48, %v1141_v17  ;;  %v1184_v20 = vadd.f32 %v1181_v23, %v1140_v62  ;;  %v2004_v34 = vrot.slane %v2000_v4, 1  ;;  %v1929_v22 = vmul.f32 %v5720_v56, %v1928_v10  ;;  %v7005_v17 = vld [vmem:[#allocation247_spill] sm:$0xff] }
 0x226   : >> { %v5811_v46 = vpop.permute.xlu1 %1440  ;;  %v5813_v59 = vpop.permute.xlu0 %1438  ;;  %v1173_v51 = vadd.f32 %v6999_v25, %v1134_v15  ;;  %v1930_v61 = vmul.f32 %v5716_v43, %v1928_v10  ;;  %v1989_v11 = vsel %vm840_vm6, %v1987_v29, %v1988_v41  ;;  %v2003_v60 = vrot.slane %v1999_v0, 1 }
 0x227   : >> { %v1917_v18 = vmul.f32 %v5720_v56, %v1916_v32  ;;  %v1918_v1 = vmul.f32 %v5716_v43, %v1916_v32  ;;  %v1199_v63 = vadd.f32 %v5527_v33, %v1161_v31  ;;  %v1211_v45 = vadd.f32 %v7000_v21, %v1172_v36 }
 0x228   : >> { %1886 = vrot.lane.b32.xlu1 %v1884_v14, %s6967_s2  ;;  %1879 = vrot.lane.b32.xlu0 %v1877_v13, %s6967_s2  ;;  %v1192_v2 = vadd.f32 %v7001_v39, %v1151_v16  ;;  %v1212_v15 = vadd.f32 %v7002_v12, %v1173_v51  ;;  %v1225_v55 = vadd.f32 %v7003_v30, %v1185_v35  ;;  %v1933_v33 = vrot.slane %v1929_v22, 2 }
 0x229   : >> { %v1224_v23 = vadd.f32 %v7005_v17, %v1184_v20  ;;  %v1249_v56 = vadd.f32 %v5579_v26, %v1199_v63  ;;  %v2005_v43 = vsel %vm840_vm6, %v2003_v60, %v2004_v34  ;;  %v1934_v62 = vrot.slane %v1930_v61, 2  ;;  %v5860_v61 = vld [vmem:[%s5003_s24 + $0x68] sm:$0x3] }
 0x22a   : >> { %v5827_v48 = vpop.permute.xlu1 %1456  ;;  %v5829_v37 = vpop.permute.xlu0 %1454  ;;  %v1921_v14 = vrot.slane %v1917_v18, 2  ;;  %v1922_v13 = vrot.slane %v1918_v1, 2  ;;  %v1237_v4 = vadd.f32 %v5581_v3, %v1192_v2  ;;  %v1257_v29 = vadd.f32 %v5602_v42, %v1211_v45 }
 0x22b   : >> { %v1258_v0 = vadd.f32 %v5602_v42, %v1212_v15  ;;  %v1266_v31 = vadd.f32 %v5600_v19, %v1224_v23  ;;  %v1267_v32 = vadd.f32 %v5600_v19, %v1225_v55  ;;  %v1291_v36 = vadd.f32 %v5621_v57, %v1249_v56  ;;  %v7011_v23 = vld [vmem:[#allocation248_spill] sm:$0xff] }
 0x22c   : >> { %1992 = vrot.lane.b32.xlu1 %v1988_v41, %s6967_s2  ;;  %1990 = vrot.lane.b32.xlu0 %v1989_v11, %s6967_s2  ;;  %v1970_v41 = vstv %s7004_s7  ;;  %v2028_v16 = vstv %s7006_s16  ;;  %v1279_v6 = vadd.f32 %v5623_v7, %v1237_v4  ;;  %v1306_v25 = vadd.f32 %v5639_v9, %v1257_v29  ;;  %s7014_s7 = sld [smem:[#allocation70_spill]]  ;;  %s7015_s16 = sld [smem:[#allocation69_spill]] }
 0x22d   : >> { %v1307_v3 = vadd.f32 %v5637_v54, %v1258_v0  ;;  %v2041_v42 = vstv %s7007_s3  ;;  %v1935_v51 = vsel %vm801_vm5, %v1933_v33, %v1934_v62  ;;  %v1923_v19 = vsel %vm801_vm5, %v1921_v14, %v1922_v13  ;;  %v5864_v9 = vld [vmem:[%s5003_s24 + $0x60] sm:$0xff]  ;;  %v7012_v33 = vld [vmem:[#allocation249_spill] sm:$0xff]  ;;  %s7016_s3 = sld [smem:[#allocation163_spill]] }
 0x22e   : >> { %v1473_v10 = vpop.permute.xlu1 %1472  ;;  %v1466_v26 = vpop.permute.xlu0 %1465  ;;  %v1971_v35 = vmul.f32 %v5760_v47, %v1970_v41  ;;  %v1958_v57 = vstv %s7008_s6  ;;  %v1323_v20 = vadd.f32 %v5658_v52, %v1267_v32  ;;  %v2030_v54 = vmul.f32 %v5860_v61, %v2028_v16  ;;  %s7017_s6 = sld [smem:[#allocation161_spill]] }
 0x22f   : >> { %v1972_v11 = vmul.f32 %v5787_v44, %v1970_v41  ;;  %v1322_v60 = vadd.f32 %v5660_v50, %v1266_v31  ;;  %v1337_v18 = vadd.f32 %v5678_v38, %v1291_v36  ;;  %v1330_v1 = vadd.f32 %v5680_v53, %v1279_v6 }
 0x230   : >> { %2008 = vrot.lane.b32.xlu1 %v2004_v34, %s6967_s2  ;;  %2006 = vrot.lane.b32.xlu0 %v2005_v43, %s6967_s2  ;;  %v2029_v34 = vmul.f32 %v5864_v9, %v2028_v16  ;;  %v2043_v52 = vmul.f32 %v5860_v61, %v2041_v42  ;;  %v2042_v63 = vmul.f32 %v5864_v9, %v2041_v42  ;;  %v1975_v38 = vrot.slane %v1971_v35, 1 }
 0x231   : >> { %v1959_v21 = vmul.f32 %v5760_v47, %v1958_v57  ;;  %v1960_v45 = vmul.f32 %v5787_v44, %v1958_v57  ;;  %v1387_v39 = vadd.f32 %v5748_v40, %v1337_v18  ;;  %v1375_v50 = vadd.f32 %v5750_v8, %v1330_v1 }
 0x232   : >> { %v1484_v22 = vpop.permute.xlu1 %1483  ;;  %v1482_v7 = vpop.permute.xlu0 %1481  ;;  %v2087_v2 = vstv %s7009_s8  ;;  %v1350_v53 = vadd.f32 %v5706_v24, %v1307_v3  ;;  %v1349_v12 = vadd.f32 %v5708_v49, %v1306_v25  ;;  %v1976_v55 = vrot.slane %v1972_v11, 1  ;;  %s7018_s8 = sld [smem:[#allocation160_spill]] }
 0x233   : >> { %v2078_v17 = vstv %s7010_s11  ;;  %v1363_v56 = vadd.f32 %v7011_v23, %v1323_v20  ;;  %v1362_v47 = vadd.f32 %v7012_v33, %v1322_v60  ;;  %v1429_v44 = vadd.f32 %v5798_v58, %v1387_v39  ;;  %s7019_s11 = sld [smem:[#allocation117_spill]] }
 0x234   : >> { %1936 = vrot.lane.b32.xlu1 %v1935_v51, %s6967_s2  ;;  %1924 = vrot.lane.b32.xlu0 %v1923_v19, %s6967_s2  ;;  %v1417_v40 = vadd.f32 %v5800_v5, %v1375_v50  ;;  %v1395_v8 = vadd.f32 %v5774_v27, %v1349_v12  ;;  %v1396_v43 = vadd.f32 %v5774_v27, %v1350_v53  ;;  %v1963_v24 = vrot.slane %v1959_v21, 1  ;;  %v5896_v27 = vld [vmem:[%s5003_s24 + $0x78] sm:$0xff] }
 0x235   : >> { %v1964_v49 = vrot.slane %v1960_v45, 1  ;;  %v1404_v62 = vadd.f32 %v5772_v28, %v1362_v47  ;;  %v1405_v14 = vadd.f32 %v5772_v28, %v1363_v56  ;;  %v1475_v13 = vadd.f32 %v1473_v10, %v1429_v44 }
 0x236   : >> { %v1497_v15 = vpop.permute.xlu1 %1496  ;;  %v1495_v30 = vpop.permute.xlu0 %1494  ;;  %v1468_v4 = vadd.f32 %v1466_v26, %v1417_v40  ;;  %v1445_v58 = vadd.f32 %v5811_v46, %v1396_v43  ;;  %v1444_v5 = vadd.f32 %v5813_v59, %v1395_v8  ;;  %v2088_v41 = vmul.f32 %v5896_v27, %v2087_v2 }
 0x237   : >> { %v1461_v31 = vadd.f32 %v5827_v48, %v1405_v14  ;;  %v1460_v32 = vadd.f32 %v5829_v37, %v1404_v62  ;;  %v1977_v28 = vsel %vm840_vm6, %v1975_v38, %v1976_v55  ;;  %v1965_v46 = vsel %vm840_vm6, %v1963_v24, %v1964_v49 }
 0x238   : >> { %2035 = vrot.lane.b32.xlu1 %v2030_v54, %s6967_s2  ;;  %2033 = vrot.lane.b32.xlu0 %v2029_v34, %s6967_s2  ;;  %v2079_v59 = vmul.f32 %v5896_v27, %v2078_v17  ;;  %v2120_v10 = vstv %s7013_s4  ;;  %v1488_v26 = vadd.f32 %v1484_v22, %v1445_v58  ;;  %v1487_v6 = vadd.f32 %v1482_v7, %v1444_v5  ;;  %v5910_v54 = vld [vmem:[%s5003_s24 + $0x80] sm:$0x3]  ;;  %s7020_s4 = sld [smem:[#allocation116_spill]] }
 0x239   : >> { %v1501_v48 = vadd.f32 %v1497_v15, %v1461_v31  ;;  %v1500_v37 = vadd.f32 %v1495_v30, %v1460_v32  ;;  %v2090_v57 = vrot.slane %v2088_v41, 7  ;;  %v2122_v22 = vmul.f32 %v5910_v54, %v2120_v10 }
 0x23a   : >> { %v1523_v29 = vpop.permute.xlu1 %1522  ;;  %v1511_v0 = vpop.permute.xlu0 %1510  ;;  %v2081_v20 = vrot.slane %v2079_v59, 7  ;;  %v2121_v7 = vmul.f32 %v5896_v27, %v2120_v10  ;;  %v2021_v34 = vstv %s7014_s7  ;;  %v2014_v11 = vstv %s7015_s16  ;;  %s7021_s7 = sld [smem:[#allocation115_spill]]  ;;  %s7022_s16 = sld [smem:[#allocation118_spill]] }
 0x23b   : >> { %v1525_v36 = vadd.f32 %v1523_v29, %v1475_v13  ;;  %v1513_v16 = vadd.f32 %v1511_v0, %v1468_v4  ;;  %v2136_v1 = vstv %s7016_s3  ;;  %v2022_v21 = vmul.f32 %v5864_v9, %v2021_v34  ;;  %s7023_s3 = sld [smem:[#allocation76_spill]] }
 0x23c   : >> { %2048 = vrot.lane.b32.xlu1 %v2043_v52, %s6967_s2  ;;  %2046 = vrot.lane.b32.xlu0 %v2042_v63, %s6967_s2  ;;  %v2015_v45 = vmul.f32 %v5864_v9, %v2014_v11  ;;  %v2126_v39 = vrot.slane %v2122_v22, 1  ;;  %v2125_v50 = vrot.slane %v2121_v7, 1  ;;  %v2138_v38 = vmul.f32 %v5910_v54, %v2136_v1 }
 0x23d   : >> { %v2137_v2 = vmul.f32 %v5896_v27, %v2136_v1  ;;  %v2066_v53 = vstv %s7017_s6  ;;  %v2054_v30 = vstv %s7018_s8  ;;  %v2166_v41 = vstv %s7019_s11  ;;  %s7024_s6 = sld [smem:[#allocation75_spill]]  ;;  %s7025_s8 = sld [smem:[#allocation166_spill]] }
 0x23e   : >> { %v1540_v3 = vpop.permute.xlu1 %1539  ;;  %v1531_v25 = vpop.permute.xlu0 %1530  ;;  %v2127_v23 = vsel %vm840_vm6, %v2125_v50, %v2126_v39  ;;  %v2067_v56 = vmul.f32 %v5864_v9, %v2066_v53  ;;  %v2068_v33 = vmul.f32 %v5860_v61, %v2066_v53  ;;  %v2142_v47 = vrot.slane %v2138_v38, 1  ;;  %s7026_s11 = sld [smem:[#allocation167_spill]]  ;;  %v3853_v38 = vld [vmem:[%s5003_s24 + $0xa8] sm:$0xff] }
 0x23f   : >> { %v1542_v42 = vadd.f32 %v1540_v3, %v1500_v37  ;;  %v1543_v51 = vadd.f32 %v1540_v3, %v1501_v48  ;;  %v1533_v19 = vadd.f32 %v1531_v25, %v1487_v6  ;;  %v1534_v35 = vadd.f32 %v1531_v25, %v1488_v26  ;;  %v5947_v26 = vld [vmem:[%s5003_s24 + $0x98] sm:$0x3]  ;;  %v5953_v48 = vld [vmem:[%s5003_s24 + $0x90] sm:$0xff] }
 0x240   : >> { %1978 = vrot.lane.b32.xlu1 %v1977_v28, %s6967_s2  ;;  %1966 = vrot.lane.b32.xlu0 %v1965_v46, %s6967_s2  ;;  %v2141_v44 = vrot.slane %v2137_v2, 1  ;;  %v2055_v40 = vmul.f32 %v5864_v9, %v2054_v30  ;;  %v2056_v8 = vmul.f32 %v5860_v61, %v2054_v30  ;;  %v2071_v14 = vrot.slane %v2067_v56, 2 }
 0x241   : >> { %v2072_v4 = vrot.slane %v2068_v33, 2  ;;  %v2096_v46 = vstv %s7021_s7  ;;  %v2168_v6 = vmul.f32 %v5947_v26, %v2166_v41  ;;  %v2167_v37 = vmul.f32 %v5953_v48, %v2166_v41  ;;  %s7028_s7 = sld [smem:[#allocation73_spill]] }
 0x242   : >> { %v1565_v60 = vpop.permute.xlu1 %1564  ;;  %v1553_v18 = vpop.permute.xlu0 %1552  ;;  %v2143_v13 = vsel %vm840_vm6, %v2141_v44, %v2142_v47  ;;  %v2059_v58 = vrot.slane %v2055_v40, 2  ;;  %v2060_v5 = vrot.slane %v2056_v8, 2 }
 0x243   : >> { %v1567_v52 = vadd.f32 %v1565_v60, %v1525_v36  ;;  %v1555_v63 = vadd.f32 %v1553_v18, %v1513_v16  ;;  %v2073_v31 = vsel %vm801_vm5, %v2071_v14, %v2072_v4  ;;  %v2108_v36 = vstv %s7020_s4  ;;  %s7027_s4 = sld [smem:[#allocation74_spill]] }
 0x244   : >> { %2091 = vrot.lane.b32.xlu1 %v2090_v57, %s6967_s2  ;;  %2082 = vrot.lane.b32.xlu0 %v2081_v20, %s6967_s2  ;;  %v2061_v32 = vsel %vm801_vm5, %v2059_v58, %v2060_v5  ;;  %v2109_v3 = vmul.f32 %v5896_v27, %v2108_v36  ;;  %v2110_v25 = vmul.f32 %v5910_v54, %v2108_v36  ;;  %v2274_v44 = vstv %s7026_s11  ;;  %s2302_s11 = scalar_lea.vmem %s4982_s5, %s4998_s29 [#allocation14] }
 0x246   : >> { %v1579_v12 = vpop.permute.xlu1 %1578  ;;  %v1577_v15 = vpop.permute.xlu0 %1576  ;;  %v2113_v11 = vrot.slane %v2109_v3, 1  ;;  %v2114_v60 = vrot.slane %v2110_v25, 1 }
 0x247   : >> { %v1583_v55 = vadd.f32 %v1579_v12, %v1534_v35  ;;  %v1582_v17 = vadd.f32 %v1577_v15, %v1533_v19  ;;  %v2098_v19 = vmul.f32 %v5910_v54, %v2096_v46  ;;  %v2152_v8 = vstv %s7028_s7  ;;  %s3294_s7 = scalar_lea.vmem [#allocation3], %s4998_s29 }
 0x248   : >> { %2024 = vrot.lane.b32.xlu1 %v2022_v21, %s6967_s2  ;;  %2017 = vrot.lane.b32.xlu0 %v2015_v45, %s6967_s2  ;;  %v2115_v12 = vsel %vm840_vm6, %v2113_v11, %v2114_v60 }
 0x249   : >> { %v2102_v1 = vrot.slane %v2098_v19, 1  ;;  %v2159_v40 = vstv %s7027_s4  ;;  %s4112_s4 = smov 1  }
 0x24a   : >> { %v1595_v43 = vpop.permute.xlu1 %1594  ;;  %v1593_v24 = vpop.permute.xlu0 %1592  ;;  %v2160_v5 = vmul.f32 %v5953_v48, %v2159_v40 }
 0x24b   : >> { %v1599_v49 = vadd.f32 %v1595_v43, %v1543_v51  ;;  %v1598_v62 = vadd.f32 %v1593_v24, %v1542_v42  ;;  %v2179_v42 = vstv %s7022_s16  ;;  %v2097_v51 = vmul.f32 %v5896_v27, %v2096_v46  ;;  %s7029_s16 = sld [smem:[#allocation165_spill]]  ;;  %v3854_v43 = vld [vmem:[%s5003_s24 + $0xb0] sm:$0x3]  ;;  %s7031_s24 = sld [smem:[#allocation120_spill]] }
 0x24c   : >> { %2130 = vrot.lane.b32.xlu1 %v2126_v39, %s6967_s2  ;;  %2128 = vrot.lane.b32.xlu0 %v2127_v23, %s6967_s2  ;;  %v2181_v7 = vmul.f32 %v5947_v26, %v2179_v42  ;;  %v2180_v34 = vmul.f32 %v5953_v48, %v2179_v42  ;;  %v2225_v27 = vstv %s7023_s3  ;;  %s7030_s3 = sld [smem:[#allocation164_spill]]  ;;  %v2276_v58 = vmul.f32 %v3854_v43, %v2274_v44 }
 0x24d   : >> { %v2101_v18 = vrot.slane %v2097_v51, 1  ;;  %v2226_v2 = vmul.f32 %v3853_v38, %v2225_v27 }
 0x24e   : >> { %v1611_v9 = vpop.permute.xlu1 %1610  ;;  %v1604_v61 = vpop.permute.xlu0 %1603 }
 0x24f   : >> { %v5935_v29 = vadd.f32 %v1611_v9, %v1567_v52  ;;  %v5937_v0 = vadd.f32 %v1604_v61, %v1555_v63  ;;  %v2216_v52 = vstv %s7024_s6  ;;  %v2103_v15 = vsel %vm840_vm6, %v2101_v18, %v2102_v1  ;;  %s7032_s6 = sld [smem:[#allocation119_spill]] }
 0x250   : >> { %2146 = vrot.lane.b32.xlu1 %v2142_v47, %s6967_s2  ;;  %2144 = vrot.lane.b32.xlu0 %v2143_v13, %s6967_s2  ;;  %v2217_v53 = vmul.f32 %v3853_v38, %v2216_v52  ;;  %v2228_v33 = vrot.slane %v2226_v2, 7  ;;  %v2153_v9 = vmul.f32 %v5953_v48, %v2152_v8  ;;  %v2275_v61 = vmul.f32 %v3853_v38, %v2274_v44 }
 0x251   : >> { %v2204_v41 = vstv %s7029_s16  ;;  %s6023_s16 = smov (%p772_p7), 0  }
 0x252   : >> { %v1622_v16 = vpop.permute.xlu1 %1621  ;;  %v1620_v28 = vpop.permute.xlu0 %1619  ;;  %v2219_v47 = vrot.slane %v2217_v53, 7  ;;  %v2192_v36 = vstv %s7030_s3  ;;  %v2206_v3 = vmul.f32 %v5947_v26, %v2204_v41 }
 0x253   : >> { %v1626_v59 = vadd.f32 %v1622_v16, %v1583_v55  ;;  %v1625_v10 = vadd.f32 %v1620_v28, %v1582_v17  ;;  %v2258_v17 = vstv %s7025_s8  ;;  %v2193_v25 = vmul.f32 %v5953_v48, %v2192_v36  ;;  %s7034_s8 = sld [smem:[#allocation168_spill]] }
 0x254   : >> { %2074 = vrot.lane.b32.xlu1 %v2073_v31, %s6967_s2  ;;  %2062 = vrot.lane.b32.xlu0 %v2061_v32, %s6967_s2  ;;  %v2260_v24 = vmul.f32 %v3854_v43, %v2258_v17  ;;  %v2194_v42 = vmul.f32 %v5947_v26, %v2192_v36 }
 0x255   : >> { %v2197_v11 = vrot.slane %v2193_v25, 2 }
 0x256   : >> { %v1635_v35 = vpop.permute.xlu1 %1634  ;;  %v1633_v57 = vpop.permute.xlu0 %1632  ;;  %v2264_v31 = vrot.slane %v2260_v24, 1 }
 0x257   : >> { %v1639_v20 = vadd.f32 %v1635_v35, %v1599_v49  ;;  %v1638_v22 = vadd.f32 %v1633_v57, %v1598_v62  ;;  %v2259_v49 = vmul.f32 %v3853_v38, %v2258_v17  ;;  %v2246_v35 = vstv %s7031_s24 }
 0x258   : >> { %2173 = vrot.lane.b32.xlu1 %v2168_v6, %s6967_s2  ;;  %2171 = vrot.lane.b32.xlu0 %v2167_v37, %s6967_s2  ;;  %v2205_v6 = vmul.f32 %v5953_v48, %v2204_v41  ;;  %v2279_v37 = vrot.slane %v2275_v61, 1  ;;  %v2198_v48 = vrot.slane %v2194_v42, 2  ;;  %v2247_v60 = vmul.f32 %v3853_v38, %v2246_v35 }
 0x259   : >> { %v2263_v32 = vrot.slane %v2259_v49, 1  ;;  %v2248_v26 = vmul.f32 %v3854_v43, %v2246_v35 }
 0x25a   : >> { %v1678_v54 = vpop.permute.xlu1 %1677  ;;  %v1669_v63 = vpop.permute.xlu0 %1668 }
 0x25b   : >> { %v1680_v21 = vadd.f32 %v1678_v54, %v1638_v22  ;;  %v1681_v45 = vadd.f32 %v1678_v54, %v1639_v20  ;;  %v1671_v39 = vadd.f32 %v1669_v63, %v1625_v10  ;;  %v1672_v50 = vadd.f32 %v1669_v63, %v1626_v59 }
 0x25c   : >> { %2186 = vrot.lane.b32.xlu1 %v2181_v7, %s6967_s2  ;;  %2184 = vrot.lane.b32.xlu0 %v2180_v34, %s6967_s2  ;;  %v2280_v10 = vrot.slane %v2276_v58, 1  ;;  %v2265_v51 = vsel %vm840_vm6, %v2263_v32, %v2264_v31  ;;  %v2209_v22 = vrot.slane %v2205_v6, 2  ;;  %v2210_v34 = vrot.slane %v2206_v3, 2 }
 0x25e   : >> { %v1717_v30 = vpop.permute.xlu1 %1716  ;;  %v1715_v55 = vpop.permute.xlu0 %1714  ;;  %v2281_v7 = vsel %vm840_vm6, %v2279_v37, %v2280_v10 }
 0x25f   : >> { %v1721_v23 = vadd.f32 %v1717_v30, %v1672_v50  ;;  %v1720_v56 = vadd.f32 %v1715_v55, %v1671_v39  ;;  %v2251_v39 = vrot.slane %v2247_v60, 1  ;;  %v2252_v50 = vrot.slane %v2248_v26, 1 }
 0x260   : >> { %2116 = vrot.lane.b32.xlu1 %v2115_v12, %s6967_s2  ;;  %2104 = vrot.lane.b32.xlu0 %v2103_v15, %s6967_s2 }
 0x261   : >> { %v2253_v55 = vsel %vm840_vm6, %v2251_v39, %v2252_v50 }
 0x262   : >> { %v1733_v62 = vpop.permute.xlu1 %1732  ;;  %v1731_v14 = vpop.permute.xlu0 %1730 }
 0x263   : >> { %v1737_v13 = vadd.f32 %v1733_v62, %v1681_v45  ;;  %v1736_v4 = vadd.f32 %v1731_v14, %v1680_v21  ;;  %v2211_v21 = vsel %vm801_vm5, %v2209_v22, %v2210_v34  ;;  %v2199_v45 = vsel %vm801_vm5, %v2197_v11, %v2198_v48 }
 0x264   : >> { %2229 = vrot.lane.b32.xlu1 %v2228_v33, %s6967_s2  ;;  %2220 = vrot.lane.b32.xlu0 %v2219_v47, %s6967_s2 }
 0x266   : >> { %v1661_v16 = vpop.permute.xlu1 %1660  ;;  %v1649_v28 = vpop.permute.xlu0 %1648 }
 0x267   : >> { %v1663_v46 = vadd.f32 %v1661_v16, %v5935_v29  ;;  %v1651_v59 = vadd.f32 %v1649_v28, %v5937_v0  ;;  %v2234_v0 = vstv %s7032_s6 }
 0x268   : >> { %2162 = vrot.lane.b32.xlu1 %v2160_v5, %s6967_s2  ;;  %2155 = vrot.lane.b32.xlu0 %v2153_v9, %s6967_s2  ;;  %v2235_v18 = vmul.f32 %v3853_v38, %v2234_v0  ;;  %v2236_v1 = vmul.f32 %v3854_v43, %v2234_v0 }
 0x26a   : >> { %v1760_v19 = vpop.permute.xlu1 %1759  ;;  %v1758_v29 = vpop.permute.xlu0 %1757  ;;  %v2239_v2 = vrot.slane %v2235_v18, 1  ;;  %v2240_v53 = vrot.slane %v2236_v1, 1 }
 0x26b   : >> { %v1764_v57 = vadd.f32 %v1760_v19, %v1721_v23  ;;  %v1763_v20 = vadd.f32 %v1758_v29, %v1720_v56 }
 0x26c   : >> { %2268 = vrot.lane.b32.xlu1 %v2264_v31, %s6967_s2  ;;  %2266 = vrot.lane.b32.xlu0 %v2265_v51, %s6967_s2  ;;  %v2241_v17 = vsel %vm840_vm6, %v2239_v2, %v2240_v53 }
 0x26e   : >> { %v1773_v27 = vpop.permute.xlu1 %1772  ;;  %v1771_v52 = vpop.permute.xlu0 %1770 }
 0x26f   : >> { %v1777_v54 = vadd.f32 %v1773_v27, %v1737_v13  ;;  %v1776_v63 = vadd.f32 %v1771_v52, %v1736_v4 }
 0x270   : >> { %2284 = vrot.lane.b32.xlu1 %v2280_v10, %s6967_s2  ;;  %2282 = vrot.lane.b32.xlu0 %v2281_v7, %s6967_s2 }
 0x272   : >> { %v1703_v12 = vpop.permute.xlu1 %1702  ;;  %v1691_v15 = vpop.permute.xlu0 %1690 }
 0x273   : >> { %v1705_v38 = vadd.f32 %v1703_v12, %v1663_v46  ;;  %v1693_v30 = vadd.f32 %v1691_v15, %v1651_v59 }
 0x274   : >> { %2212 = vrot.lane.b32.xlu1 %v2211_v21, %s6967_s2  ;;  %2200 = vrot.lane.b32.xlu0 %v2199_v45, %s6967_s2 }
 0x276   : >> { %v1816_v23 = vpop.permute.xlu1 %1815  ;;  %v1807_v56 = vpop.permute.xlu0 %1806 }
 0x277   : >> { %v1818_v33 = vadd.f32 %v1816_v23, %v1776_v63  ;;  %v1819_v47 = vadd.f32 %v1816_v23, %v1777_v54  ;;  %v1809_v44 = vadd.f32 %v1807_v56, %v1763_v20  ;;  %v1810_v40 = vadd.f32 %v1807_v56, %v1764_v57 }
 0x278   : >> { %2254 = vrot.lane.b32.xlu1 %v2253_v55, %s6967_s2  ;;  %2242 = vrot.lane.b32.xlu0 %v2241_v17, %s6967_s2  ;;  %s7033_s2 = sld [smem:[#allocation169_spill]] }
 0x27a   : >> { %v1749_v8 = vpop.permute.xlu1 %1748  ;;  %v1742_v43 = vpop.permute.xlu0 %1741 }
 0x27b   : >> { %v1751_v24 = vadd.f32 %v1749_v8, %v1705_v38  ;;  %v1744_v49 = vadd.f32 %v1742_v43, %v1693_v30 }
 0x27e   : >> { %v1855_v62 = vpop.permute.xlu1 %1854  ;;  %v1853_v14 = vpop.permute.xlu0 %1852 }
 0x27f   : >> { %v1859_v13 = vadd.f32 %v1855_v62, %v1810_v40  ;;  %v1858_v4 = vadd.f32 %v1853_v14, %v1809_v44 }
 0x282   : >> { %v1871_v58 = vpop.permute.xlu1 %1870  ;;  %v1869_v5 = vpop.permute.xlu0 %1868 }
 0x283   : >> { %v1875_v9 = vadd.f32 %v1871_v58, %v1819_v47  ;;  %v1874_v61 = vadd.f32 %v1869_v5, %v1818_v33 }
 0x286   : >> { %v1799_v41 = vpop.permute.xlu1 %1798  ;;  %v1787_v31 = vpop.permute.xlu0 %1786 }
 0x287   : >> { %v1801_v32 = vadd.f32 %v1799_v41, %v1751_v24  ;;  %v1789_v36 = vadd.f32 %v1787_v31, %v1744_v49 }
 0x28a   : >> { %v1898_v16 = vpop.permute.xlu1 %1897  ;;  %v1896_v28 = vpop.permute.xlu0 %1895 }
 0x28b   : >> { %v1902_v46 = vadd.f32 %v1898_v16, %v1859_v13  ;;  %v1901_v59 = vadd.f32 %v1896_v28, %v1858_v4 }
 0x28e   : >> { %v1911_v10 = vpop.permute.xlu1 %1910  ;;  %v1909_v6 = vpop.permute.xlu0 %1908 }
 0x28f   : >> { %v1915_v37 = vadd.f32 %v1911_v10, %v1875_v9  ;;  %v1914_v3 = vadd.f32 %v1909_v6, %v1874_v61 }
 0x292   : >> { %v1841_v25 = vpop.permute.xlu1 %1840  ;;  %v1829_v42 = vpop.permute.xlu0 %1828 }
 0x293   : >> { %v1843_v51 = vadd.f32 %v1841_v25, %v1801_v32  ;;  %v1831_v19 = vadd.f32 %v1829_v42, %v1789_v36 }
 0x296   : >> { %v1954_v29 = vpop.permute.xlu1 %1953  ;;  %v1945_v35 = vpop.permute.xlu0 %1944 }
 0x297   : >> { %v1956_v0 = vadd.f32 %v1954_v29, %v1914_v3  ;;  %v1957_v57 = vadd.f32 %v1954_v29, %v1915_v37  ;;  %v1947_v20 = vadd.f32 %v1945_v35, %v1901_v59  ;;  %v1948_v22 = vadd.f32 %v1945_v35, %v1902_v46 }
 0x29a   : >> { %v1887_v7 = vpop.permute.xlu1 %1886  ;;  %v1880_v34 = vpop.permute.xlu0 %1879 }
 0x29b   : >> { %v1889_v11 = vadd.f32 %v1887_v7, %v1843_v51  ;;  %v1882_v48 = vadd.f32 %v1880_v34, %v1831_v19 }
 0x29e   : >> { %v1993_v60 = vpop.permute.xlu1 %1992  ;;  %v1991_v26 = vpop.permute.xlu0 %1990 }
 0x29f   : >> { %v1997_v24 = vadd.f32 %v1993_v60, %v1948_v22  ;;  %v1996_v49 = vadd.f32 %v1991_v26, %v1947_v20 }
 0x2a2   : >> { %v2009_v18 = vpop.permute.xlu1 %2008  ;;  %v2007_v1 = vpop.permute.xlu0 %2006 }
 0x2a3   : >> { %v2013_v58 = vadd.f32 %v2009_v18, %v1957_v57  ;;  %v2012_v5 = vadd.f32 %v2007_v1, %v1956_v0 }
 0x2a6   : >> { %v1937_v27 = vpop.permute.xlu1 %1936  ;;  %v1925_v52 = vpop.permute.xlu0 %1924 }
 0x2a7   : >> { %v1939_v37 = vadd.f32 %v1937_v27, %v1889_v11  ;;  %v1927_v3 = vadd.f32 %v1925_v52, %v1882_v48 }
 0x2aa   : >> { %v2036_v54 = vpop.permute.xlu1 %2035  ;;  %v2034_v63 = vpop.permute.xlu0 %2033 }
 0x2ab   : >> { %v2040_v62 = vadd.f32 %v2036_v54, %v1997_v24  ;;  %v2039_v14 = vadd.f32 %v2034_v63, %v1996_v49  ;;  %v2319_v24 = vstv %s7033_s2 }
 0x2ae   : >> { %v2049_v21 = vpop.permute.xlu1 %2048  ;;  %v2047_v45 = vpop.permute.xlu0 %2046 }
 0x2af   : >> { %v2053_v41 = vadd.f32 %v2049_v21, %v2013_v58  ;;  %v2052_v31 = vadd.f32 %v2047_v45, %v2012_v5 }
 0x2b2   : >> { %v1979_v39 = vpop.permute.xlu1 %1978  ;;  %v1967_v50 = vpop.permute.xlu0 %1966 }
 0x2b3   : >> { %v1981_v29 = vadd.f32 %v1979_v39, %v1939_v37  ;;  %v1969_v35 = vadd.f32 %v1967_v50, %v1927_v3 }
 0x2b6   : >> { %v2092_v2 = vpop.permute.xlu1 %2091  ;;  %v2083_v53 = vpop.permute.xlu0 %2082 }
 0x2b7   : >> { %v2085_v9 = vadd.f32 %v2083_v53, %v2039_v14  ;;  %v2086_v61 = vadd.f32 %v2083_v53, %v2040_v62  ;;  %v2094_v46 = vadd.f32 %v2092_v2, %v2052_v31  ;;  %v2095_v59 = vadd.f32 %v2092_v2, %v2053_v41 }
 0x2ba   : >> { %v2025_v12 = vpop.permute.xlu1 %2024  ;;  %v2018_v15 = vpop.permute.xlu0 %2017 }
 0x2bb   : >> { %v2027_v60 = vadd.f32 %v2025_v12, %v1981_v29  ;;  %v2020_v26 = vadd.f32 %v2018_v15, %v1969_v35 }
 0x2be   : >> { %v2131_v38 = vpop.permute.xlu1 %2130  ;;  %v2129_v30 = vpop.permute.xlu0 %2128 }
 0x2bf   : >> { %v2135_v32 = vadd.f32 %v2131_v38, %v2086_v61  ;;  %v2134_v36 = vadd.f32 %v2129_v30, %v2085_v9 }
 0x2c2   : >> { %v2147_v55 = vpop.permute.xlu1 %2146  ;;  %v2145_v17 = vpop.permute.xlu0 %2144 }
 0x2c3   : >> { %v2151_v25 = vadd.f32 %v2147_v55, %v2095_v59  ;;  %v2150_v42 = vadd.f32 %v2145_v17, %v2094_v46 }
 0x2c6   : >> { %v2075_v23 = vpop.permute.xlu1 %2074  ;;  %v2063_v56 = vpop.permute.xlu0 %2062 }
 0x2c7   : >> { %v2077_v11 = vadd.f32 %v2075_v23, %v2027_v60  ;;  %v2065_v52 = vadd.f32 %v2063_v56, %v2020_v26 }
 0x2ca   : >> { %v2174_v33 = vpop.permute.xlu1 %2173  ;;  %v2172_v47 = vpop.permute.xlu0 %2171 }
 0x2cb   : >> { %v2178_v10 = vadd.f32 %v2174_v33, %v2135_v32  ;;  %v2177_v6 = vadd.f32 %v2172_v47, %v2134_v36 }
 0x2ce   : >> { %v2187_v44 = vpop.permute.xlu1 %2186  ;;  %v2185_v40 = vpop.permute.xlu0 %2184 }
 0x2cf   : >> { %v2191_v20 = vadd.f32 %v2187_v44, %v2151_v25  ;;  %v2190_v22 = vadd.f32 %v2185_v40, %v2150_v42 }
 0x2d2   : >> { %v2117_v8 = vpop.permute.xlu1 %2116  ;;  %v2105_v43 = vpop.permute.xlu0 %2104 }
 0x2d3   : >> { %v2119_v50 = vadd.f32 %v2117_v8, %v2077_v11  ;;  %v2107_v2 = vadd.f32 %v2105_v43, %v2065_v52  ;;  %v2297_v8 = vstv %s7034_s8 }
 0x2d6   : >> { %v2230_v13 = vpop.permute.xlu1 %2229  ;;  %v2221_v4 = vpop.permute.xlu0 %2220 }
 0x2d7   : >> { %v2223_v51 = vadd.f32 %v2221_v4, %v2177_v6  ;;  %v2224_v19 = vadd.f32 %v2221_v4, %v2178_v10  ;;  %v2232_v18 = vadd.f32 %v2230_v13, %v2190_v22  ;;  %v2233_v1 = vadd.f32 %v2230_v13, %v2191_v20 }
 0x2da   : >> { %v2163_v16 = vpop.permute.xlu1 %2162  ;;  %v2156_v28 = vpop.permute.xlu0 %2155 }
 0x2db   : >> { %v2165_v30 = vadd.f32 %v2163_v16, %v2119_v50  ;;  %v2158_v55 = vadd.f32 %v2156_v28, %v2107_v2 }
 0x2de   : >> { %v2269_v0 = vpop.permute.xlu1 %2268  ;;  %v2267_v57 = vpop.permute.xlu0 %2266 }
 0x2df   : >> { %v2273_v7 = vadd.f32 %v2269_v0, %v2224_v19  ;;  %v2272_v34 = vadd.f32 %v2267_v57, %v2223_v51 }
 0x2e1   : >> { %v2293_v54 = vrot.slane %v2273_v7, 1  ;;  %v2292_v63 = vrot.slane %v2272_v34, 1 }
 0x2e2   : >> { %v2285_v48 = vpop.permute.xlu1 %2284  ;;  %v2283_v27 = vpop.permute.xlu0 %2282 }
 0x2e3   : >> { %v2289_v21 = vadd.f32 %v2285_v48, %v2233_v1  ;;  %v2288_v45 = vadd.f32 %v2283_v27, %v2232_v18  ;;  %v2294_v39 = vsel %vm840_vm6, %v2292_v63, %v2293_v54 }
 0x2e5   : >> { %v2315_v53 = vrot.slane %v2289_v21, 1  ;;  %v2314_v38 = vrot.slane %v2288_v45, 1 }
 0x2e6   : >> { %v2213_v12 = vpop.permute.xlu1 %2212  ;;  %v2201_v15 = vpop.permute.xlu0 %2200 }
 0x2e7   : >> { %v2316_v17 = vsel %vm840_vm6, %v2314_v38, %v2315_v53  ;;  %v2215_v23 = vadd.f32 %v2213_v12, %v2165_v30  ;;  %v2203_v56 = vadd.f32 %v2201_v15, %v2158_v55 }
 0x2ea   : >> { %v2255_v33 = vpop.permute.xlu1 %2254  ;;  %v2243_v47 = vpop.permute.xlu0 %2242 }
 0x2eb   : >> { %v2257_v44 = vadd.f32 %v2255_v33, %v2215_v23  ;;  %v2245_v40 = vadd.f32 %v2243_v47, %v2203_v56 }
 0x2ed   : >> { %v2318_v49 = vadd.f32 %v2316_v17, %v2257_v44  ;;  %v2296_v43 = vadd.f32 %v2294_v39, %v2245_v40 }
 0x2ef   : >> { %v2320_v62 = vadd.f32 %v2319_v24, %v2318_v49  ;;  %v2298_v14 = vadd.f32 %v2297_v8, %v2296_v43 }
 0x2f1   : >> { %vm2321_vm8 = vcmp.gt.f32.partialorder %v2320_v62, 0.0  ;;  %v2322_v13 = vmul.f32 0.1, %v2320_v62  ;;  %vm2299_vm9 = vcmp.gt.f32.partialorder %v2298_v14, 0.0  ;;  %v2300_v4 = vmul.f32 0.1, %v2298_v14 }
 0x2f3   : >> { %v2323_v58 = vsel %vm2321_vm8, %v2320_v62, %v2322_v13  ;;  %v2301_v5 = vsel %vm2299_vm9, %v2298_v14, %v2300_v4 }
 0x2f4   : >> { %2328 = vrot.lane.b32.xlu1 %v2323_v58, %s4112_s4  ;;  %3690 = vst.msk [vmem:[%s2302_s11 + $0x10] sm:$0xff] %vm2303_vm7, %v2323_v58  ;;  %2307 = vrot.lane.b32.xlu0 %v2301_v5, %s4112_s4  ;;  %2304 = vst.msk [vmem:[%s2302_s11] sm:$0xff] %vm2303_vm7, %v2301_v5 }
 0x361   : > { %774 = sbr.rel (!%p772_p7) target bundleno = 371 (0x173), region = 166 }
 0x366   : >> { %v2329_v9 = vpop.permute.xlu1 %2328  ;;  %v2308_v61 = vpop.permute.xlu0 %2307 }
 0x367   : >> { %3692 = vst.msk [vmem:[%s3294_s7 + $0x19] sm:$0xff] %vm531_vm4, %v2329_v9  ;;  %3688 = vst.msk [vmem:[%s3294_s7 + $0x1] sm:$0xff] %vm531_vm4, %v2308_v61 }
 0x368 LB: >> { %s7035_s3 = sld [smem:[#allocation180_spill]]  ;;  %s7036_s24 = sld [smem:[#allocation178_spill]]  ;;  %v2592_v29 = vstv %s4880_s22  ;;  %v2630_v35 = vstv %s4928_s13  ;;  %v2618_v0 = vstv %s4926_s0  ;;  %s4099_s16 = sphi %s6023_s16, %s2339_s16  }
 0x369   : >> { %s7037_s6 = sld [smem:[#allocation181_spill]]  ;;  %s7038_s2 = sld [smem:[#allocation179_spill]] }
 0x36a   : >> { %s7039_s29 = sld [smem:[#allocation202_spill]]  ;;  %s6029_s8 = sshll.u32 %s4099_s16, 3 }
 0x36b   : >> { %s6034_s17 = scalar_lea.vmem [#allocation3], %s6029_s8  ;;  %s7040_s25 = sld [smem:[#allocation203_spill]] }
 0x36c   : >> { %s4113_s26 = smov 127   ;;  %s7041_s27 = sld [smem:[#allocation204_spill]] }
 0x36d   : >> { %s7042_s19 = sld [smem:[#allocation226_spill]]  ;;  %s7043_s18 = sld [smem:[#allocation225_spill]] }
 0x36e   : >> { %v2552_v41 = vstv %s7035_s3  ;;  %v2538_v31 = vstv %s7036_s24  ;;  %v6037_v32 = vld [vmem:[%s6034_s17] sm:$0xff]  ;;  %v6048_v6 = vld [vmem:[%s6034_s17 + $0x8] sm:$0x3]  ;;  %s7044_s20 = sld [smem:[#allocation183_spill]]  ;;  %s7045_s21 = sld [smem:[#allocation182_spill]] }
 0x36f   : >> { %v2559_v36 = vstv %s7037_s6  ;;  %v2545_v16 = vstv %s7038_s2  ;;  %v2553_v28 = vmul.f32 %v2552_v41, %v6037_v32  ;;  %v2539_v46 = vmul.f32 %v2538_v31, %v6037_v32  ;;  %s7046_s23 = sld [smem:[#allocation185_spill]]  ;;  %s7047_s30 = sld [smem:[#allocation184_spill]]  ;;  %v6089_v23 = vld [vmem:[%s6034_s17 + $0x18] sm:$0xff]  ;;  %v6101_v49 = vld [vmem:[%s6034_s17 + $0x20] sm:$0x3] }
 0x370   : >> { %v2560_v59 = vmul.f32 %v2559_v36, %v6037_v32  ;;  %v2546_v10 = vmul.f32 %v2545_v16, %v6037_v32  ;;  %v2566_v37 = vstv %s7039_s29  ;;  %v2594_v20 = vmul.f32 %v2592_v29, %v6048_v6  ;;  %s7048_s10 = sld [smem:[#allocation206_spill]]  ;;  %s7049_s14 = sld [smem:[#allocation205_spill]] }
 0x371   : >> { %2555 = vrot.lane.b32.xlu1 %v2553_v28, %s4113_s26  ;;  %2541 = vrot.lane.b32.xlu0 %v2539_v46, %s4113_s26  ;;  %v2568_v3 = vmul.f32 %v2566_v37, %v6048_v6  ;;  %v2567_v25 = vmul.f32 %v2566_v37, %v6037_v32  ;;  %v2579_v42 = vstv %s7040_s25  ;;  %v2593_v22 = vmul.f32 %v2592_v29, %v6037_v32  ;;  %s7050_s9 = sld [smem:[#allocation208_spill]]  ;;  %s7051_s11 = sld [smem:[#allocation207_spill]] }
 0x372   : >> { %v2581_v51 = vmul.f32 %v2579_v42, %v6048_v6  ;;  %v2580_v19 = vmul.f32 %v2579_v42, %v6037_v32  ;;  %v2605_v57 = vstv %s7041_s27  ;;  %v2631_v7 = vmul.f32 %v2630_v35, %v6037_v32  ;;  %s7052_s4 = sld [smem:[#allocation227_spill]]  ;;  %s7053_s7 = sld [smem:[#allocation228_spill]] }
 0x373   : >> { %v2654_v34 = vstv %s7042_s19  ;;  %v2632_v60 = vmul.f32 %v2630_v35, %v6048_v6  ;;  %v2619_v26 = vmul.f32 %v2618_v0, %v6037_v32  ;;  %v2620_v18 = vmul.f32 %v2618_v0, %v6048_v6  ;;  %s7054_s3 = sld [smem:[#allocation209_spill]]  ;;  %s7055_s24 = sld [smem:[#allocation229_spill]] }
 0x374   : >> { %v2642_v1 = vstv %s7043_s18  ;;  %v2607_v54 = vmul.f32 %v2605_v57, %v6048_v6  ;;  %v2606_v63 = vmul.f32 %v2605_v57, %v6037_v32  ;;  %v2635_v11 = vrot.slane %v2631_v7, 2  ;;  %s7056_s6 = sld [smem:[#allocation230_spill]]  ;;  %s4114_s29 = smov 126  }
 0x375   : >> { %2562 = vrot.lane.b32.xlu1 %v2560_v59, %s4113_s26  ;;  %2548 = vrot.lane.b32.xlu0 %v2546_v10, %s4113_s26  ;;  %v2655_v48 = vmul.f32 %v2654_v34, %v6037_v32  ;;  %v2656_v27 = vmul.f32 %v2654_v34, %v6048_v6  ;;  %v2643_v52 = vmul.f32 %v2642_v1, %v6037_v32  ;;  %v2636_v21 = vrot.slane %v2632_v60, 2  ;;  %s7057_s2 = sld [smem:[#allocation190_spill]]  ;;  %s7058_s17 = sld [smem:[#allocation186_spill]] }
 0x376   : >> { %v2623_v45 = vrot.slane %v2619_v26, 2  ;;  %v2624_v39 = vrot.slane %v2620_v18, 2  ;;  %v2644_v50 = vmul.f32 %v2642_v1, %v6048_v6  ;;  %v2675_v38 = vstv %s7044_s20  ;;  %s7059_s25 = sld [smem:[#allocation210_spill]]  ;;  %s7060_s27 = sld [smem:[#allocation211_spill]] }
 0x377   : >> { %v2659_v2 = vrot.slane %v2655_v48, 2  ;;  %v2660_v53 = vrot.slane %v2656_v27, 2  ;;  %v2666_v12 = vstv %s7045_s21  ;;  %v2637_v15 = vsel %vm801_vm5, %v2635_v11, %v2636_v21  ;;  %s7061_s19 = sld [smem:[#allocation212_spill]]  ;;  %s7062_s18 = sld [smem:[#allocation231_spill]] }
 0x378   : >> { %v2625_v30 = vsel %vm801_vm5, %v2623_v45, %v2624_v39  ;;  %v2647_v55 = vrot.slane %v2643_v52, 2  ;;  %v2648_v17 = vrot.slane %v2644_v50, 2  ;;  %v2693_v56 = vstv %s7046_s23  ;;  %s7063_s20 = sld [smem:[#allocation191_spill]]  ;;  %s7065_s21 = sld [smem:[#allocation192_spill]] }
 0x379   : >> { %2573 = vrot.lane.b32.xlu1 %v2568_v3, %s4113_s26  ;;  %2571 = vrot.lane.b32.xlu0 %v2567_v25, %s4113_s26  ;;  %v2676_v33 = vmul.f32 %v6089_v23, %v2675_v38  ;;  %v2667_v47 = vmul.f32 %v6089_v23, %v2666_v12  ;;  %v2684_v44 = vstv %s7047_s30  ;;  %v2714_v40 = vstv %s7048_s10  ;;  %s7066_s23 = sld [smem:[#allocation213_spill]]  ;;  %s7067_s30 = sld [smem:[#allocation188_spill]] }
 0x37a   : >> { %v2661_v24 = vsel %vm801_vm5, %v2659_v2, %v2660_v53  ;;  %v2649_v8 = vsel %vm801_vm5, %v2647_v55, %v2648_v17  ;;  %v2702_v43 = vstv %s7049_s14  ;;  %v2694_v62 = vmul.f32 %v6089_v23, %v2693_v56  ;;  %s7068_s10 = sld [smem:[#allocation187_spill]]  ;;  %s2339_s16 = sadd.s32 1, %s4099_s16  }
 0x37b   : >> { %v2685_v14 = vmul.f32 %v6089_v23, %v2684_v44  ;;  %v2715_v13 = vmul.f32 %v6089_v23, %v2714_v40  ;;  %v2678_v4 = vrot.slane %v2676_v33, 7  ;;  %v2669_v58 = vrot.slane %v2667_v47, 7  ;;  %s7069_s14 = sld [smem:[#allocation235_spill]]  ;;  %p2336_p12 = scmp.ge.s32.totalorder %s2339_s16, 2  }
 0x37c   : >> { %v2716_v5 = vmul.f32 %v6101_v49, %v2714_v40  ;;  %v2703_v9 = vmul.f32 %v6089_v23, %v2702_v43  ;;  %v2704_v61 = vmul.f32 %v6101_v49, %v2702_v43  ;;  %v2738_v41 = vstv %s7050_s9  ;;  %s7070_s9 = sld [smem:[#allocation189_spill]]  ;;  %s4115_s0 = smov (%p2336_p12), [#allocation15]  }
 0x37d   : >> { %2586 = vrot.lane.b32.xlu1 %v2581_v51, %s4113_s26  ;;  %2584 = vrot.lane.b32.xlu0 %v2580_v19, %s4113_s26  ;;  %v2726_v31 = vstv %s7051_s11  ;;  %v2696_v36 = vrot.slane %v2694_v62, 7  ;;  %v2687_v16 = vrot.slane %v2685_v14, 7  ;;  %v2719_v28 = vrot.slane %v2715_v13, 1  ;;  %s7071_s11 = sld [smem:[#allocation236_spill]] }
 0x37e   : >> { %v2720_v46 = vrot.slane %v2716_v5, 1  ;;  %v2707_v59 = vrot.slane %v2703_v9, 1  ;;  %v2739_v10 = vmul.f32 %v6089_v23, %v2738_v41  ;;  %v2740_v37 = vmul.f32 %v6101_v49, %v2738_v41 }
 0x37f   : >> { %v2708_v3 = vrot.slane %v2704_v61, 1  ;;  %v2727_v25 = vmul.f32 %v6089_v23, %v2726_v31  ;;  %v2728_v42 = vmul.f32 %v6101_v49, %v2726_v31  ;;  %v2750_v51 = vstv %s7052_s4  ;;  %s7072_s4 = sld [smem:[#allocation237_spill]] }
 0x380   : >> { %v2721_v19 = vsel %vm840_vm6, %v2719_v28, %v2720_v46  ;;  %v2743_v29 = vrot.slane %v2739_v10, 1  ;;  %v2744_v35 = vrot.slane %v2740_v37, 1  ;;  %v2752_v0 = vmul.f32 %v6101_v49, %v2750_v51 }
 0x381   : >> { %2599 = vrot.lane.b32.xlu1 %v2594_v20, %s4113_s26  ;;  %2597 = vrot.lane.b32.xlu0 %v2593_v22, %s4113_s26  ;;  %v2709_v57 = vsel %vm840_vm6, %v2707_v59, %v2708_v3  ;;  %v2731_v20 = vrot.slane %v2727_v25, 1  ;;  %v2732_v22 = vrot.slane %v2728_v42, 1  ;;  %v2751_v7 = vmul.f32 %v6089_v23, %v2750_v51 }
 0x382   : >> { %v2766_v34 = vstv %s7053_s7  ;;  %v2745_v60 = vsel %vm840_vm6, %v2743_v29, %v2744_v35  ;;  %v2756_v26 = vrot.slane %v2752_v0, 1  ;;  %v2842_v48 = vstv %s7054_s3  ;;  %s7073_s7 = sld [smem:[#allocation233_spill]]  ;;  %s7074_s3 = sld [smem:[#allocation232_spill]] }
 0x383   : >> { %v2733_v18 = vsel %vm840_vm6, %v2731_v20, %v2732_v22  ;;  %v2755_v1 = vrot.slane %v2751_v7, 1  ;;  %v2782_v21 = vstv %s7055_s24  ;;  %v2843_v45 = vmul.f32 %v2842_v48, %v6037_v32  ;;  %s7075_s24 = sld [smem:[#allocation219_spill]] }
 0x384   : >> { %v2784_v50 = vmul.f32 %v6101_v49, %v2782_v21  ;;  %v2783_v2 = vmul.f32 %v6089_v23, %v2782_v21  ;;  %v2798_v53 = vstv %s7056_s6  ;;  %v2844_v38 = vmul.f32 %v2842_v48, %v6048_v6  ;;  %s7076_s6 = sld [smem:[#allocation200_spill]] }
 0x385   : >> { %2612 = vrot.lane.b32.xlu1 %v2607_v54, %s4113_s26  ;;  %2610 = vrot.lane.b32.xlu0 %v2606_v63, %s4113_s26  ;;  %v2767_v54 = vmul.f32 %v6089_v23, %v2766_v34  ;;  %v2768_v63 = vmul.f32 %v6101_v49, %v2766_v34  ;;  %v2757_v11 = vsel %vm840_vm6, %v2755_v1, %v2756_v26  ;;  %v2942_v47 = vstv %s7057_s2  ;;  %s7077_s2 = sld [smem:[#allocation214_spill]] }
 0x386   : >> { %v2788_v12 = vrot.slane %v2784_v50, 1  ;;  %v2799_v55 = vmul.f32 %v6089_v23, %v2798_v53  ;;  %v2943_v44 = vmul.f32 %v6089_v23, %v2942_v47  ;;  %v2855_v62 = vstv %s7059_s25  ;;  %s7079_s25 = sld [smem:[#allocation172_spill]] }
 0x387   : >> { %v2771_v27 = vrot.slane %v2767_v54, 1  ;;  %v2772_v52 = vrot.slane %v2768_v63, 1  ;;  %v2857_v14 = vmul.f32 %v2855_v62, %v6048_v6  ;;  %v2856_v13 = vmul.f32 %v2855_v62, %v6037_v32 }
 0x388   : >> { %v2803_v33 = vrot.slane %v2799_v55, 1  ;;  %v2945_v43 = vrot.slane %v2943_v44, 7  ;;  %v2881_v61 = vstv %s7061_s19  ;;  %v2951_v46 = vstv %s7063_s20  ;;  %s7081_s19 = sld [smem:[#allocation216_spill]]  ;;  %s7083_s20 = sld [smem:[#allocation217_spill]] }
 0x389   : >> { %2638 = vrot.lane.b32.xlu1 %v2637_v15, %s4113_s26  ;;  %2626 = vrot.lane.b32.xlu0 %v2625_v30, %s4113_s26  ;;  %v2773_v39 = vsel %vm840_vm6, %v2771_v27, %v2772_v52  ;;  %v2787_v15 = vrot.slane %v2783_v2, 1  ;;  %v2800_v30 = vmul.f32 %v6101_v49, %v2798_v53  ;;  %v2882_v28 = vmul.f32 %v2881_v61, %v6037_v32 }
 0x38a   : >> { %v2952_v25 = vmul.f32 %v6089_v23, %v2951_v46  ;;  %v2960_v35 = vstv %s7065_s21  ;;  %v2978_v7 = vstv %s7066_s23  ;;  %v3042_v63 = vstv %s7069_s14  ;;  %s7085_s21 = sld [smem:[#allocation198_spill]]  ;;  %s7086_s23 = sld [smem:[#allocation218_spill]] }
 0x38b   : >> { %v2789_v17 = vsel %vm840_vm6, %v2787_v15, %v2788_v12  ;;  %v2804_v56 = vrot.slane %v2800_v30, 1  ;;  %v2961_v20 = vmul.f32 %v6089_v23, %v2960_v35  ;;  %v2979_v1 = vmul.f32 %v6089_v23, %v2978_v7  ;;  %s7089_s14 = sld [smem:[#allocation173_spill]] }
 0x38c   : >> { %v2954_v0 = vrot.slane %v2952_v25, 7  ;;  %v2980_v54 = vmul.f32 %v6101_v49, %v2978_v7  ;;  %v2835_v27 = vstv %s7070_s9  ;;  %v3058_v50 = vstv %s7071_s11  ;;  %s7090_s9 = sld [smem:[#allocation171_spill]]  ;;  %s7091_s11 = sld [smem:[#allocation175_spill]] }
 0x38d   : >> { %2662 = vrot.lane.b32.xlu1 %v2661_v24, %s4113_s26  ;;  %2650 = vrot.lane.b32.xlu0 %v2649_v8, %s4113_s26  ;;  %v2805_v40 = vsel %vm840_vm6, %v2803_v33, %v2804_v56  ;;  %v2814_v24 = vstv %s7058_s17  ;;  %v2983_v21 = vrot.slane %v2979_v1, 1  ;;  %v2836_v2 = vmul.f32 %v2835_v27, %v6037_v32  ;;  %s7078_s17 = sld [smem:[#allocation234_spill]] }
 0x38e   : >> { %v2815_v8 = vmul.f32 %v2814_v24, %v6037_v32  ;;  %v3060_v53 = vmul.f32 %v6101_v49, %v3058_v50  ;;  %v3074_v55 = vstv %s7072_s4  ;;  %v2906_v47 = vstv %s7074_s3  ;;  %s7092_s4 = sld [smem:[#allocation222_spill]]  ;;  %s7094_s3 = sld [smem:[#allocation176_spill]] }
 0x38f   : >> { %v3075_v24 = vmul.f32 %v6089_v23, %v3074_v55  ;;  %v2470_v62 = vstv %s7076_s6  ;;  %s7097_s6 = sld [smem:[#allocation177_spill]] }
 0x391   : >> { %2679 = vrot.lane.b32.xlu1 %v2678_v4, %s4113_s26  ;;  %2670 = vrot.lane.b32.xlu0 %v2669_v58, %s4113_s26  ;;  %v2868_v4 = vstv %s7060_s27  ;;  %v3026_v58 = vstv %s4954_s12  ;;  %s7080_s27 = sld [smem:[#allocation170_spill]]  ;;  %s3949_s12 = sshll.u32 (%p2336_p12), %s4115_s0, 4  ;;  %s3950_s12 = int_to_ptr.vmem [resolvable:$false] %s3949_s12 }
 0x392   : >> { %v2870_v5 = vmul.f32 %v2868_v4, %v6048_v6  ;;  %v2869_v9 = vmul.f32 %v2868_v4, %v6037_v32  ;;  %v3028_v41 = vmul.f32 %v6101_v49, %v3026_v58  ;;  %v3027_v31 = vmul.f32 %v6089_v23, %v3026_v58 }
 0x393   : >> { %v2908_v4 = vmul.f32 %v2906_v47, %v6048_v6 }
 0x394   : >> { %v3032_v59 = vrot.slane %v3028_v41, 1  ;;  %v3031_v10 = vrot.slane %v3027_v31, 1  ;;  %v2930_v31 = vstv %s7078_s17  ;;  %s7099_s17 = sld [smem:[#allocation197_spill]] }
 0x395   : >> { %2697 = vrot.lane.b32.xlu1 %v2696_v36, %s4113_s26  ;;  %2688 = vrot.lane.b32.xlu0 %v2687_v16, %s4113_s26  ;;  %v2894_v36 = vstv %s7062_s18  ;;  %v2883_v16 = vmul.f32 %v2881_v61, %v6048_v6  ;;  %v3079_v61 = vrot.slane %v3075_v24, 1  ;;  %s7082_s18 = sld [smem:[#allocation215_spill]] }
 0x396   : >> { %v2895_v37 = vmul.f32 %v2894_v36, %v6037_v32  ;;  %v2896_v3 = vmul.f32 %v2894_v36, %v6048_v6  ;;  %v3033_v51 = vsel %vm840_vm6, %v3031_v10, %v3032_v59  ;;  %v2350_v36 = vstv %s7079_s25  ;;  %s7100_s25 = sld [smem:[#allocation174_spill]] }
 0x397   : >> { %v6256_v35 = vmul.f32 %v2350_v36, %v6037_v32 }
 0x398   : >> { %v2900_v29 = vrot.slane %v2896_v3, 2 }
 0x399   : >> { %2722 = vrot.lane.b32.xlu1 %v2721_v19, %s4113_s26  ;;  %2710 = vrot.lane.b32.xlu0 %v2709_v57, %s4113_s26  ;;  %v2899_v19 = vrot.slane %v2895_v37, 2  ;;  %v2912_v37 = vrot.slane %v2908_v4, 2 }
 0x39b   : >> { %v2901_v22 = vsel %vm801_vm5, %v2899_v19, %v2900_v29  ;;  %v3002_v7 = vstv %s7082_s18  ;;  %s7103_s18 = sld [smem:[#allocation238_spill]] }
 0x39d   : >> { %2746 = vrot.lane.b32.xlu1 %v2745_v60, %s4113_s26  ;;  %2734 = vrot.lane.b32.xlu0 %v2733_v18, %s4113_s26  ;;  %v2963_v60 = vrot.slane %v2961_v20, 7  ;;  %v2821_v18 = vstv %s7068_s10  ;;  %v2344_v20 = vstv %s7080_s27  ;;  %s7088_s10 = sld [smem:[#allocation199_spill]]  ;;  %s7101_s27 = sld [smem:[#allocation221_spill]] }
 0x39e   : >> { %v2822_v48 = vmul.f32 %v2821_v18, %v6037_v32 }
 0x3a1   : >> { %2760 = vrot.lane.b32.xlu1 %v2756_v26, %s4113_s26  ;;  %2758 = vrot.lane.b32.xlu0 %v2757_v11, %s4113_s26  ;;  %v2828_v26 = vstv %s7067_s30  ;;  %s7087_s30 = sld [smem:[#allocation201_spill]] }
 0x3a2   : >> { %v2829_v11 = vmul.f32 %v2828_v26, %v6037_v32 }
 0x3a5   : >> { %2847 = vrot.lane.b32.xlu1 %v2843_v45, %s4114_s29  ;;  %2774 = vrot.lane.b32.xlu0 %v2773_v39, %s4113_s26  ;;  %v2984_v45 = vrot.slane %v2980_v54, 1  ;;  %v3043_v39 = vmul.f32 %v6089_v23, %v3042_v63 }
 0x3a7   : >> { %v3047_v30 = vrot.slane %v3043_v39, 1 }
 0x3a9   : >> { %2776 = vrot.lane.b32.xlu1 %v2772_v52, %s4113_s26  ;;  %2849 = vrot.lane.b32.xlu0 %v2844_v38, %s4114_s29  ;;  %v3044_v52 = vmul.f32 %v6101_v49, %v3042_v63  ;;  %v3059_v38 = vmul.f32 %v6089_v23, %v3058_v50 }
 0x3ab   : >> { %v3048_v15 = vrot.slane %v3044_v52, 1  ;;  %v3063_v33 = vrot.slane %v3059_v38, 1  ;;  %v3003_v52 = vmul.f32 %v6089_v23, %v3002_v7 }
 0x3ad   : >> { %2792 = vrot.lane.b32.xlu1 %v2788_v12, %s4113_s26  ;;  %2790 = vrot.lane.b32.xlu0 %v2789_v17, %s4113_s26  ;;  %v2985_v12 = vsel %vm840_vm6, %v2983_v21, %v2984_v45  ;;  %v2918_v17 = vstv %s7073_s7  ;;  %v3049_v44 = vsel %vm840_vm6, %v3047_v30, %v3048_v15  ;;  %v3004_v21 = vmul.f32 %v6101_v49, %v3002_v7  ;;  %s7093_s7 = sld [smem:[#allocation195_spill]] }
 0x3ae   : >> { %v3007_v24 = vrot.slane %v3003_v52, 1 }
 0x3b1   : >> { %2808 = vrot.lane.b32.xlu1 %v2804_v56, %s4113_s26  ;;  %2806 = vrot.lane.b32.xlu0 %v2805_v40, %s4113_s26  ;;  %s7064_s26 = sld [smem:[#allocation193_spill]]  ;;  %v3064_v56 = vrot.slane %v3060_v53, 1  ;;  %v3076_v40 = vmul.f32 %v6101_v49, %v3074_v55  ;;  %v2449_v53 = vstv %s7085_s21  ;;  %v2387_v55 = vstv %s7086_s23  ;;  %s7106_s23 = sld [smem:[#allocation240_spill]] }
 0x3b2   : >> { %s7105_s21 = sld [smem:[#allocation241_spill]] }
 0x3b3   : >> { %v3065_v58 = vsel %vm840_vm6, %v3063_v33, %v3064_v56 }
 0x3b5   : >> { %2817 = vrot.lane.b32.xlu1 %v2815_v8, %s4114_s29  ;;  %2946 = vrot.lane.b32.xlu0 %v2945_v43, %s4114_s29  ;;  %v2397_v8 = vstv %s7075_s24  ;;  %v2919_v43 = vmul.f32 %v2918_v17, %v6037_v32  ;;  %s7095_s24 = sld [smem:[#allocation223_spill]] }
 0x3b6   : >> { %v6237_v41 = vmul.f32 %v2397_v8, %v6048_v6 }
 0x3b7   : >> { %v2969_v42 = vstv %s7064_s26  ;;  %v2923_v46 = vrot.slane %v2919_v43, 2  ;;  %s7084_s26 = sld [smem:[#allocation220_spill]] }
 0x3b8   : >> { %v2970_v57 = vmul.f32 %v6089_v23, %v2969_v42  ;;  %v2931_v42 = vmul.f32 %v2930_v31, %v6037_v32  ;;  %v2403_v29 = vrot.slane %v6237_v41, 2  ;;  %v2353_v41 = vstv %s7089_s14 }
 0x3b9   : >> { %2862 = vrot.lane.b32.xlu1 %v2857_v14, %s4114_s29  ;;  %2860 = vrot.lane.b32.xlu0 %v2856_v13, %s4114_s29  ;;  %v2920_v14 = vmul.f32 %v2918_v17, %v6048_v6  ;;  %v2907_v13 = vmul.f32 %v2906_v47, %v6037_v32  ;;  %v2480_v17 = vstv %s7087_s30  ;;  %s3113_s30 = scalar_lea.vmem %s4990_s1, %s6029_s8 [#allocation17] }
 0x3ba   : >> { %v2972_v34 = vrot.slane %v2970_v57, 7  ;;  %v2935_v63 = vrot.slane %v2931_v42, 2  ;;  %v2481_v36 = vmul.f32 %v6089_v23, %v2480_v17  ;;  %v2347_v42 = vstv %s7090_s9 }
 0x3bb   : >> { %v2911_v10 = vrot.slane %v2907_v13, 2  ;;  %v2460_v13 = vstv %s7088_s10 }
 0x3bd   : >> { %2875 = vrot.lane.b32.xlu1 %v2870_v5, %s4114_s29  ;;  %2873 = vrot.lane.b32.xlu0 %v2869_v9, %s4114_s29  ;;  %v2990_v5 = vstv %s7077_s2  ;;  %v3080_v9 = vrot.slane %v3076_v40, 1  ;;  %v2913_v26 = vsel %vm801_vm5, %v2911_v10, %v2912_v37  ;;  %v2407_v18 = vstv %s7084_s26  ;;  %s7098_s2 = sld [smem:[#allocation224_spill]]  ;;  %s7104_s26 = sld [smem:[#allocation239_spill]] }
 0x3be   : >> { %v2991_v3 = vmul.f32 %v6089_v23, %v2990_v5  ;;  %v2992_v25 = vmul.f32 %v6101_v49, %v2990_v5  ;;  %v2409_v30 = vmul.f32 %v2407_v18, %v6048_v6  ;;  %v2450_v5 = vmul.f32 %v6089_v23, %v2449_v53 }
 0x3bf   : >> { %v3081_v19 = vsel %vm840_vm6, %v3079_v61, %v3080_v9  ;;  %v2462_v10 = vmul.f32 %v6101_v49, %v2460_v13 }
 0x3c0   : >> { %v2995_v1 = vrot.slane %v2991_v3, 1  ;;  %v2996_v54 = vrot.slane %v2992_v25, 1 }
 0x3c1   : >> { %2888 = vrot.lane.b32.xlu1 %v2883_v16, %s4114_s29  ;;  %2886 = vrot.lane.b32.xlu0 %v2882_v28, %s4114_s29  ;;  %v6242_v16 = vmul.f32 %v6089_v23, %v2470_v62  ;;  %v6245_v28 = vmul.f32 %v6101_v49, %v2470_v62 }
 0x3c2   : >> { %v2997_v33 = vsel %vm840_vm6, %v2995_v1, %v2996_v54  ;;  %v2502_v1 = vstv %s7092_s4 }
 0x3c3   : >> { %v2475_v57 = vrot.slane %v6242_v16, 1  ;;  %v2476_v45 = vrot.slane %v6245_v28, 1  ;;  %v2482_v28 = vmul.f32 %v6101_v49, %v2480_v17  ;;  %v2503_v16 = vmul.f32 %v6089_v23, %v2502_v1 }
 0x3c5   : >> { %3036 = vrot.lane.b32.xlu1 %v3032_v59, %s4114_s29  ;;  %3034 = vrot.lane.b32.xlu0 %v3033_v51, %s4114_s29  ;;  %v2924_v59 = vrot.slane %v2920_v14, 2  ;;  %v2932_v51 = vmul.f32 %v2930_v31, %v6048_v6  ;;  %v2389_v14 = vmul.f32 %v2387_v55, %v6048_v6  ;;  %v2413_v31 = vrot.slane %v2409_v30, 2 }
 0x3c6   : >> { %v2504_v30 = vmul.f32 %v6101_v49, %v2502_v1 }
 0x3c9   : >> { %2955 = vrot.lane.b32.xlu1 %v2954_v0, %s4114_s29  ;;  %2902 = vrot.lane.b32.xlu0 %v2901_v22, %s4114_s29  ;;  %v2398_v0 = vmul.f32 %v2397_v8, %v6037_v32  ;;  %v3014_v22 = vstv %s7081_s19  ;;  %v3008_v8 = vrot.slane %v3004_v21, 1  ;;  %s7102_s19 = sld [smem:[#allocation194_spill]] }
 0x3ca   : >> { %v3016_v27 = vmul.f32 %v6101_v49, %v3014_v22 }
 0x3cb   : >> { %v2402_v50 = vrot.slane %v2398_v0, 2  ;;  %v3009_v3 = vsel %vm840_vm6, %v3007_v24, %v3008_v8 }
 0x3cc   : >> { %v3020_v40 = vrot.slane %v3016_v27, 1  ;;  %v2477_v27 = vsel %vm840_vm6, %v2475_v57, %v2476_v45 }
 0x3cd   : >> { %2973 = vrot.lane.b32.xlu1 %v2972_v34, %s4114_s29  ;;  %2964 = vrot.lane.b32.xlu0 %v2963_v60, %s4114_s29  ;;  %v2376_v34 = vstv %s7083_s20  ;;  %v2925_v60 = vsel %vm801_vm5, %v2923_v46, %v2924_v59  ;;  %v2461_v59 = vmul.f32 %v6089_v23, %v2460_v13  ;;  %v2404_v25 = vsel %vm801_vm5, %v2402_v50, %v2403_v29  ;;  %s3101_s20 = scalar_lea.vmem %s4986_s28, %s6029_s8 [#allocation15]  ;;  %s7107_s8 = sld [smem:[#allocation28_spill]] (%p2336_p12) }
 0x3ce   : >> { %v2428_v29 = vstv %s7091_s11  ;;  %v2406_v52 = vadd.f32 %v2404_v25, %v6256_v35  ;;  %v2508_v13 = vrot.slane %v2504_v30, 1  ;;  %s3179_s11 = sshll.u32 (%p2336_p12), %s4986_s28, 4  ;;  %s3951_s28 = scalar_lea.vmem (%p2336_p12), %s3950_s12, 512  ;;  %s6442_s11 = int_to_ptr.vmem [resolvable:$true] %s3179_s11 }
 0x3cf   : > { %s3945_s16 = scalar_lea.vmem (%p2336_p12), %s6442_s11, 256  ;;  %p3952_p10 = scmp.lt.s32.totalorder (%p2336_p12), %s6442_s11, %s3950_s12 }
 0x3d0   : > { %p3946_p9 = scmp.ne.s32.totalorder (%p2336_p12), %s6442_s11, %s3945_s16  ;;  %p3953_p0 = scmp.lt.s32.totalorder (%p2336_p12), %s3951_s28, %s3945_s16 }
 0x3d1   : >> { %2831 = vrot.lane.b32.xlu1 %v2829_v11, %s4114_s29  ;;  %2824 = vrot.lane.b32.xlu0 %v2822_v48, %s4114_s29  ;;  %v2936_v11 = vrot.slane %v2932_v51, 2  ;;  %v3015_v48 = vmul.f32 %v6089_v23, %v3014_v22  ;;  %v2393_v51 = vrot.slane %v2389_v14, 2  ;;  %v2455_v22 = vrot.slane %v2450_v5, 1 }
 0x3d2   : >> { %v2526_v5 = vstv %s7098_s2  ;;  %p3947_p3 = pnand (%p2336_p12), %p3946_p9, %p4274_p6  ;;  %p3954_p11 = por (%p2336_p12), %p3953_p0, %p3952_p10 }
 0x3d3   : >> { %v2937_v47 = vsel %vm801_vm5, %v2935_v63, %v2936_v11  ;;  %v2465_v63 = vrot.slane %v2461_v59, 1  ;;  %v2466_v11 = vrot.slane %v2462_v10, 1  ;;  %s3144_s14 = sand.u32 (%p2336_p12), 1, %s7107_s8   ;;  %s3712_s9 = sshll.u32 (%p2336_p12), %s7107_s8, 8 }
 0x3d4   : > { %p3948_p13 = pneg (%p2336_p12), %p3947_p3 }
 0x3d5   : >> { %2986 = vrot.lane.b32.xlu1 %v2985_v12, %s4114_s29  ;;  %2838 = vrot.lane.b32.xlu0 %v2836_v2, %s4114_s29  ;;  %v2378_v2 = vmul.f32 %v2376_v34, %v6048_v6  ;;  %v6281_v12 = vmul.f32 %v2344_v20, %v6037_v32  ;;  %v2467_v17 = vsel %vm840_vm6, %v2465_v63, %v2466_v11 }
 0x3d6   : > { %p3955_p1 = pnand (%p2336_p12), %p3954_p11, %p3948_p13 }
 0x3d7   : >> { %v2383_v43 = vrot.slane %v2378_v2, 2 }
 0x3d9   : >> { %3052 = vrot.lane.b32.xlu1 %v3048_v15, %s4114_s29  ;;  %3050 = vrot.lane.b32.xlu0 %v3049_v44, %s4114_s29  ;;  %v2377_v15 = vmul.f32 %v2376_v34, %v6037_v32  ;;  %v3019_v44 = vrot.slane %v3015_v48, 1  ;;  %v2348_v48 = vmul.f32 %v2347_v42, %v6037_v32  ;;  %v2527_v42 = vmul.f32 %v6089_v23, %v2526_v5 }
 0x3db   : >> { %v2382_v61 = vrot.slane %v2377_v15, 2  ;;  %v3021_v37 = vsel %vm840_vm6, %v3019_v44, %v3020_v40  ;;  %v2429_v15 = vmul.f32 %v6089_v23, %v2428_v29 }
 0x3dd   : >> { %3068 = vrot.lane.b32.xlu1 %v3064_v56, %s4114_s29  ;;  %3066 = vrot.lane.b32.xlu0 %v3065_v58, %s4114_s29  ;;  %v2408_v56 = vmul.f32 %v2407_v18, %v6037_v32  ;;  %v2388_v58 = vmul.f32 %v2387_v55, %v6037_v32  ;;  %v2384_v34 = vsel %vm801_vm5, %v2382_v61, %v2383_v43  ;;  %v2486_v18 = vrot.slane %v2482_v28, 1 }
 0x3de   : >> { %v2386_v45 = vadd.f32 %v2384_v34, %v6281_v12  ;;  %v2442_v12 = vstv %s7097_s6  ;;  %v2431_v14 = vrot.slane %v2429_v15, 7 }
 0x3df   : >> { %v2412_v46 = vrot.slane %v2408_v56, 2  ;;  %v2443_v59 = vmul.f32 %v6089_v23, %v2442_v12 }
 0x3e1   : >> { %3084 = vrot.lane.b32.xlu1 %v3080_v9, %s4114_s29  ;;  %3082 = vrot.lane.b32.xlu0 %v3081_v19, %s4114_s29  ;;  %v2451_v9 = vmul.f32 %v6101_v49, %v2449_v53  ;;  %v2392_v19 = vrot.slane %v2388_v58, 2  ;;  %v2414_v54 = vsel %vm801_vm5, %v2412_v46, %v2413_v31  ;;  %v2361_v53 = vstv %s7093_s7 }
 0x3e2   : >> { %v2363_v44 = vmul.f32 %v2361_v53, %v6048_v6  ;;  %v2362_v40 = vmul.f32 %v2361_v53, %v6037_v32  ;;  %v2507_v58 = vrot.slane %v2503_v16, 1  ;;  %v2371_v46 = vstv %s7099_s17 }
 0x3e3   : >> { %v6274_v39 = vpop.permute.xlu1 %2555  ;;  %v6278_v38 = vpop.permute.xlu0 %2541  ;;  %v2456_v7 = vrot.slane %v2451_v9, 1  ;;  %v2394_v21 = vsel %vm801_vm5, %v2392_v19, %v2393_v51  ;;  %v2479_v9 = vadd.f32 %v2477_v27, %v2406_v52  ;;  %v2373_v29 = vmul.f32 %v2371_v46, %v6048_v6 }
 0x3e4   : >> { %v2396_v56 = vadd.f32 %v2394_v21, %v2348_v48  ;;  %v2434_v19 = vadd.f32 %v2431_v14, %v2363_v44  ;;  %v2445_v63 = vrot.slane %v2443_v59, 7  ;;  %v2372_v11 = vmul.f32 %v2371_v46, %v6037_v32 }
 0x3e5   : >> { %2926 = vrot.lane.b32.xlu1 %v2925_v60, %s4114_s29  ;;  %2914 = vrot.lane.b32.xlu0 %v2913_v26, %s4114_s29  ;;  %v2354_v60 = vmul.f32 %v2353_v41, %v6037_v32  ;;  %v2485_v26 = vrot.slane %v2481_v36, 1  ;;  %v2457_v57 = vsel %vm840_vm6, %v2455_v22, %v2456_v7  ;;  %v2509_v22 = vsel %vm840_vm6, %v2507_v58, %v2508_v13 }
 0x3e6   : >> { %v2459_v36 = vadd.f32 %v2457_v57, %v2386_v45  ;;  %v2469_v28 = vadd.f32 %v2467_v17, %v2396_v56  ;;  %v2433_v7 = vadd.f32 %v2431_v14, %v2362_v40  ;;  %v2531_v27 = vrot.slane %v2527_v42, 1 }
 0x3e7   : >> { %v6292_v62 = vpop.permute.xlu1 %2562  ;;  %v6296_v4 = vpop.permute.xlu0 %2548  ;;  %v2487_v35 = vsel %vm840_vm6, %v2485_v26, %v2486_v18  ;;  %v2416_v55 = vadd.f32 %v2414_v54, %v2354_v60  ;;  %v2513_v53 = vadd.f32 %v2508_v13, %v2434_v19  ;;  %v2447_v17 = vadd.f32 %v2445_v63, %v2372_v11 }
 0x3e8   : >> { %v2544_v1 = vadd.f32 %v6278_v38, %v2459_v36  ;;  %v2551_v54 = vadd.f32 %v6296_v4, %v2469_v28  ;;  %v2512_v16 = vadd.f32 %v2509_v22, %v2433_v7  ;;  %v2558_v38 = vadd.f32 %v6274_v39, %v2479_v9 }
 0x3e9   : >> { %2998 = vrot.lane.b32.xlu1 %v2997_v33, %s4114_s29  ;;  %2938 = vrot.lane.b32.xlu0 %v2937_v47, %s4114_s29  ;;  %v2435_v33 = vstv %s7094_s3  ;;  %v2514_v47 = vstv %s7095_s24  ;;  %v2489_v10 = vadd.f32 %v2487_v35, %v2416_v55  ;;  %v2448_v55 = vadd.f32 %v2445_v63, %v2373_v29  ;;  %s7109_s3 = sld [smem:[#allocation256_spill]] (%p2336_p12) }
 0x3ea   : >> { %v2436_v61 = vmul.f32 %v6089_v23, %v2435_v33  ;;  %v2516_v41 = vmul.f32 %v6101_v49, %v2514_v47  ;;  %v2515_v31 = vmul.f32 %v6089_v23, %v2514_v47  ;;  %v2356_v63 = vstv %s7102_s19 }
 0x3eb   : >> { %v6312_v0 = vpop.permute.xlu1 %2573  ;;  %v6314_v20 = vpop.permute.xlu0 %2571  ;;  %v2565_v4 = vadd.f32 %v6292_v62, %v2489_v10 }
 0x3ec   : >> { %v2438_v60 = vrot.slane %v2436_v61, 7  ;;  %v2520_v26 = vrot.slane %v2516_v41, 1  ;;  %v2519_v18 = vrot.slane %v2515_v31, 1 }
 0x3ed   : >> { %3022 = vrot.lane.b32.xlu1 %v3021_v37, %s4114_s29  ;;  %3010 = vrot.lane.b32.xlu0 %v3009_v3, %s4114_s29  ;;  %s7096_s29 = sld [smem:[#allocation196_spill]]  ;;  %v2528_v3 = vmul.f32 %v6101_v49, %v2526_v5 }
 0x3ee   : >> { %v2521_v45 = vsel %vm840_vm6, %v2519_v18, %v2520_v26 }
 0x3ef   : >> { %v6329_v50 = vpop.permute.xlu1 %2586  ;;  %v6331_v2 = vpop.permute.xlu0 %2584  ;;  %v2532_v48 = vrot.slane %v2528_v3, 1  ;;  %s6440_s24 = scalar_lea.hbm (%p2336_p12), %s7109_s3, %s3712_s9 }
 0x3f0   : >> { %v2591_v14 = vadd.f32 %v6329_v50, %v2513_v53  ;;  %v2590_v13 = vadd.f32 %v6331_v2, %v2512_v16 }
 0x3f1   : >> { %v2533_v56 = vsel %vm840_vm6, %v2531_v27, %v2532_v48  ;;  %v2537_v58 = vadd.f32 %v2532_v48, %v2448_v55 }
 0x3f2   : >> { %v2536_v5 = vadd.f32 %v2533_v56, %v2447_v17 }
 0x3f3   : >> { %v2366_v24 = vstv %s7096_s29  ;;  %v6346_v8 = vpop.permute.xlu1 %2599  ;;  %v6348_v43 = vpop.permute.xlu0 %2597  ;;  %s6444_s29 = scalar_lea.sflag (%p2336_p12), [#allocation16], %s3144_s14 }
 0x3f4   : >> { %v2368_v37 = vmul.f32 %v2366_v24, %v6048_v6  ;;  %v2367_v34 = vmul.f32 %v2366_v24, %v6037_v32 }
 0x3f6   : >> { %v2441_v57 = vadd.f32 %v2438_v60, %v2368_v37  ;;  %v2440_v35 = vadd.f32 %v2438_v60, %v2367_v34 }
 0x3f7   : >> { %v2613_v25 = vpop.permute.xlu1 %2612  ;;  %v2611_v51 = vpop.permute.xlu0 %2610 }
 0x3f8   : >> { %v2525_v24 = vadd.f32 %v2520_v26, %v2441_v57  ;;  %v2524_v12 = vadd.f32 %v2521_v45, %v2440_v35  ;;  %v2617_v36 = vadd.f32 %v2613_v25, %v2537_v58  ;;  %v2616_v28 = vadd.f32 %v2611_v51, %v2536_v5 }
 0x3f9   : >> { %v2421_v26 = vstv %s7100_s25 }
 0x3fa   : >> { %v2604_v41 = vadd.f32 %v6346_v8, %v2525_v24  ;;  %v2603_v31 = vadd.f32 %v6348_v43, %v2524_v12 }
 0x3fb   : >> { %v2639_v52 = vpop.permute.xlu1 %2638  ;;  %v2627_v21 = vpop.permute.xlu0 %2626 }
 0x3fc   : >> { %v2641_v15 = vadd.f32 %v2639_v52, %v2551_v54  ;;  %v6366_v30 = vadd.f32 %v2627_v21, %v2544_v1  ;;  %v2490_v1 = vstv %s7101_s27  ;;  %v2422_v54 = vmul.f32 %v6089_v23, %v2421_v26 }
 0x3fd   : >> { %v2492_v11 = vmul.f32 %v6101_v49, %v2490_v1  ;;  %v2491_v48 = vmul.f32 %v6089_v23, %v2490_v1  ;;  %v2358_v21 = vmul.f32 %v2356_v63, %v6048_v6 }
 0x3fe   : >> { %v2424_v53 = vrot.slane %v2422_v54, 7 }
 0x3ff   : >> { %v2663_v33 = vpop.permute.xlu1 %2662  ;;  %v2651_v47 = vpop.permute.xlu0 %2650  ;;  %v2496_v16 = vrot.slane %v2492_v11, 1  ;;  %v2495_v57 = vrot.slane %v2491_v48, 1 }
 0x400   : >> { %v2665_v44 = vadd.f32 %v2663_v33, %v2565_v4  ;;  %v2653_v40 = vadd.f32 %v2651_v47, %v2558_v38  ;;  %v2427_v38 = vadd.f32 %v2424_v53, %v2358_v21 }
 0x401   : >> { %v2497_v55 = vsel %vm840_vm6, %v2495_v57, %v2496_v16 }
 0x402   : >> { %v2501_v49 = vadd.f32 %v2496_v16, %v2427_v38  ;;  %v3097_v38 = vstv %s7103_s18 }
 0x403   : >> { %v2680_v61 = vpop.permute.xlu1 %2679  ;;  %v2671_v39 = vpop.permute.xlu0 %2670 }
 0x404   : >> { %v6374_v9 = vadd.f32 %v2680_v61, %v2590_v13  ;;  %v6376_v62 = vadd.f32 %v2680_v61, %v2591_v14 }
 0x407   : >> { %v2698_v46 = vpop.permute.xlu1 %2697  ;;  %v2689_v59 = vpop.permute.xlu0 %2688 }
 0x408   : >> { %v6380_v50 = vadd.f32 %v2698_v46, %v2616_v28  ;;  %v6382_v2 = vadd.f32 %v2698_v46, %v2617_v36  ;;  %v6384_v10 = vadd.f32 %v2689_v59, %v2603_v31  ;;  %v6386_v37 = vadd.f32 %v2689_v59, %v2604_v41 }
 0x40b   : >> { %v2723_v3 = vpop.permute.xlu1 %2722  ;;  %v2711_v42 = vpop.permute.xlu0 %2710 }
 0x40c   : >> { %v6388_v8 = vadd.f32 %v2723_v3, %v2641_v15  ;;  %v2357_v15 = vmul.f32 %v2356_v63, %v6037_v32 }
 0x40e   : >> { %v2426_v4 = vadd.f32 %v2424_v53, %v2357_v15 }
 0x40f   : >> { %v2747_v43 = vpop.permute.xlu1 %2746  ;;  %v2735_v25 = vpop.permute.xlu0 %2734 }
 0x410   : >> { %v6390_v51 = vadd.f32 %v2747_v43, %v2665_v44  ;;  %v6392_v19 = vadd.f32 %v2735_v25, %v2653_v40  ;;  %v2500_v33 = vadd.f32 %v2497_v55, %v2426_v4  ;;  %v2578_v44 = vadd.f32 %v6312_v0, %v2501_v49 }
 0x412   : >> { %v2577_v6 = vadd.f32 %v6314_v20, %v2500_v33  ;;  %v2674_v12 = vadd.f32 %v2671_v39, %v2578_v44 }
 0x413   : >> { %v2761_v22 = vpop.permute.xlu1 %2760  ;;  %v2759_v7 = vpop.permute.xlu0 %2758 }
 0x414   : >> { %v2673_v24 = vadd.f32 %v2671_v39, %v2577_v6  ;;  %v2765_v14 = vadd.f32 %v2761_v22, %v2674_v12 }
 0x416   : >> { %v2764_v13 = vadd.f32 %v2759_v7, %v2673_v24  ;;  %v2713_v7 = vadd.f32 %v2711_v42, %v6366_v30 }
 0x417   : >> { %v2848_v34 = vpop.permute.xlu1 %2847  ;;  %v2775_v60 = vpop.permute.xlu0 %2774 }
 0x418   : >> { %v2853_v61 = vadd.f32 %v2848_v34, %v2764_v13  ;;  %v2780_v54 = vadd.f32 %v2775_v60, %v6374_v9 }
 0x41b   : >> { %v2777_v18 = vpop.permute.xlu1 %2776  ;;  %v2850_v29 = vpop.permute.xlu0 %2849 }
 0x41c   : >> { %v2854_v41 = vadd.f32 %v2850_v29, %v2765_v14  ;;  %v2781_v63 = vadd.f32 %v2777_v18, %v6376_v62 }
 0x41f   : >> { %v2793_v27 = vpop.permute.xlu1 %2792  ;;  %v2791_v52 = vpop.permute.xlu0 %2790 }
 0x420   : >> { %v2796_v57 = vadd.f32 %v2791_v52, %v6384_v10  ;;  %v2797_v4 = vadd.f32 %v2793_v27, %v6386_v37 }
 0x423   : >> { %v2809_v45 = vpop.permute.xlu1 %2808  ;;  %v2807_v35 = vpop.permute.xlu0 %2806 }
 0x424   : >> { %v2813_v33 = vadd.f32 %v2809_v45, %v6382_v2 }
 0x427   : >> { %v2818_v17 = vpop.permute.xlu1 %2817  ;;  %v2947_v56 = vpop.permute.xlu0 %2946 }
 0x428   : >> { %v2949_v31 = vadd.f32 %v2947_v56, %v2853_v61  ;;  %v2950_v36 = vadd.f32 %v2947_v56, %v2854_v41  ;;  %v2820_v29 = vadd.f32 %v2818_v17, %v2713_v7  ;;  %v3111_v7 = vstv %s7104_s26 }
 0x42b   : >> { %v2863_v23 = vpop.permute.xlu1 %2862  ;;  %v2861_v47 = vpop.permute.xlu0 %2860 }
 0x42c   : >> { %v2867_v53 = vadd.f32 %v2863_v23, %v2781_v63  ;;  %v2866_v15 = vadd.f32 %v2861_v47, %v2780_v54  ;;  %v2812_v23 = vadd.f32 %v2807_v35, %v6380_v50 }
 0x42f   : >> { %v2876_v40 = vpop.permute.xlu1 %2875  ;;  %v2874_v32 = vpop.permute.xlu0 %2873 }
 0x430   : >> { %v2879_v56 = vadd.f32 %v2874_v32, %v2796_v57  ;;  %v2880_v62 = vadd.f32 %v2876_v40, %v2797_v4 }
 0x433   : >> { %v2889_v58 = vpop.permute.xlu1 %2888  ;;  %v2887_v5 = vpop.permute.xlu0 %2886 }
 0x434   : >> { %v2893_v44 = vadd.f32 %v2889_v58, %v2813_v33  ;;  %v2892_v6 = vadd.f32 %v2887_v5, %v2812_v23 }
 0x437   : >> { %v3037_v28 = vpop.permute.xlu1 %3036  ;;  %v3035_v46 = vpop.permute.xlu0 %3034 }
 0x438   : >> { %v3041_v59 = vadd.f32 %v3037_v28, %v2950_v36  ;;  %v3040_v3 = vadd.f32 %v3035_v46, %v2949_v31 }
 0x43a   : >> { %v3093_v43 = vrot.slane %v3041_v59, 1  ;;  %v3092_v0 = vrot.slane %v3040_v3, 1 }
 0x43b   : >> { %v2956_v25 = vpop.permute.xlu1 %2955  ;;  %v2903_v20 = vpop.permute.xlu0 %2902 }
 0x43c   : >> { %v3094_v26 = vsel %vm840_vm6, %v3092_v0, %v3093_v43  ;;  %v2905_v11 = vadd.f32 %v2903_v20, %v2820_v29  ;;  %v2958_v55 = vadd.f32 %v2956_v25, %v2866_v15  ;;  %v2959_v30 = vadd.f32 %v2956_v25, %v2867_v53 }
 0x43d   : >> { %v3134_v15 = vstv %s7105_s21 }
 0x43f   : >> { %v2974_v39 = vpop.permute.xlu1 %2973  ;;  %v2965_v22 = vpop.permute.xlu0 %2964 }
 0x440   : >> { %v2967_v10 = vadd.f32 %v2965_v22, %v2879_v56  ;;  %v2968_v52 = vadd.f32 %v2965_v22, %v2880_v62  ;;  %v2976_v61 = vadd.f32 %v2974_v39, %v2892_v6  ;;  %v2977_v41 = vadd.f32 %v2974_v39, %v2893_v44 }
 0x443   : >> { %v2832_v1 = vpop.permute.xlu1 %2831  ;;  %v2825_v34 = vpop.permute.xlu0 %2824 }
 0x444   : >> { %v2827_v3 = vadd.f32 %v2825_v34, %v6388_v8 }
 0x447   : >> { %v2987_v48 = vpop.permute.xlu1 %2986  ;;  %v2839_v21 = vpop.permute.xlu0 %2838 }
 0x448   : >> { %v2989_v16 = vadd.f32 %v2987_v48, %v2905_v11  ;;  %v2841_v39 = vadd.f32 %v2839_v21, %v6390_v51 }
 0x44a   : >> { %v3096_v42 = vadd.f32 %v3094_v26, %v2989_v16  ;;  %v2834_v26 = vadd.f32 %v2832_v1, %v6392_v19  ;;  %v3122_v16 = vstv %s7106_s23 }
 0x44b   : >> { %v3053_v9 = vpop.permute.xlu1 %3052  ;;  %v3051_v60 = vpop.permute.xlu0 %3050 }
 0x44c   : >> { %v3098_v18 = vadd.f32 %v3097_v38, %v3096_v42  ;;  %v3057_v17 = vadd.f32 %v3053_v9, %v2959_v30  ;;  %v3056_v49 = vadd.f32 %v3051_v60, %v2958_v55 }
 0x44e   : >> { %v3099_v47 = vmax.f32 %v3098_v18, 0.0  ;;  %v3107_v37 = vrot.slane %v3057_v17, 1  ;;  %v3106_v27 = vrot.slane %v3056_v49, 1 }
 0x44f   : >> { %v3069_v32 = vpop.permute.xlu1 %3068  ;;  %v3067_v24 = vpop.permute.xlu0 %3066 }
 0x450   : >> { %v3100_v12 = vadd.f32 1e-10, %v3099_v47  ;;  %v3108_v40 = vsel %vm840_vm6, %v3106_v27, %v3107_v37  ;;  %v3073_v14 = vadd.f32 %v3069_v32, %v2968_v52  ;;  %v3072_v13 = vadd.f32 %v3067_v24, %v2967_v10 }
 0x452   : >> { %3103 = vst.msk [vmem:[%s3101_s20] sm:$0xff] %vm2303_vm7, %v3100_v12  ;;  %v3118_v50 = vrot.slane %v3073_v14, 1  ;;  %v3117_v2 = vrot.slane %v3072_v13, 1 }
 0x453   : >> { %v3085_v45 = vpop.permute.xlu1 %3084  ;;  %v3083_v35 = vpop.permute.xlu0 %3082 }
 0x454   : >> { %v3119_v58 = vsel %vm840_vm6, %v3117_v2, %v3118_v50  ;;  %v3089_v5 = vadd.f32 %v3085_v45, %v2977_v41  ;;  %v3088_v31 = vadd.f32 %v3083_v35, %v2976_v61 }
 0x456   : >> { %v3130_v36 = vrot.slane %v3089_v5, 1  ;;  %v3129_v28 = vrot.slane %v3088_v31, 1 }
 0x457   : >> { %v2927_v46 = vpop.permute.xlu1 %2926  ;;  %v2915_v59 = vpop.permute.xlu0 %2914 }
 0x458   : >> { %v3131_v43 = vsel %vm840_vm6, %v3129_v28, %v3130_v36  ;;  %v2917_v0 = vadd.f32 %v2915_v59, %v2827_v3  ;;  %v2929_v29 = vadd.f32 %v2927_v46, %v2834_v26 }
 0x45b   : >> { %v2999_v25 = vpop.permute.xlu1 %2998  ;;  %v2939_v20 = vpop.permute.xlu0 %2938 }
 0x45c   : >> { %v3001_v22 = vadd.f32 %v2999_v25, %v2917_v0  ;;  %v2941_v63 = vadd.f32 %v2939_v20, %v2841_v39 }
 0x45e   : >> { %v3110_v54 = vadd.f32 %v3108_v40, %v3001_v22 }
 0x45f   : >> { %v3023_v11 = vpop.permute.xlu1 %3022  ;;  %v3011_v48 = vpop.permute.xlu0 %3010 }
 0x460   : >> { %v3112_v8 = vadd.f32 %v3111_v7, %v3110_v54  ;;  %v3025_v34 = vadd.f32 %v3023_v11, %v2941_v63  ;;  %v3013_v53 = vadd.f32 %v3011_v48, %v2929_v29  ;;  %2338 = sbr.rel (!%p2336_p12) target bundleno = 872 (0x368), region = 177 }
 0x462   : >> { %3114 = vst.msk [vmem:[%s3113_s30] sm:$0xff] %vm2303_vm7, %v3112_v8  ;;  %v3133_v57 = vadd.f32 %v3131_v43, %v3025_v34  ;;  %v3121_v38 = vadd.f32 %v3119_v58, %v3013_v53 }
 0x464   : >> { %v3135_v19 = vadd.f32 %v3134_v15, %v3133_v57  ;;  %v3123_v1 = vadd.f32 %v3122_v16, %v3121_v38 }
 0x466   : >> { %3700 = vst.msk [vmem:[%s3113_s30 + $0x20] sm:$0xff] %vm2303_vm7, %v3135_v19  ;;  %3698 = vst.msk [vmem:[%s3113_s30 + $0x10] sm:$0xff] %vm2303_vm7, %v3123_v1 }
 0x467   : > { %3958 = shalt.err (!%p3955_p1)
}
 0x468   : > { %s3959_s13 = scalar_lea.hbm %s6440_s24, 256  ;;  %s3963_s2 = scalar_lea.hbm %s7109_s3, 512 }
 0x469   : > { %p3960_p2 = scmp.ne.s32.totalorder %s6440_s24, %s3959_s13  ;;  %p3964_p8 = scmp.lt.u32.totalorder %s6440_s24, %s7109_s3 }
 0x46a   : > { %p3965_p7 = scmp.lt.u32.totalorder %s3963_s2, %s3959_s13  ;;  %p3967_p9 = scmp.lt.u32.totalorder %s3959_s13, %s6440_s24 }
 0x46b   : > { %p3961_p5 = pnand %p3960_p2, %p4274_p6 }
 0x46c   : > { %p3966_p12 = por %p3965_p7, %p3964_p8 }
 0x46d   : > { %p3962_p4 = pneg %p3961_p5 }
 0x46e   : > { %p3968_p3 = por %p3967_p9, %p3966_p12 }
 0x470   : > { %p3969_p13 = pnand %p3968_p3, %p3962_p4 }
 0x472   : > { %3972 = shalt.err (!%p3969_p13)
}
 0x473   : > { %s4116_s27 = smov 128   ;;  %s4117_s19 = smov 8  }
 0x474   : > { %3734 = dma.vmem_to_hbm [thread:$0]  (%p4274_p6), %s6442_s11, 256, %s6440_s24, %s6444_s29, %s4116_s27, %s4116_s27, %s4117_s19  }
 0x475   : > { %s3711_s18 = sshll.u32 %s7107_s8, 9  ;;  %s7110_s21 = sld [smem:[#allocation255_spill]] }
 0x476   : > { %s3163_s30 = sshll.u32 %s4982_s5, 4  ;;  %s3714_s14 = smul.u32 768, %s7107_s8  ;;  %s6478_s30 = int_to_ptr.vmem [resolvable:$true] %s3163_s30 }
 0x477   : > { %s3140_s9 = scalar_lea.sflag [#allocation6], %s4323_s15  ;;  %s3973_s4 = scalar_lea.vmem %s6478_s30, 512 }
 0x478   : > { %p3974_p10 = scmp.ne.s32.totalorder %s6478_s30, %s3973_s4  ;;  %s4118_s11 = smov [#allocation14]  }
 0x479   : > { %s3977_s7 = sshll.u32 %s4118_s11, 4  ;;  %s3978_s7 = int_to_ptr.vmem [resolvable:$false] %s3977_s7 }
 0x47a   : > { %p3975_p0 = pnand %p3974_p10, %p4274_p6  ;;  %s3979_s24 = scalar_lea.vmem %s3978_s7, 1024 }
 0x47b   : > { %s6475_s23 = scalar_lea.hbm %s7110_s21, %s3711_s18  ;;  %p3980_p1 = scmp.lt.s32.totalorder %s6478_s30, %s3978_s7 }
 0x47c   : > { %p3976_p11 = pneg %p3975_p0  ;;  %p3981_p2 = scmp.lt.s32.totalorder %s3979_s24, %s3973_s4 }
 0x47e   : > { %p3982_p5 = por %p3981_p2, %p3980_p1 }
 0x480   : > { %p3983_p4 = pnand %p3982_p5, %p3976_p11 }
 0x482   : > { %3986 = shalt.err (!%p3983_p4)
}
 0x483   : > { %s3987_s5 = scalar_lea.hbm %s6475_s23, 512  ;;  %s3991_s12 = scalar_lea.hbm %s7110_s21, 1024 }
 0x484   : > { %p3988_p8 = scmp.ne.s32.totalorder %s6475_s23, %s3987_s5  ;;  %p3992_p9 = scmp.lt.u32.totalorder %s6475_s23, %s7110_s21 }
 0x485   : > { %p3993_p3 = scmp.lt.u32.totalorder %s3991_s12, %s3987_s5  ;;  %p3995_p10 = scmp.lt.u32.totalorder %s3987_s5, %s6475_s23 }
 0x486   : > { %p3989_p7 = pnand %p3988_p8, %p4274_p6 }
 0x487   : > { %p3994_p13 = por %p3993_p3, %p3992_p9 }
 0x488   : > { %p3990_p12 = pneg %p3989_p7 }
 0x489   : > { %p3996_p0 = por %p3995_p10, %p3994_p13 }
 0x48b   : > { %p3997_p11 = pnand %p3996_p0, %p3990_p12 }
 0x48d   : > { %4000 = shalt.err (!%p3997_p11)
}
 0x48e   : > { %3733 = dma.vmem_to_hbm [thread:$0]  (%p4274_p6), %s6478_s30, 512, %s6475_s23, %s3140_s9, %s4116_s27, %s4116_s27, %s4117_s19  }
 0x48f   : > { %s7111_s2 = sld [smem:[#allocation257_spill]]  ;;  %s3195_s25 = sshll.u32 %s4990_s1, 4  ;;  %s6516_s25 = int_to_ptr.vmem [resolvable:$true] %s3195_s25 }
 0x490   : > { %s4001_s18 = scalar_lea.vmem %s6516_s25, 768  ;;  %s4119_s15 = smov [#allocation17]  }
 0x491   : > { %p4002_p1 = scmp.ne.s32.totalorder %s6516_s25, %s4001_s18  ;;  %s4005_s20 = sshll.u32 %s4119_s15, 4  ;;  %s4006_s20 = int_to_ptr.vmem [resolvable:$false] %s4005_s20 }
 0x492   : > { %s4007_s8 = scalar_lea.vmem %s4006_s20, 1536  ;;  %p4008_p4 = scmp.lt.s32.totalorder %s6516_s25, %s4006_s20 }
 0x493   : > { %p4003_p2 = pnand %p4002_p1, %p4274_p6  ;;  %p4009_p8 = scmp.lt.s32.totalorder %s4007_s8, %s4001_s18 }
 0x495   : > { %s6513_s17 = scalar_lea.hbm %s7111_s2, %s3714_s14  ;;  %p4004_p5 = pneg %p4003_p2 }
 0x496   : > { %p4010_p7 = por %p4009_p8, %p4008_p4 }
 0x498   : > { %p4011_p12 = pnand %p4010_p7, %p4004_p5 }
 0x49a   : > { %4014 = shalt.err (!%p4011_p12)
}
 0x49b   : > { %s4015_s1 = scalar_lea.hbm %s6513_s17, 768  ;;  %s4019_s30 = scalar_lea.hbm %s7111_s2, 1536 }
 0x49c   : > { %p4016_p9 = scmp.ne.s32.totalorder %s6513_s17, %s4015_s1  ;;  %p4020_p10 = scmp.lt.u32.totalorder %s6513_s17, %s7111_s2 }
 0x49d   : > { %p4021_p0 = scmp.lt.u32.totalorder %s4019_s30, %s4015_s1  ;;  %p4023_p1 = scmp.lt.u32.totalorder %s4015_s1, %s6513_s17 }
 0x49e   : > { %p4017_p3 = pnand %p4016_p9, %p4274_p6 }
 0x49f   : > { %p4022_p11 = por %p4021_p0, %p4020_p10 }
 0x4a0   : > { %p4018_p13 = pneg %p4017_p3 }
 0x4a1   : > { %p4024_p2 = por %p4023_p1, %p4022_p11 }
 0x4a3   : > { %p4025_p5 = pnand %p4024_p2, %p4018_p13 }
 0x4a5   : > { %4028 = shalt.err (!%p4025_p5)
}
 0x4a6   : > { %3735 = dma.vmem_to_hbm [thread:$0]  (%p4274_p6), %s6516_s25, 768, %s6513_s17, %s6444_s29, %s4116_s27, %s4116_s27, %s4117_s19  }
 0x4a7 PF: > { %s7112_s4 = sld [smem:[#allocation24_spill]]  ;;  %s7113_s11 = sld [smem:[#allocation29_spill]] }
 0x4a8   : > { %s7114_s7 = sld [smem:[#allocation27_spill]] }
 0x4ad   : > { %s3210_s24 = sand.u32 1, %s7112_s4   ;;  %p7115_p4 = scmp.ne.s32.totalorder %s7113_s11, 0 }
 0x4ae   : > { %p7116_p8 = scmp.ge.s32.totalorder %s7114_s7, 2  ;;  %s3211_s5 = scalar_lea.sflag [#allocation6], %s3210_s24 }
 0x4b0   : > { %p3757_p7 = pnand %p7116_p8, %p7115_p4 }
 0x4b2   : > { %4070 = dma.done.wait (!%p3757_p7), %s3211_s5, 512  }
 0x4b3   : > { %4072 = vsyncadd (!%p3757_p7), %s3211_s5, 4294966784  ;;  %s7117_s10 = sadd.s32 4294967294, %s7114_s7  }
 0x4b4   : > { %s3219_s16 = sand.u32 1, %s7117_s10  }
 0x4b5   : > { %s3220_s0 = scalar_lea.sflag [#allocation16], %s3219_s16 }
 0x4b6   : > { %4074 = dma.done.wait (!%p3757_p7), %s3220_s0, 1024  }
 0x4b7   : > { %4076 = vsyncadd (!%p3757_p7), %s3220_s0, 4294966272  ;;  %s7118_s27 = sld [smem:[#allocation30_spill]]  ;;  %s7119_s24 = sld [smem:[#allocation25_spill]] }
 0x4b8   : > { %s7120_s25 = sld [smem:[#allocation26_spill]]  ;;  %s7121_s26 = sld [smem:[#allocation31_spill]] }
 0x4bd   : > { %p27_p6 = scmp.ge.s32.totalorder %s7118_s27, 4  }
 0x4bf   :  { %29 = sbr.rel (!%p27_p6) target bundleno = 19 (0x13), region = 188 }
 0x4c6   :  { %3234 = vsyncpa [#allocation5], 1 }
 0x4c7   :  { %3236 = vsyncpa [#allocation5 + $0x1], 1 }
 0x4c8   :  { %3237 = vsyncpa [#allocation6], 1 }
 0x4c9   :  { %3239 = vsyncpa [#allocation6 + $0x1], 1 }
 0x4ca   :  { %3240 = vsyncpa [#allocation16], 1 }
 0x4cb   :  { %3242 = vsyncpa [#allocation16 + $0x1], 1 }
 0x4cc   :  { %3243 = vsyncpa [#allocation7], 1 }
 0x4cd   :  { %3245 = vsyncpa [#allocation7 + $0x1], 1 }
 0x4ce   :  { %3246 = vsyncpa [#allocation10], 1 }
 0x4cf   :  { %3247 = vsyncpa [#allocation13], 1 }

</bundles_post_ra>
